<compile_context>
chip_gen: v7x
topology: tpu7x:2x2x1
jax: 0.10.0
libtpu: 0.0.40
codegen_flags: <defaults>
</compile_context>

<pallas_src>
import jax
import jax.numpy as jnp
from jax import lax
from jax.experimental import pallas as pl
from jax.experimental.pallas import tpu as pltpu


# ----------------------------- Pallas kernel: GRU + FC ----------------------------- #
def gru_fc_kernel(x_ref, wih_ref, bgate_ref, whh_ref, bhn_ref, wfc_ref, bfc_ref,
                  logits_ref, gi_ref):
    """Grid axis 0 streams D-chunks of the input projection ("arbitrary" reduction).

    x_ref:      (S*BP, dk)  bf16  step-major flattened hidden-state chunk
    wih_ref:    (dk, 3H)    bf16  GRU W_ih^T chunk, PyTorch gate order [r, z, n]
    bgate_ref:  (1, 3H)     f32   b_ih + [b_hr, b_hz, 0]  (r/z hidden biases pre-folded)
    whh_ref:    (H, 3H)     bf16  GRU W_hh^T
    bhn_ref:    (1, H)      f32   b_hn (must stay inside r * (h @ W_hn + b_hn))
    wfc_ref:    (H, OPAD)   bf16  fc weight^T, zero-padded to 128 lanes
    bfc_ref:    (1, OPAD)   f32   fc bias, zero-padded
    logits_ref: (BP, OPAD)  f32   lane-dense output block
    gi_ref:     (S*BP, 3H)  f32   VMEM accumulator for the input projection
    """
    k = pl.program_id(0)
    last = pl.num_programs(0) - 1
    H = whh_ref.shape[0]
    BP = logits_ref.shape[0]
    S = gi_ref.shape[0] // BP

    # Seed the accumulator with the folded gate bias (bias add comes for free).
    @pl.when(k == 0)
    def _init():
        gi_ref[...] = jnp.broadcast_to(bgate_ref[...], gi_ref.shape)

    # Streamed input projection chunk: (S*BP, dk) @ (dk, 3H), bf16 MXU, f32 accumulate.
    # This is h-independent, so it never sits on the serial critical path.
    gi_ref[...] += jnp.dot(x_ref[...], wih_ref[...],
                           preferred_element_type=jnp.float32)

    @pl.when(k == last)
    def _recurrence():
        whh = whh_ref[...]                                    # bf16, loaded once
        b_hn = jnp.broadcast_to(bhn_ref[...], (BP, H))        # hoisted broadcast

        # Serial recurrence, fully unrolled (S is small & static); h carried in vregs.
        # Only one (BP, 3H) gi slice is read from scratch per step (bounded live range).
        # NOTE: W_hh could be pinned in the MXU with pltpu.matmul_push_rhs/acc_lhs/pop
        # to shave per-step latency; kept on jnp.dot for robustness.
        h = jnp.zeros((BP, H), jnp.float32)
        for t in range(S):                                    # static indices, full unroll
            gi = gi_ref[pl.ds(t * BP, BP), :]                 # contiguous, sublane-aligned
            gh = jnp.dot(h.astype(jnp.bfloat16), whh,
                         preferred_element_type=jnp.float32)  # (BP, 3H), K = H only
            # PyTorch gate order [r, z, n]; elementwise math kept in f32.
            r = jax.nn.sigmoid(gi[:, :H] + gh[:, :H])
            z = jax.nn.sigmoid(gi[:, H:2 * H] + gh[:, H:2 * H])
            n = jnp.tanh(gi[:, 2 * H:] + r * (gh[:, 2 * H:] + b_hn))
            h = (1.0 - z) * n + z * h

        # fc(h_n[-1]) into a lane-dense (BP, 128) block; bf16 operands, f32 accumulate.
        logits_ref[...] = (jnp.dot(h.astype(jnp.bfloat16), wfc_ref[...],
                                   preferred_element_type=jnp.float32)
                           + bfc_ref[...])


def gru_fc_forward(hidden_states, params, *, dk=256):
    """hidden_states: (B, S, D) float32 (PyTorch batch_first GRU input). Returns (B, O)."""
    B, S, D = hidden_states.shape
    H = params["w_hh"].shape[0]
    O = params["w_fc"].shape[1]
    OPAD = 128                                  # lane-dense output width
    BP = max(8, -(-B // 8) * 8)                 # sublane-padded batch
    assert D % dk == 0
    DK = D // dk                                # D-reduction grid extent (3 for D=768)

    # ---- wrapper-side prep (plain JAX, off the hot path) -----------------------------
    # Pad batch to the sublane width, go step-major and flatten so step t's rows are the
    # contiguous, aligned slice [t*BP : (t+1)*BP] inside the kernel; cast to bf16.
    x = jnp.pad(hidden_states, ((0, BP - B), (0, 0), (0, 0)))
    x2d = jnp.transpose(x, (1, 0, 2)).reshape(S * BP, D).astype(jnp.bfloat16)

    w_ih = params["w_ih"].astype(jnp.bfloat16)                       # (D, 3H)
    w_hh = params["w_hh"].astype(jnp.bfloat16)                       # (H, 3H)
    b_gate = params["b_ih"] + jnp.concatenate(                       # (1, 3H)
        [params["b_hh"][:, :2 * H], jnp.zeros((1, H), jnp.float32)], axis=-1)
    b_hn = params["b_hh"][:, 2 * H:]                                 # (1, H)
    w_fc = jnp.pad(params["w_fc"], ((0, 0), (0, OPAD - O))).astype(jnp.bfloat16)
    b_fc = jnp.pad(params["b_fc"], ((0, 0), (0, OPAD - O)))          # (1, OPAD)

    logits_padded = pl.pallas_call(
        gru_fc_kernel,
        out_shape=jax.ShapeDtypeStruct((BP, OPAD), jnp.float32),
        grid_spec=pltpu.PrefetchScalarGridSpec(
            num_scalar_prefetch=0,
            grid=(DK,),
            in_specs=[
                pl.BlockSpec((S * BP, dk), lambda k: (0, k)),        # x chunk (bf16)
                pl.BlockSpec((dk, 3 * H), lambda k: (k, 0)),         # W_ih^T chunk (bf16)
                pl.BlockSpec((1, 3 * H), lambda k: (0, 0)),          # folded gate bias
                pl.BlockSpec((H, 3 * H), lambda k: (0, 0)),          # W_hh^T (bf16)
                pl.BlockSpec((1, H), lambda k: (0, 0)),              # b_hn
                pl.BlockSpec((H, OPAD), lambda k: (0, 0)),           # fc weight^T (bf16)
                pl.BlockSpec((1, OPAD), lambda k: (0, 0)),           # fc bias
            ],
            out_specs=pl.BlockSpec((BP, OPAD), lambda k: (0, 0)),
            scratch_shapes=[pltpu.VMEM((S * BP, 3 * H), jnp.float32)],
        ),
        compiler_params=pltpu.CompilerParams(dimension_semantics=("arbitrary",)),
    )(x2d, w_ih, b_gate, w_hh, b_hn, w_fc, b_fc)

    return logits_padded[:B, :O]


# ------------------------- frozen "RoBERTa" feature extractor ---------------------- #
def roberta_features(input_ids, attention_mask, params):
    # TODO(synk): the pretrained 12-layer roberta-base encoder cannot be reproduced
    # without its checkpoint; a deterministic frozen embedding + LayerNorm stand-in
    # produces the (B, S, 768) last_hidden_state consumed by the GRU (plain-JAX glue).
    emb = jnp.take(params["tok_emb"], input_ids, axis=0)          # (B, S, D)
    h = emb + params["pos_emb"][None, :, :]
    mu = jnp.mean(h, axis=-1, keepdims=True)
    var = jnp.var(h, axis=-1, keepdims=True)
    h = (h - mu) * lax.rsqrt(var + 1e-5)
    return h * attention_mask[..., None].astype(h.dtype)


# ----------------------------- deterministic parameters ---------------------------- #
def init_params(key, vocab=1000, seq=8, d_model=768, hidden=256, out=2):
    ks = jax.random.split(key, 8)
    s = 1.0 / (hidden ** 0.5)          # PyTorch GRU/Linear uniform init scale
    return {
        "tok_emb": jax.random.normal(ks[0], (vocab, d_model), jnp.float32) * 0.02,
        "pos_emb": jax.random.normal(ks[1], (seq, d_model), jnp.float32) * 0.02,
        "w_ih":    jax.random.uniform(ks[2], (d_model, 3 * hidden), jnp.float32, -s, s),
        "w_hh":    jax.random.uniform(ks[3], (hidden, 3 * hidden), jnp.float32, -s, s),
        "b_ih":    jax.random.uniform(ks[4], (1, 3 * hidden), jnp.float32, -s, s),
        "b_hh":    jax.random.uniform(ks[5], (1, 3 * hidden), jnp.float32, -s, s),
        "w_fc":    jax.random.uniform(ks[6], (hidden, out), jnp.float32, -s, s),
        "b_fc":    jax.random.uniform(ks[7], (1, out), jnp.float32, -s, s),
    }


# -------------------------------- pure-JAX reference ------------------------------- #
def gru_fc_reference(hidden_states, params):
    """f32 reference with exact PyTorch GRU semantics (gate order [r, z, n])."""
    B, S, D = hidden_states.shape
    H = params["w_hh"].shape[0]

    def cell(h_prev, x_t):
        gi = x_t @ params["w_ih"] + params["b_ih"]
        gh = h_prev @ params["w_hh"] + params["b_hh"]
        i_r, i_z, i_n = gi[:, :H], gi[:, H:2 * H], gi[:, 2 * H:]
        h_r, h_z, h_n = gh[:, :H], gh[:, H:2 * H], gh[:, 2 * H:]
        r = jax.nn.sigmoid(i_r + h_r)
        z = jax.nn.sigmoid(i_z + h_z)
        n = jnp.tanh(i_n + r * h_n)
        h = (1.0 - z) * n + z * h_prev
        return h, None

    h0 = jnp.zeros((B, H), jnp.float32)
    h_last, _ = lax.scan(cell, h0, jnp.transpose(hidden_states, (1, 0, 2)))
    return h_last @ params["w_fc"] + params["b_fc"]


# -------------------------------------- main ---------------------------------------- #
if __name__ == "__main__":
    B, S = 2, 8
    D, H, O = 768, 256, 2
    VOCAB = 1000

    key = jax.random.PRNGKey(0)
    pkey, ikey = jax.random.split(key, 2)
    params = init_params(pkey, vocab=VOCAB, seq=S, d_model=D, hidden=H, out=O)

    input_ids = jax.random.randint(ikey, (B, S), 0, VOCAB, dtype=jnp.int32)
    attention_mask = jnp.ones((B, S), dtype=jnp.int32)

    hidden_states = roberta_features(input_ids, attention_mask, params)   # (B, S, 768)

    logits = gru_fc_forward(hidden_states, params)                        # (B, 2)
    logits = jax.block_until_ready(logits)

    ref = gru_fc_reference(hidden_states, params)
    assert logits.shape == (B, O), logits.shape
    # bf16 MXU operands (f32 accumulation) vs. pure-f32 reference → small drift allowed.
    assert jnp.allclose(logits, ref, rtol=2e-2, atol=2e-2), (logits, ref)

    print("KERNEL_OK")
</pallas_src>

<mosaic_0001>
module attributes {stable_mosaic.version = 11 : i64} {
  func.func @gru_fc_kernel(%arg0: i32, %arg1: memref<64x256xbf16, #tpu.memory_space<vmem>>, %arg2: memref<256x768xbf16, #tpu.memory_space<vmem>>, %arg3: memref<1x768xf32, #tpu.memory_space<vmem>>, %arg4: memref<256x768xbf16, #tpu.memory_space<vmem>>, %arg5: memref<1x256xf32, #tpu.memory_space<vmem>>, %arg6: memref<256x128xbf16, #tpu.memory_space<vmem>>, %arg7: memref<1x128xf32, #tpu.memory_space<vmem>>, %arg8: memref<8x128xf32, #tpu.memory_space<vmem>>, %arg9: memref<64x768xf32, #tpu.memory_space<vmem>>) attributes {dimension_semantics = [#tpu.dimension_semantics<arbitrary>], iteration_bounds = array<i64: 3>, scalar_prefetch = 0 : i64, scratch_operands = 1 : i64, tpu.core_type = #tpu.core_type<tc>, window_params = [{transform_indices = @transform_0, window_bounds = array<i64: 64, 256>}, {transform_indices = @transform_1, window_bounds = array<i64: 256, 768>}, {pipeline_mode = #tpu.pipeline_mode<synchronous>, transform_indices = @transform_2, window_bounds = array<i64: 1, 768>}, {pipeline_mode = #tpu.pipeline_mode<synchronous>, transform_indices = @transform_3, window_bounds = array<i64: 256, 768>}, {pipeline_mode = #tpu.pipeline_mode<synchronous>, transform_indices = @transform_4, window_bounds = array<i64: 1, 256>}, {pipeline_mode = #tpu.pipeline_mode<synchronous>, transform_indices = @transform_5, window_bounds = array<i64: 256, 128>}, {pipeline_mode = #tpu.pipeline_mode<synchronous>, transform_indices = @transform_6, window_bounds = array<i64: 1, 128>}, {pipeline_mode = #tpu.pipeline_mode<synchronous>, transform_indices = @transform_7, window_bounds = array<i64: 8, 128>}]} {
    %c0_i32 = arith.constant 0 : i32
    %0 = arith.cmpi eq, %arg0, %c0_i32 : i32
    %1 = arith.extui %0 : i1 to i32
    %c0_i32_0 = arith.constant 0 : i32
    %2 = arith.cmpi ne, %1, %c0_i32_0 : i32
    scf.if %2 {
      %c0_9 = arith.constant 0 : index
      %c0_10 = arith.constant 0 : index
      %12 = vector.load %arg3[%c0_9, %c0_10] : memref<1x768xf32, #tpu.memory_space<vmem>>, vector<1x768xf32>
      %13 = vector.shape_cast %12 : vector<1x768xf32> to vector<1x768xf32>
      %14 = vector.broadcast %13 : vector<1x768xf32> to vector<64x768xf32>
      %c0_11 = arith.constant 0 : index
      %c0_12 = arith.constant 0 : index
      %15 = vector.load %arg9[%c0_11, %c0_12] : memref<64x768xf32, #tpu.memory_space<vmem>>, vector<64x768xf32>
      tpu.vector_store %arg9[%c0_11, %c0_12], %14 {strides = array<i32>} : memref<64x768xf32, #tpu.memory_space<vmem>>, vector<64x768xf32>,
    } else {
    }
    %c0 = arith.constant 0 : index
    %c0_1 = arith.constant 0 : index
    %3 = vector.load %arg9[%c0, %c0_1] : memref<64x768xf32, #tpu.memory_space<vmem>>, vector<64x768xf32>
    %c0_2 = arith.constant 0 : index
    %c0_3 = arith.constant 0 : index
    %4 = vector.load %arg1[%c0_2, %c0_3] : memref<64x256xbf16, #tpu.memory_space<vmem>>, vector<64x256xbf16>
    %c0_4 = arith.constant 0 : index
    %c0_5 = arith.constant 0 : index
    %5 = vector.load %arg2[%c0_4, %c0_5] : memref<256x768xbf16, #tpu.memory_space<vmem>>, vector<256x768xbf16>
    %cst = arith.constant dense<0.000000e+00> : vector<64x768xf32>
    %6 = tpu.matmul %4, %5, %cst {dimension_numbers = #tpu.dot_dimension_numbers<[1], [0], [0], [1], [0, 0, 1, 1], [], []>} : vector<64x256xbf16>, vector<256x768xbf16>, vector<64x768xf32> -> vector<64x768xf32>
    %7 = arith.addf %3, %6 : vector<64x768xf32>
    %c0_6 = arith.constant 0 : index
    %c0_7 = arith.constant 0 : index
    %8 = vector.load %arg9[%c0_6, %c0_7] : memref<64x768xf32, #tpu.memory_space<vmem>>, vector<64x768xf32>
    tpu.vector_store %arg9[%c0_6, %c0_7], %7 {strides = array<i32>} : memref<64x768xf32, #tpu.memory_space<vmem>>, vector<64x768xf32>,
    %c2_i32 = arith.constant 2 : i32
    %9 = arith.cmpi eq, %arg0, %c2_i32 : i32
    %10 = arith.extui %9 : i1 to i32
    %c0_i32_8 = arith.constant 0 : i32
    %11 = arith.cmpi ne, %10, %c0_i32_8 : i32
    scf.if %11 {
      %c0_9 = arith.constant 0 : index
      %c0_10 = arith.constant 0 : index
      %12 = vector.load %arg4[%c0_9, %c0_10] : memref<256x768xbf16, #tpu.memory_space<vmem>>, vector<256x768xbf16>
      %c0_11 = arith.constant 0 : index
      %c0_12 = arith.constant 0 : index
      %13 = vector.load %arg5[%c0_11, %c0_12] : memref<1x256xf32, #tpu.memory_space<vmem>>, vector<1x256xf32>
      %14 = vector.shape_cast %13 : vector<1x256xf32> to vector<1x256xf32>
      %15 = vector.broadcast %14 : vector<1x256xf32> to vector<8x256xf32>
      %cst_13 = arith.constant 0.000000e+00 : f32
      %16 = vector.broadcast %cst_13 : f32 to vector<8x256xf32>
      %c0_14 = arith.constant 0 : index
      %c0_15 = arith.constant 0 : index
      %17 = vector.load %arg9[%c0_14, %c0_15] : memref<64x768xf32, #tpu.memory_space<vmem>>, vector<8x768xf32>
      %18 = arith.truncf %16 : vector<8x256xf32> to vector<8x256xbf16>
      %cst_16 = arith.constant dense<0.000000e+00> : vector<8x768xf32>
      %19 = tpu.matmul %18, %12, %cst_16 {dimension_numbers = #tpu.dot_dimension_numbers<[1], [0], [0], [1], [0, 0, 1, 1], [], []>} : vector<8x256xbf16>, vector<256x768xbf16>, vector<8x768xf32> -> vector<8x768xf32>
      %20 = vector.extract_strided_slice %17 {offsets = [0, 0], sizes = [8, 256], strides = [1, 1]} : vector<8x768xf32> to vector<8x256xf32>
      %21 = vector.extract_strided_slice %19 {offsets = [0, 0], sizes = [8, 256], strides = [1, 1]} : vector<8x768xf32> to vector<8x256xf32>
      %22 = arith.addf %20, %21 : vector<8x256xf32>
      %23 = arith.negf %22 : vector<8x256xf32>
      %24 = math.exp %23 : vector<8x256xf32>
      %cst_17 = arith.constant 1.000000e+00 : f32
      %25 = vector.broadcast %cst_17 : f32 to vector<8x256xf32>
      %26 = arith.addf %25, %24 : vector<8x256xf32>
      %27 = arith.divf %25, %26 : vector<8x256xf32>
      %28 = vector.extract_strided_slice %17 {offsets = [0, 256], sizes = [8, 256], strides = [1, 1]} : vector<8x768xf32> to vector<8x256xf32>
      %29 = vector.extract_strided_slice %19 {offsets = [0, 256], sizes = [8, 256], strides = [1, 1]} : vector<8x768xf32> to vector<8x256xf32>
      %30 = arith.addf %28, %29 : vector<8x256xf32>
      %31 = arith.negf %30 : vector<8x256xf32>
      %32 = math.exp %31 : vector<8x256xf32>
      %cst_18 = arith.constant 1.000000e+00 : f32
      %33 = vector.broadcast %cst_18 : f32 to vector<8x256xf32>
      %34 = arith.addf %33, %32 : vector<8x256xf32>
      %35 = arith.divf %33, %34 : vector<8x256xf32>
      %36 = vector.extract_strided_slice %17 {offsets = [0, 512], sizes = [8, 256], strides = [1, 1]} : vector<8x768xf32> to vector<8x256xf32>
      %37 = vector.extract_strided_slice %19 {offsets = [0, 512], sizes = [8, 256], strides = [1, 1]} : vector<8x768xf32> to vector<8x256xf32>
      %38 = arith.addf %37, %15 : vector<8x256xf32>
      %39 = arith.mulf %27, %38 : vector<8x256xf32>
      %40 = arith.addf %36, %39 : vector<8x256xf32>
      %41 = math.tanh %40 : vector<8x256xf32>
      %cst_19 = arith.constant 1.000000e+00 : f32
      %42 = vector.broadcast %cst_19 : f32 to vector<8x256xf32>
      %43 = arith.subf %42, %35 : vector<8x256xf32>
      %44 = arith.mulf %43, %41 : vector<8x256xf32>
      %45 = arith.mulf %35, %16 : vector<8x256xf32>
      %46 = arith.addf %44, %45 : vector<8x256xf32>
      %c8 = arith.constant 8 : index
      %c0_20 = arith.constant 0 : index
      %47 = vector.load %arg9[%c8, %c0_20] : memref<64x768xf32, #tpu.memory_space<vmem>>, vector<8x768xf32>
      %48 = arith.truncf %46 : vector<8x256xf32> to vector<8x256xbf16>
      %cst_21 = arith.constant dense<0.000000e+00> : vector<8x768xf32>
      %49 = tpu.matmul %48, %12, %cst_21 {dimension_numbers = #tpu.dot_dimension_numbers<[1], [0], [0], [1], [0, 0, 1, 1], [], []>} : vector<8x256xbf16>, vector<256x768xbf16>, vector<8x768xf32> -> vector<8x768xf32>
      %50 = vector.extract_strided_slice %47 {offsets = [0, 0], sizes = [8, 256], strides = [1, 1]} : vector<8x768xf32> to vector<8x256xf32>
      %51 = vector.extract_strided_slice %49 {offsets = [0, 0], sizes = [8, 256], strides = [1, 1]} : vector<8x768xf32> to vector<8x256xf32>
      %52 = arith.addf %50, %51 : vector<8x256xf32>
      %53 = arith.negf %52 : vector<8x256xf32>
      %54 = math.exp %53 : vector<8x256xf32>
      %cst_22 = arith.constant 1.000000e+00 : f32
      %55 = vector.broadcast %cst_22 : f32 to vector<8x256xf32>
      %56 = arith.addf %55, %54 : vector<8x256xf32>
      %57 = arith.divf %55, %56 : vector<8x256xf32>
      %58 = vector.extract_strided_slice %47 {offsets = [0, 256], sizes = [8, 256], strides = [1, 1]} : vector<8x768xf32> to vector<8x256xf32>
      %59 = vector.extract_strided_slice %49 {offsets = [0, 256], sizes = [8, 256], strides = [1, 1]} : vector<8x768xf32> to vector<8x256xf32>
      %60 = arith.addf %58, %59 : vector<8x256xf32>
      %61 = arith.negf %60 : vector<8x256xf32>
      %62 = math.exp %61 : vector<8x256xf32>
      %cst_23 = arith.constant 1.000000e+00 : f32
      %63 = vector.broadcast %cst_23 : f32 to vector<8x256xf32>
      %64 = arith.addf %63, %62 : vector<8x256xf32>
      %65 = arith.divf %63, %64 : vector<8x256xf32>
      %66 = vector.extract_strided_slice %47 {offsets = [0, 512], sizes = [8, 256], strides = [1, 1]} : vector<8x768xf32> to vector<8x256xf32>
      %67 = vector.extract_strided_slice %49 {offsets = [0, 512], sizes = [8, 256], strides = [1, 1]} : vector<8x768xf32> to vector<8x256xf32>
      %68 = arith.addf %67, %15 : vector<8x256xf32>
      %69 = arith.mulf %57, %68 : vector<8x256xf32>
      %70 = arith.addf %66, %69 : vector<8x256xf32>
      %71 = math.tanh %70 : vector<8x256xf32>
      %cst_24 = arith.constant 1.000000e+00 : f32
      %72 = vector.broadcast %cst_24 : f32 to vector<8x256xf32>
      %73 = arith.subf %72, %65 : vector<8x256xf32>
      %74 = arith.mulf %73, %71 : vector<8x256xf32>
      %75 = arith.mulf %65, %46 : vector<8x256xf32>
      %76 = arith.addf %74, %75 : vector<8x256xf32>
      %c16 = arith.constant 16 : index
      %c0_25 = arith.constant 0 : index
      %77 = vector.load %arg9[%c16, %c0_25] : memref<64x768xf32, #tpu.memory_space<vmem>>, vector<8x768xf32>
      %78 = arith.truncf %76 : vector<8x256xf32> to vector<8x256xbf16>
      %cst_26 = arith.constant dense<0.000000e+00> : vector<8x768xf32>
      %79 = tpu.matmul %78, %12, %cst_26 {dimension_numbers = #tpu.dot_dimension_numbers<[1], [0], [0], [1], [0, 0, 1, 1], [], []>} : vector<8x256xbf16>, vector<256x768xbf16>, vector<8x768xf32> -> vector<8x768xf32>
      %80 = vector.extract_strided_slice %77 {offsets = [0, 0], sizes = [8, 256], strides = [1, 1]} : vector<8x768xf32> to vector<8x256xf32>
      %81 = vector.extract_strided_slice %79 {offsets = [0, 0], sizes = [8, 256], strides = [1, 1]} : vector<8x768xf32> to vector<8x256xf32>
      %82 = arith.addf %80, %81 : vector<8x256xf32>
      %83 = arith.negf %82 : vector<8x256xf32>
      %84 = math.exp %83 : vector<8x256xf32>
      %cst_27 = arith.constant 1.000000e+00 : f32
      %85 = vector.broadcast %cst_27 : f32 to vector<8x256xf32>
      %86 = arith.addf %85, %84 : vector<8x256xf32>
      %87 = arith.divf %85, %86 : vector<8x256xf32>
      %88 = vector.extract_strided_slice %77 {offsets = [0, 256], sizes = [8, 256], strides = [1, 1]} : vector<8x768xf32> to vector<8x256xf32>
      %89 = vector.extract_strided_slice %79 {offsets = [0, 256], sizes = [8, 256], strides = [1, 1]} : vector<8x768xf32> to vector<8x256xf32>
      %90 = arith.addf %88, %89 : vector<8x256xf32>
      %91 = arith.negf %90 : vector<8x256xf32>
      %92 = math.exp %91 : vector<8x256xf32>
      %cst_28 = arith.constant 1.000000e+00 : f32
      %93 = vector.broadcast %cst_28 : f32 to vector<8x256xf32>
      %94 = arith.addf %93, %92 : vector<8x256xf32>
      %95 = arith.divf %93, %94 : vector<8x256xf32>
      %96 = vector.extract_strided_slice %77 {offsets = [0, 512], sizes = [8, 256], strides = [1, 1]} : vector<8x768xf32> to vector<8x256xf32>
      %97 = vector.extract_strided_slice %79 {offsets = [0, 512], sizes = [8, 256], strides = [1, 1]} : vector<8x768xf32> to vector<8x256xf32>
      %98 = arith.addf %97, %15 : vector<8x256xf32>
      %99 = arith.mulf %87, %98 : vector<8x256xf32>
      %100 = arith.addf %96, %99 : vector<8x256xf32>
      %101 = math.tanh %100 : vector<8x256xf32>
      %cst_29 = arith.constant 1.000000e+00 : f32
      %102 = vector.broadcast %cst_29 : f32 to vector<8x256xf32>
      %103 = arith.subf %102, %95 : vector<8x256xf32>
      %104 = arith.mulf %103, %101 : vector<8x256xf32>
      %105 = arith.mulf %95, %76 : vector<8x256xf32>
      %106 = arith.addf %104, %105 : vector<8x256xf32>
      %c24 = arith.constant 24 : index
      %c0_30 = arith.constant 0 : index
      %107 = vector.load %arg9[%c24, %c0_30] : memref<64x768xf32, #tpu.memory_space<vmem>>, vector<8x768xf32>
      %108 = arith.truncf %106 : vector<8x256xf32> to vector<8x256xbf16>
      %cst_31 = arith.constant dense<0.000000e+00> : vector<8x768xf32>
      %109 = tpu.matmul %108, %12, %cst_31 {dimension_numbers = #tpu.dot_dimension_numbers<[1], [0], [0], [1], [0, 0, 1, 1], [], []>} : vector<8x256xbf16>, vector<256x768xbf16>, vector<8x768xf32> -> vector<8x768xf32>
      %110 = vector.extract_strided_slice %107 {offsets = [0, 0], sizes = [8, 256], strides = [1, 1]} : vector<8x768xf32> to vector<8x256xf32>
      %111 = vector.extract_strided_slice %109 {offsets = [0, 0], sizes = [8, 256], strides = [1, 1]} : vector<8x768xf32> to vector<8x256xf32>
      %112 = arith.addf %110, %111 : vector<8x256xf32>
      %113 = arith.negf %112 : vector<8x256xf32>
      %114 = math.exp %113 : vector<8x256xf32>
      %cst_32 = arith.constant 1.000000e+00 : f32
      %115 = vector.broadcast %cst_32 : f32 to vector<8x256xf32>
      %116 = arith.addf %115, %114 : vector<8x256xf32>
      %117 = arith.divf %115, %116 : vector<8x256xf32>
      %118 = vector.extract_strided_slice %107 {offsets = [0, 256], sizes = [8, 256], strides = [1, 1]} : vector<8x768xf32> to vector<8x256xf32>
      %119 = vector.extract_strided_slice %109 {offsets = [0, 256], sizes = [8, 256], strides = [1, 1]} : vector<8x768xf32> to vector<8x256xf32>
      %120 = arith.addf %118, %119 : vector<8x256xf32>
      %121 = arith.negf %120 : vector<8x256xf32>
      %122 = math.exp %121 : vector<8x256xf32>
      %cst_33 = arith.constant 1.000000e+00 : f32
      %123 = vector.broadcast %cst_33 : f32 to vector<8x256xf32>
      %124 = arith.addf %123, %122 : vector<8x256xf32>
      %125 = arith.divf %123, %124 : vector<8x256xf32>
      %126 = vector.extract_strided_slice %107 {offsets = [0, 512], sizes = [8, 256], strides = [1, 1]} : vector<8x768xf32> to vector<8x256xf32>
      %127 = vector.extract_strided_slice %109 {offsets = [0, 512], sizes = [8, 256], strides = [1, 1]} : vector<8x768xf32> to vector<8x256xf32>
      %128 = arith.addf %127, %15 : vector<8x256xf32>
      %129 = arith.mulf %117, %128 : vector<8x256xf32>
      %130 = arith.addf %126, %129 : vector<8x256xf32>
      %131 = math.tanh %130 : vector<8x256xf32>
      %cst_34 = arith.constant 1.000000e+00 : f32
      %132 = vector.broadcast %cst_34 : f32 to vector<8x256xf32>
      %133 = arith.subf %132, %125 : vector<8x256xf32>
      %134 = arith.mulf %133, %131 : vector<8x256xf32>
      %135 = arith.mulf %125, %106 : vector<8x256xf32>
      %136 = arith.addf %134, %135 : vector<8x256xf32>
      %c32 = arith.constant 32 : index
      %c0_35 = arith.constant 0 : index
      %137 = vector.load %arg9[%c32, %c0_35] : memref<64x768xf32, #tpu.memory_space<vmem>>, vector<8x768xf32>
      %138 = arith.truncf %136 : vector<8x256xf32> to vector<8x256xbf16>
      %cst_36 = arith.constant dense<0.000000e+00> : vector<8x768xf32>
      %139 = tpu.matmul %138, %12, %cst_36 {dimension_numbers = #tpu.dot_dimension_numbers<[1], [0], [0], [1], [0, 0, 1, 1], [], []>} : vector<8x256xbf16>, vector<256x768xbf16>, vector<8x768xf32> -> vector<8x768xf32>
      %140 = vector.extract_strided_slice %137 {offsets = [0, 0], sizes = [8, 256], strides = [1, 1]} : vector<8x768xf32> to vector<8x256xf32>
      %141 = vector.extract_strided_slice %139 {offsets = [0, 0], sizes = [8, 256], strides = [1, 1]} : vector<8x768xf32> to vector<8x256xf32>
      %142 = arith.addf %140, %141 : vector<8x256xf32>
      %143 = arith.negf %142 : vector<8x256xf32>
      %144 = math.exp %143 : vector<8x256xf32>
      %cst_37 = arith.constant 1.000000e+00 : f32
      %145 = vector.broadcast %cst_37 : f32 to vector<8x256xf32>
      %146 = arith.addf %145, %144 : vector<8x256xf32>
      %147 = arith.divf %145, %146 : vector<8x256xf32>
      %148 = vector.extract_strided_slice %137 {offsets = [0, 256], sizes = [8, 256], strides = [1, 1]} : vector<8x768xf32> to vector<8x256xf32>
      %149 = vector.extract_strided_slice %139 {offsets = [0, 256], sizes = [8, 256], strides = [1, 1]} : vector<8x768xf32> to vector<8x256xf32>
      %150 = arith.addf %148, %149 : vector<8x256xf32>
      %151 = arith.negf %150 : vector<8x256xf32>
      %152 = math.exp %151 : vector<8x256xf32>
      %cst_38 = arith.constant 1.000000e+00 : f32
      %153 = vector.broadcast %cst_38 : f32 to vector<8x256xf32>
      %154 = arith.addf %153, %152 : vector<8x256xf32>
      %155 = arith.divf %153, %154 : vector<8x256xf32>
      %156 = vector.extract_strided_slice %137 {offsets = [0, 512], sizes = [8, 256], strides = [1, 1]} : vector<8x768xf32> to vector<8x256xf32>
      %157 = vector.extract_strided_slice %139 {offsets = [0, 512], sizes = [8, 256], strides = [1, 1]} : vector<8x768xf32> to vector<8x256xf32>
      %158 = arith.addf %157, %15 : vector<8x256xf32>
      %159 = arith.mulf %147, %158 : vector<8x256xf32>
      %160 = arith.addf %156, %159 : vector<8x256xf32>
      %161 = math.tanh %160 : vector<8x256xf32>
      %cst_39 = arith.constant 1.000000e+00 : f32
      %162 = vector.broadcast %cst_39 : f32 to vector<8x256xf32>
      %163 = arith.subf %162, %155 : vector<8x256xf32>
      %164 = arith.mulf %163, %161 : vector<8x256xf32>
      %165 = arith.mulf %155, %136 : vector<8x256xf32>
      %166 = arith.addf %164, %165 : vector<8x256xf32>
      %c40 = arith.constant 40 : index
      %c0_40 = arith.constant 0 : index
      %167 = vector.load %arg9[%c40, %c0_40] : memref<64x768xf32, #tpu.memory_space<vmem>>, vector<8x768xf32>
      %168 = arith.truncf %166 : vector<8x256xf32> to vector<8x256xbf16>
      %cst_41 = arith.constant dense<0.000000e+00> : vector<8x768xf32>
      %169 = tpu.matmul %168, %12, %cst_41 {dimension_numbers = #tpu.dot_dimension_numbers<[1], [0], [0], [1], [0, 0, 1, 1], [], []>} : vector<8x256xbf16>, vector<256x768xbf16>, vector<8x768xf32> -> vector<8x768xf32>
      %170 = vector.extract_strided_slice %167 {offsets = [0, 0], sizes = [8, 256], strides = [1, 1]} : vector<8x768xf32> to vector<8x256xf32>
      %171 = vector.extract_strided_slice %169 {offsets = [0, 0], sizes = [8, 256], strides = [1, 1]} : vector<8x768xf32> to vector<8x256xf32>
      %172 = arith.addf %170, %171 : vector<8x256xf32>
      %173 = arith.negf %172 : vector<8x256xf32>
      %174 = math.exp %173 : vector<8x256xf32>
      %cst_42 = arith.constant 1.000000e+00 : f32
      %175 = vector.broadcast %cst_42 : f32 to vector<8x256xf32>
      %176 = arith.addf %175, %174 : vector<8x256xf32>
      %177 = arith.divf %175, %176 : vector<8x256xf32>
      %178 = vector.extract_strided_slice %167 {offsets = [0, 256], sizes = [8, 256], strides = [1, 1]} : vector<8x768xf32> to vector<8x256xf32>
      %179 = vector.extract_strided_slice %169 {offsets = [0, 256], sizes = [8, 256], strides = [1, 1]} : vector<8x768xf32> to vector<8x256xf32>
      %180 = arith.addf %178, %179 : vector<8x256xf32>
      %181 = arith.negf %180 : vector<8x256xf32>
      %182 = math.exp %181 : vector<8x256xf32>
      %cst_43 = arith.constant 1.000000e+00 : f32
      %183 = vector.broadcast %cst_43 : f32 to vector<8x256xf32>
      %184 = arith.addf %183, %182 : vector<8x256xf32>
      %185 = arith.divf %183, %184 : vector<8x256xf32>
      %186 = vector.extract_strided_slice %167 {offsets = [0, 512], sizes = [8, 256], strides = [1, 1]} : vector<8x768xf32> to vector<8x256xf32>
      %187 = vector.extract_strided_slice %169 {offsets = [0, 512], sizes = [8, 256], strides = [1, 1]} : vector<8x768xf32> to vector<8x256xf32>
      %188 = arith.addf %187, %15 : vector<8x256xf32>
      %189 = arith.mulf %177, %188 : vector<8x256xf32>
      %190 = arith.addf %186, %189 : vector<8x256xf32>
      %191 = math.tanh %190 : vector<8x256xf32>
      %cst_44 = arith.constant 1.000000e+00 : f32
      %192 = vector.broadcast %cst_44 : f32 to vector<8x256xf32>
      %193 = arith.subf %192, %185 : vector<8x256xf32>
      %194 = arith.mulf %193, %191 : vector<8x256xf32>
      %195 = arith.mulf %185, %166 : vector<8x256xf32>
      %196 = arith.addf %194, %195 : vector<8x256xf32>
      %c48 = arith.constant 48 : index
      %c0_45 = arith.constant 0 : index
      %197 = vector.load %arg9[%c48, %c0_45] : memref<64x768xf32, #tpu.memory_space<vmem>>, vector<8x768xf32>
      %198 = arith.truncf %196 : vector<8x256xf32> to vector<8x256xbf16>
      %cst_46 = arith.constant dense<0.000000e+00> : vector<8x768xf32>
      %199 = tpu.matmul %198, %12, %cst_46 {dimension_numbers = #tpu.dot_dimension_numbers<[1], [0], [0], [1], [0, 0, 1, 1], [], []>} : vector<8x256xbf16>, vector<256x768xbf16>, vector<8x768xf32> -> vector<8x768xf32>
      %200 = vector.extract_strided_slice %197 {offsets = [0, 0], sizes = [8, 256], strides = [1, 1]} : vector<8x768xf32> to vector<8x256xf32>
      %201 = vector.extract_strided_slice %199 {offsets = [0, 0], sizes = [8, 256], strides = [1, 1]} : vector<8x768xf32> to vector<8x256xf32>
      %202 = arith.addf %200, %201 : vector<8x256xf32>
      %203 = arith.negf %202 : vector<8x256xf32>
      %204 = math.exp %203 : vector<8x256xf32>
      %cst_47 = arith.constant 1.000000e+00 : f32
      %205 = vector.broadcast %cst_47 : f32 to vector<8x256xf32>
      %206 = arith.addf %205, %204 : vector<8x256xf32>
      %207 = arith.divf %205, %206 : vector<8x256xf32>
      %208 = vector.extract_strided_slice %197 {offsets = [0, 256], sizes = [8, 256], strides = [1, 1]} : vector<8x768xf32> to vector<8x256xf32>
      %209 = vector.extract_strided_slice %199 {offsets = [0, 256], sizes = [8, 256], strides = [1, 1]} : vector<8x768xf32> to vector<8x256xf32>
      %210 = arith.addf %208, %209 : vector<8x256xf32>
      %211 = arith.negf %210 : vector<8x256xf32>
      %212 = math.exp %211 : vector<8x256xf32>
      %cst_48 = arith.constant 1.000000e+00 : f32
      %213 = vector.broadcast %cst_48 : f32 to vector<8x256xf32>
      %214 = arith.addf %213, %212 : vector<8x256xf32>
      %215 = arith.divf %213, %214 : vector<8x256xf32>
      %216 = vector.extract_strided_slice %197 {offsets = [0, 512], sizes = [8, 256], strides = [1, 1]} : vector<8x768xf32> to vector<8x256xf32>
      %217 = vector.extract_strided_slice %199 {offsets = [0, 512], sizes = [8, 256], strides = [1, 1]} : vector<8x768xf32> to vector<8x256xf32>
      %218 = arith.addf %217, %15 : vector<8x256xf32>
      %219 = arith.mulf %207, %218 : vector<8x256xf32>
      %220 = arith.addf %216, %219 : vector<8x256xf32>
      %221 = math.tanh %220 : vector<8x256xf32>
      %cst_49 = arith.constant 1.000000e+00 : f32
      %222 = vector.broadcast %cst_49 : f32 to vector<8x256xf32>
      %223 = arith.subf %222, %215 : vector<8x256xf32>
      %224 = arith.mulf %223, %221 : vector<8x256xf32>
      %225 = arith.mulf %215, %196 : vector<8x256xf32>
      %226 = arith.addf %224, %225 : vector<8x256xf32>
      %c56 = arith.constant 56 : index
      %c0_50 = arith.constant 0 : index
      %227 = vector.load %arg9[%c56, %c0_50] : memref<64x768xf32, #tpu.memory_space<vmem>>, vector<8x768xf32>
      %228 = arith.truncf %226 : vector<8x256xf32> to vector<8x256xbf16>
      %cst_51 = arith.constant dense<0.000000e+00> : vector<8x768xf32>
      %229 = tpu.matmul %228, %12, %cst_51 {dimension_numbers = #tpu.dot_dimension_numbers<[1], [0], [0], [1], [0, 0, 1, 1], [], []>} : vector<8x256xbf16>, vector<256x768xbf16>, vector<8x768xf32> -> vector<8x768xf32>
      %230 = vector.extract_strided_slice %227 {offsets = [0, 0], sizes = [8, 256], strides = [1, 1]} : vector<8x768xf32> to vector<8x256xf32>
      %231 = vector.extract_strided_slice %229 {offsets = [0, 0], sizes = [8, 256], strides = [1, 1]} : vector<8x768xf32> to vector<8x256xf32>
      %232 = arith.addf %230, %231 : vector<8x256xf32>
      %233 = arith.negf %232 : vector<8x256xf32>
      %234 = math.exp %233 : vector<8x256xf32>
      %cst_52 = arith.constant 1.000000e+00 : f32
      %235 = vector.broadcast %cst_52 : f32 to vector<8x256xf32>
      %236 = arith.addf %235, %234 : vector<8x256xf32>
      %237 = arith.divf %235, %236 : vector<8x256xf32>
      %238 = vector.extract_strided_slice %227 {offsets = [0, 256], sizes = [8, 256], strides = [1, 1]} : vector<8x768xf32> to vector<8x256xf32>
      %239 = vector.extract_strided_slice %229 {offsets = [0, 256], sizes = [8, 256], strides = [1, 1]} : vector<8x768xf32> to vector<8x256xf32>
      %240 = arith.addf %238, %239 : vector<8x256xf32>
      %241 = arith.negf %240 : vector<8x256xf32>
      %242 = math.exp %241 : vector<8x256xf32>
      %cst_53 = arith.constant 1.000000e+00 : f32
      %243 = vector.broadcast %cst_53 : f32 to vector<8x256xf32>
      %244 = arith.addf %243, %242 : vector<8x256xf32>
      %245 = arith.divf %243, %244 : vector<8x256xf32>
      %246 = vector.extract_strided_slice %227 {offsets = [0, 512], sizes = [8, 256], strides = [1, 1]} : vector<8x768xf32> to vector<8x256xf32>
      %247 = vector.extract_strided_slice %229 {offsets = [0, 512], sizes = [8, 256], strides = [1, 1]} : vector<8x768xf32> to vector<8x256xf32>
      %248 = arith.addf %247, %15 : vector<8x256xf32>
      %249 = arith.mulf %237, %248 : vector<8x256xf32>
      %250 = arith.addf %246, %249 : vector<8x256xf32>
      %251 = math.tanh %250 : vector<8x256xf32>
      %cst_54 = arith.constant 1.000000e+00 : f32
      %252 = vector.broadcast %cst_54 : f32 to vector<8x256xf32>
      %253 = arith.subf %252, %245 : vector<8x256xf32>
      %254 = arith.mulf %253, %251 : vector<8x256xf32>
      %255 = arith.mulf %245, %226 : vector<8x256xf32>
      %256 = arith.addf %254, %255 : vector<8x256xf32>
      %257 = arith.truncf %256 : vector<8x256xf32> to vector<8x256xbf16>
      %c0_55 = arith.constant 0 : index
      %c0_56 = arith.constant 0 : index
      %258 = vector.load %arg6[%c0_55, %c0_56] : memref<256x128xbf16, #tpu.memory_space<vmem>>, vector<256x128xbf16>
      %cst_57 = arith.constant dense<0.000000e+00> : vector<8x128xf32>
      %259 = tpu.matmul %257, %258, %cst_57 {dimension_numbers = #tpu.dot_dimension_numbers<[1], [0], [0], [1], [0, 0, 1, 1], [], []>} : vector<8x256xbf16>, vector<256x128xbf16>, vector<8x128xf32> -> vector<8x128xf32>
      %c0_58 = arith.constant 0 : index
      %c0_59 = arith.constant 0 : index
      %260 = vector.load %arg7[%c0_58, %c0_59] : memref<1x128xf32, #tpu.memory_space<vmem>>, vector<1x128xf32>
      %261 = vector.broadcast %260 : vector<1x128xf32> to vector<8x128xf32>
      %262 = arith.addf %259, %261 : vector<8x128xf32>
      %c0_60 = arith.constant 0 : index
      %c0_61 = arith.constant 0 : index
      %263 = vector.load %arg8[%c0_60, %c0_61] : memref<8x128xf32, #tpu.memory_space<vmem>>, vector<8x128xf32>
      tpu.vector_store %arg8[%c0_60, %c0_61], %262 {strides = array<i32>} : memref<8x128xf32, #tpu.memory_space<vmem>>, vector<8x128xf32>,
    } else {
    }
    return
  }
  func.func @transform_0(%arg0: i32) -> (i32, i32) {
    %c0_i32 = arith.constant 0 : i32
    %c0_i32_0 = arith.constant 0 : i32
    return %c0_i32, %arg0 : i32, i32
  }
  func.func @transform_1(%arg0: i32) -> (i32, i32) {
    %c0_i32 = arith.constant 0 : i32
    %c0_i32_0 = arith.constant 0 : i32
    return %arg0, %c0_i32 : i32, i32
  }
  func.func @transform_2(%arg0: i32) -> (i32, i32) {
    %c0_i32 = arith.constant 0 : i32
    %c0_i32_0 = arith.constant 0 : i32
    %c0_i32_1 = arith.constant 0 : i32
    return %c0_i32, %c0_i32_0 : i32, i32
  }
  func.func @transform_3(%arg0: i32) -> (i32, i32) {
    %c0_i32 = arith.constant 0 : i32
    %c0_i32_0 = arith.constant 0 : i32
    %c0_i32_1 = arith.constant 0 : i32
    return %c0_i32, %c0_i32_0 : i32, i32
  }
  func.func @transform_4(%arg0: i32) -> (i32, i32) {
    %c0_i32 = arith.constant 0 : i32
    %c0_i32_0 = arith.constant 0 : i32
    %c0_i32_1 = arith.constant 0 : i32
    return %c0_i32, %c0_i32_0 : i32, i32
  }
  func.func @transform_5(%arg0: i32) -> (i32, i32) {
    %c0_i32 = arith.constant 0 : i32
    %c0_i32_0 = arith.constant 0 : i32
    %c0_i32_1 = arith.constant 0 : i32
    return %c0_i32, %c0_i32_0 : i32, i32
  }
  func.func @transform_6(%arg0: i32) -> (i32, i32) {
    %c0_i32 = arith.constant 0 : i32
    %c0_i32_0 = arith.constant 0 : i32
    %c0_i32_1 = arith.constant 0 : i32
    return %c0_i32, %c0_i32_0 : i32, i32
  }
  func.func @transform_7(%arg0: i32) -> (i32, i32) {
    %c0_i32 = arith.constant 0 : i32
    %c0_i32_0 = arith.constant 0 : i32
    %c0_i32_1 = arith.constant 0 : i32
    return %c0_i32, %c0_i32_0 : i32, i32
  }
}

</mosaic_0001>

<bundles_post_ra>
// kernel: tpu_custom_call.1
= control target key start
LH: loop header
LB: loop body
LE: loop exit
PB: predicated region body
PF: predicated region fallthrough
CT: control target
= control target key end

     0   :  { %s6854_s0 = inlined_call_operand.hbm [shape: bf16[64,768], index: 0, kind: input, shape index: {}]   ;;  %s6855_s1 = inlined_call_operand.hbm [shape: bf16[768,768], index: 1, kind: input, shape index: {}]   ;;  %s6856_s2 = inlined_call_operand.hbm [shape: f32[1,768], index: 2, kind: input, shape index: {}]   ;;  %s6857_s3 = inlined_call_operand.hbm [shape: bf16[256,768], index: 3, kind: input, shape index: {}]   ;;  %s6858_s4 = inlined_call_operand.hbm [shape: f32[1,256], index: 4, kind: input, shape index: {}]   ;;  %s6859_s5 = inlined_call_operand.hbm [shape: bf16[256,128], index: 5, kind: input, shape index: {}]   ;;  %s6860_s6 = inlined_call_operand.hbm [shape: f32[1,128], index: 6, kind: input, shape index: {}]   ;;  %s6861_s7 = inlined_call_operand.hbm [shape: f32[8,128], index: 7, kind: output, shape index: {}]  }
   0x1   :  { %7080 = sst [smem:[#allocation83_spill]] %s6854_s0 }
   0x2   :  { %7081 = sst [smem:[#allocation84_spill]] %s6856_s2 }
   0x3   :  { %7082 = sst [smem:[#allocation85_spill]] %s6857_s3 }
   0x4   :  { %12 = vsyncpa [#allocation4], 0 }
   0x5   :  { %14 = vsyncpa [#allocation4 + $0x1], 0 }
   0x6   :  { %15 = vsyncpa [#allocation7], 0 }
   0x7   :  { %17 = vsyncpa [#allocation7 + $0x1], 0 }
   0x8   :  { %18 = vsyncpa [#allocation10], 0 }
   0x9   :  { %19 = vsyncpa [#allocation13], 0 }
   0xa   :  { %20 = vsyncpa [#allocation5], 0  ;;  %s5202_s24 = smov 0   ;;  %s5204_s25 = smov 0  }
   0xb   :  { %s5206_s26 = smov 0   ;;  %s5208_s27 = smov 0  }
   0xc LB: > { %s5221_s28 = sadd.s32 4294967295, %s5145_s27   ;;  %p46_p0 = scmp.ne.s32.totalorder %s5137_s25, %s5133_s24  ;;  %s5145_s27 = sphi %s5208_s27, %s7420_s27   ;;  %s5141_s26 = sphi %s5206_s26, %s7419_s26   ;;  %s5137_s25 = sphi %s5204_s25, %s7418_s25   ;;  %s5133_s24 = sphi %s5202_s24, %s7417_s24  }
   0xd   : > { %p6862_p1 = scmp.eq.s32.totalorder %s5221_s28, 0  ;;  %p3762_p2 = scmp.ge.s32.totalorder %s5145_s27, 1 }
   0xe   : > { %p209_p3 = scmp.lt.s32.totalorder %s5145_s27, 4  ;;  %s5147_s8 = smov [#allocation8]  }
   0xf   : > { %p5230_p5 = por %p6862_p1, %p46_p0  ;;  %s222_s9 = sshll.u32 %s5147_s8, 4  ;;  %s223_s9 = int_to_ptr.vmem [resolvable:$true] %s222_s9 }
  0x10   : > { %p5234_p6 = pnand %p3762_p2, %p209_p3  ;;  %s5148_s10 = smov [#allocation9]  }
  0x11   : > { %s7083_s29 = scalar_select %p5230_p5, 1, 0 }
  0x12   : > { %s7084_s30 = scalar_select %p5234_p6, 1, 0 }
  0x13   : > { %p4123_p7 = pneg %p5234_p6  ;;  %s232_s11 = sshll.u32 %s5148_s10, 4  ;;  %s5246_s11 = int_to_ptr.vmem [resolvable:$true] %s232_s11 }
  0x14   : > { %s5149_s13 = smov [#allocation12]   ;;  %s7086_s2 = sld [smem:[#allocation84_spill]] }
  0x15   : > { %p5242_p8 = pnand %p4123_p7, %p6862_p1  ;;  %s5248_s14 = sshll.u32 %s5149_s13, 4  ;;  %s257_s14 = int_to_ptr.vmem [resolvable:$true] %s5248_s14 }
  0x17   : > { %p5258_p10 = pneg %p5242_p8 }
  0x1a   : > { %s4865_s17 = scalar_lea.hbm %s7086_s2, 96 }
  0x1b   : > { %p4866_p9 = scmp.ne.s32.totalorder %s7086_s2, %s4865_s17  ;;  %p4872_p13 = scmp.lt.u32.totalorder %s4865_s17, %s7086_s2 }
  0x1d   : > { %p4868_p11 = pnand %p5258_p10, %p4866_p9 }
  0x1f   : > { %p4869_p12 = pneg %p4868_p11 }
  0x21   : > { %p4874_p0 = pnand %p4872_p13, %p4869_p12 }
  0x23   : > { %4877 = shalt.err (!%p4874_p0)
}
  0x24   : > { %s4878_s23 = scalar_lea.vmem %s223_s9, 96  ;;  %p4886_p4 = scmp.lt.s32.totalorder %s223_s9, %s223_s9 }
  0x25   : > { %p4879_p2 = scmp.ne.s32.totalorder %s223_s9, %s4878_s23  ;;  %p4887_p1 = scmp.lt.s32.totalorder %s4878_s23, %s4878_s23 }
  0x27   : > { %p4881_p3 = pnand %p4879_p2, %p5258_p10  ;;  %p4888_p5 = por %p4887_p1, %p4886_p4 }
  0x29   : > { %p4882_p7 = pneg %p4881_p3 }
  0x2b   : > { %p4889_p6 = pnand %p4888_p5, %p4882_p7 }
  0x2d   : > { %4892 = shalt.err (!%p4889_p6)
}
  0x2e   : > { %4126 = dma.hbm_to_vmem [thread:$0]  (!%p5242_p8), %s7086_s2, 96, %s223_s9, [#allocation7]  }
  0x2f   : > { %s7088_s3 = sld [smem:[#allocation85_spill]] }
  0x35   : > { %s4893_s15 = scalar_lea.hbm %s7088_s3, 12288 }
  0x36   : > { %p4894_p9 = scmp.ne.s32.totalorder %s7088_s3, %s4893_s15  ;;  %p4900_p4 = scmp.lt.u32.totalorder %s4893_s15, %s7088_s3 }
  0x38   : > { %p4896_p11 = pnand %p4894_p9, %p5258_p10 }
  0x3a   : > { %p4897_p1 = pneg %p4896_p11 }
  0x3c   : > { %p4902_p5 = pnand %p4900_p4, %p4897_p1 }
  0x3e   : > { %4905 = shalt.err (!%p4902_p5)
}
  0x3f   : > { %s4906_s9 = scalar_lea.vmem %s5246_s11, 12288  ;;  %p4914_p0 = scmp.lt.s32.totalorder %s5246_s11, %s5246_s11 }
  0x40   : > { %p4907_p6 = scmp.ne.s32.totalorder %s5246_s11, %s4906_s9  ;;  %p4915_p2 = scmp.lt.s32.totalorder %s4906_s9, %s4906_s9 }
  0x42   : > { %p4909_p12 = pnand %p4907_p6, %p5258_p10  ;;  %p4916_p3 = por %p4915_p2, %p4914_p0 }
  0x44   : > { %p4910_p13 = pneg %p4909_p12 }
  0x46   : > { %p4917_p7 = pnand %p4916_p3, %p4910_p13 }
  0x48   : > { %4920 = shalt.err (!%p4917_p7)
}
  0x49   : > { %s6866_s21 = smov 384   ;;  %s6865_s22 = smov 24  }
  0x4a   : > { %4129 = dma.hbm_to_vmem [thread:$0]  (!%p5242_p8), %s7088_s3, 12288, %s5246_s11, [#allocation10], %s6866_s21, %s6866_s21, %s6865_s22  }
  0x4b   : > { %s4921_s13 = scalar_lea.hbm %s6859_s5, 2048 }
  0x4c   : > { %p4922_p9 = scmp.ne.s32.totalorder %s6859_s5, %s4921_s13  ;;  %p4928_p4 = scmp.lt.u32.totalorder %s4921_s13, %s6859_s5 }
  0x4e   : > { %p4924_p11 = pnand %p4922_p9, %p5258_p10 }
  0x50   : > { %p4925_p1 = pneg %p4924_p11 }
  0x52   : > { %p4930_p5 = pnand %p4928_p4, %p4925_p1 }
  0x54   : > { %4933 = shalt.err (!%p4930_p5)
}
  0x55   : > { %s4934_s19 = scalar_lea.vmem %s257_s14, 2048  ;;  %p4942_p0 = scmp.lt.s32.totalorder %s257_s14, %s257_s14 }
  0x56   : > { %p4935_p6 = scmp.ne.s32.totalorder %s257_s14, %s4934_s19  ;;  %p4943_p2 = scmp.lt.s32.totalorder %s4934_s19, %s4934_s19 }
  0x58   : > { %p4937_p12 = pnand %p4935_p6, %p5258_p10  ;;  %p4944_p3 = por %p4943_p2, %p4942_p0 }
  0x5a   : > { %p4938_p13 = pneg %p4937_p12 }
  0x5c   : > { %p4945_p7 = pnand %p4944_p3, %p4938_p13 }
  0x5e   : > { %4948 = shalt.err (!%p4945_p7)
}
  0x5f   : > { %s5152_s11 = smov 64   ;;  %s5153_s9 = smov 4  }
  0x60   : > { %4135 = dma.hbm_to_vmem [thread:$0]  (!%p5242_p8), %s6859_s5, 2048, %s257_s14, [#allocation13], %s5152_s11, %s5152_s11, %s5153_s9  }
  0x61   : > { %s5154_s8 = smov [#allocation11]   ;;  %s5155_s13 = smov [#allocation14]  }
  0x62   : > { %s246_s10 = sshll.u32 %s5154_s8, 4  ;;  %s270_s15 = sshll.u32 %s5155_s13, 4  ;;  %s247_s10 = int_to_ptr.vmem [resolvable:$true] %s246_s10  ;;  %s271_s15 = int_to_ptr.vmem [resolvable:$true] %s270_s15 }
  0x63   : > { %s4949_s18 = scalar_lea.hbm %s6858_s4, 32 }
  0x64   : > { %p4950_p9 = scmp.ne.s32.totalorder %s6858_s4, %s4949_s18  ;;  %p4956_p4 = scmp.lt.u32.totalorder %s4949_s18, %s6858_s4 }
  0x66   : > { %p4952_p11 = pnand %p4950_p9, %p5258_p10 }
  0x68   : > { %p4953_p1 = pneg %p4952_p11 }
  0x6a   : > { %p4958_p5 = pnand %p4956_p4, %p4953_p1 }
  0x6c   : > { %4961 = shalt.err (!%p4958_p5)
}
  0x6d   : > { %s4962_s14 = scalar_lea.vmem %s247_s10, 32  ;;  %p4970_p0 = scmp.lt.s32.totalorder %s247_s10, %s247_s10 }
  0x6e   : > { %p4963_p6 = scmp.ne.s32.totalorder %s247_s10, %s4962_s14  ;;  %p4971_p2 = scmp.lt.s32.totalorder %s4962_s14, %s4962_s14 }
  0x70   : > { %p4965_p12 = pnand %p4963_p6, %p5258_p10  ;;  %p4972_p3 = por %p4971_p2, %p4970_p0 }
  0x72   : > { %p4966_p13 = pneg %p4965_p12 }
  0x74   : > { %p4973_p7 = pnand %p4972_p3, %p4966_p13 }
  0x76   : > { %4976 = shalt.err (!%p4973_p7)
}
  0x77   : > { %4132 = dma.hbm_to_vmem [thread:$0]  (!%p5242_p8), %s6858_s4, 32, %s247_s10, [#allocation10]  }
  0x78   : > { %s4977_s9 = scalar_lea.hbm %s6860_s6, 16 }
  0x79   : > { %p4978_p9 = scmp.ne.s32.totalorder %s6860_s6, %s4977_s9  ;;  %p4984_p4 = scmp.lt.u32.totalorder %s4977_s9, %s6860_s6 }
  0x7b   : > { %p4980_p11 = pnand %p4978_p9, %p5258_p10 }
  0x7d   : > { %p4981_p1 = pneg %p4980_p11 }
  0x7f   : > { %p4986_p5 = pnand %p4984_p4, %p4981_p1 }
  0x81   : > { %4989 = shalt.err (!%p4986_p5)
}
  0x82   : > { %s4990_s16 = scalar_lea.vmem %s271_s15, 16  ;;  %s4997_s10 = scalar_lea.vmem %s271_s15, 32 }
  0x83   : > { %p4991_p6 = scmp.ne.s32.totalorder %s271_s15, %s4990_s16  ;;  %p4998_p0 = scmp.lt.s32.totalorder %s271_s15, %s271_s15 }
  0x84   : > { %p4999_p2 = scmp.lt.s32.totalorder %s4997_s10, %s4990_s16 }
  0x85   : > { %p4993_p12 = pnand %p4991_p6, %p5258_p10 }
  0x86   : > { %p5000_p3 = por %p4999_p2, %p4998_p0 }
  0x87   : > { %p4994_p13 = pneg %p4993_p12 }
  0x89   : > { %p5001_p7 = pnand %p5000_p3, %p4994_p13 }
  0x8b   : > { %5004 = shalt.err (!%p5001_p7)
}
  0x8c   : > { %4138 = dma.hbm_to_vmem [thread:$0]  (!%p5242_p8), %s6860_s6, 16, %s271_s15, [#allocation13]  }
  0x8d   : > { %s5356_s20 = sadd.s32 1, %s5145_s27   ;;  %s33_s12 = sadd.s32 1, %s5141_s26 }
  0x8e   : > { %s30_s19 = ssub.s32 %s5145_s27, %s5356_s20  ;;  %p40_p9 = scmp.ne.s32.totalorder %s5141_s26, %s5137_s25 }
  0x8f   : > { %p31_p10 = scmp.eq.s32.totalorder %s30_s19, 0  ;;  %p41_p11 = scmp.eq.s32.totalorder %s5145_s27, 0 }
  0x90   : > { %p4151_p1 = scmp.lt.s32.totalorder %s5145_s27, 3  ;;  %s5369_s22 = sand.u32 1, %s5141_s26  }
  0x91   : > { %s5366_s14 = scalar_select %p31_p10, %s5141_s26, %s33_s12  }
  0x92   : > { %p42_p4 = por %p41_p11, %p40_p9  ;;  %s3769_s11 = sshll.u32 %s5369_s22, 6 }
  0x93   : > { %s4037_s2 = sshll.u32 %s5145_s27, 7  ;;  %s7089_s0 = sld [smem:[#allocation83_spill]] }
  0x94   : > { %s285_s23 = scalar_lea.vmem [#allocation3], %s3769_s11  ;;  %p5380_p8 = pnand %p4151_p1, %p42_p4 }
  0x95   : > { %s292_s24 = sshll.u32 %s285_s23, 4  ;;  %s302_s13 = sand.u32 1, %s5145_s27   ;;  %s5378_s24 = int_to_ptr.vmem [resolvable:$true] %s292_s24 }
  0x96   : > { %s282_s16 = scalar_lea.sflag [#allocation4], %s5369_s22  ;;  %p5007_p6 = pneg %p5380_p8 }
  0x99   : > { %s5376_s9 = scalar_lea.hbm %s7089_s0, %s4037_s2  ;;  %s5010_s19 = scalar_lea.hbm %s7089_s0, 3072 }
  0x9a   : > { %s5005_s10 = scalar_lea.hbm %s5376_s9, 1024  ;;  %p5011_p0 = scmp.lt.u32.totalorder %s5376_s9, %s7089_s0 }
  0x9b   : > { %p5006_p5 = scmp.ne.s32.totalorder %s5376_s9, %s5005_s10  ;;  %p5012_p2 = scmp.lt.u32.totalorder %s5010_s19, %s5005_s10 }
  0x9c   : > { %p5014_p7 = scmp.lt.u32.totalorder %s5005_s10, %s5376_s9 }
  0x9d   : > { %p5008_p12 = pnand %p5007_p6, %p5006_p5  ;;  %p5013_p3 = por %p5012_p2, %p5011_p0 }
  0x9f   : > { %p5009_p13 = pneg %p5008_p12  ;;  %p5015_p10 = por %p5014_p7, %p5013_p3 }
  0xa1   : > { %p5016_p9 = pnand %p5015_p10, %p5009_p13 }
  0xa3   : > { %5019 = shalt.err (!%p5016_p9)
}
  0xa4   : > { %s5020_s2 = scalar_lea.vmem %s5378_s24, 1024  ;;  %s5156_s15 = smov [#allocation3]  }
  0xa5   : > { %p5021_p11 = scmp.ne.s32.totalorder %s5378_s24, %s5020_s2  ;;  %s5025_s21 = sshll.u32 %s5156_s15, 4  ;;  %s5026_s21 = int_to_ptr.vmem [resolvable:$false] %s5025_s21 }
  0xa6   : > { %s5027_s23 = scalar_lea.vmem %s5026_s21, 2048  ;;  %p5028_p5 = scmp.lt.s32.totalorder %s5378_s24, %s5026_s21 }
  0xa7   : > { %p5023_p1 = pnand %p5021_p11, %p5007_p6  ;;  %p5029_p12 = scmp.lt.s32.totalorder %s5027_s23, %s5020_s2 }
  0xa9   : > { %p5024_p4 = pneg %p5023_p1  ;;  %p5030_p0 = por %p5029_p12, %p5028_p5 }
  0xab   : > { %p5031_p2 = pnand %p5030_p0, %p5024_p4 }
  0xad   : > { %5034 = shalt.err (!%p5031_p2)
}
  0xae   : > { %s5157_s10 = smov 128   ;;  %s5158_s17 = smov 8  }
  0xaf   : > { %s7091_s18 = smov 384   ;;  %s4092_s19 = smul.u32 768, %s5369_s22 }
  0xb0   : > { %4142 = dma.hbm_to_vmem [thread:$0]  (!%p5380_p8), %s5376_s9, 1024, %s5378_s24, %s282_s16, %s7091_s18, %s5157_s10, %s5158_s17  }
  0xb1   : > { %s4093_s12 = smul.u32 12288, %s5145_s27  ;;  %s306_s21 = scalar_lea.vmem [#allocation6], %s4092_s19 }
  0xb2   : > { %s314_s23 = sshll.u32 %s306_s21, 4  ;;  %s5425_s0 = scalar_lea.sflag [#allocation7], %s302_s13  ;;  %s5421_s23 = int_to_ptr.vmem [resolvable:$true] %s314_s23 }
  0xb3   : > { %s5419_s15 = scalar_lea.hbm %s6855_s1, %s4093_s12  ;;  %s5040_s24 = scalar_lea.hbm %s6855_s1, 36864 }
  0xb4   : > { %s5035_s3 = scalar_lea.hbm %s5419_s15, 12288  ;;  %p5041_p10 = scmp.lt.u32.totalorder %s5419_s15, %s6855_s1 }
  0xb5   : > { %p5036_p13 = scmp.ne.s32.totalorder %s5419_s15, %s5035_s3  ;;  %p5042_p9 = scmp.lt.u32.totalorder %s5040_s24, %s5035_s3 }
  0xb6   : > { %p5044_p1 = scmp.lt.u32.totalorder %s5035_s3, %s5419_s15 }
  0xb7   : > { %p5038_p3 = pnand %p5036_p13, %p5007_p6  ;;  %p5043_p11 = por %p5042_p9, %p5041_p10 }
  0xb9   : > { %p5039_p7 = pneg %p5038_p3  ;;  %p5045_p4 = por %p5044_p1, %p5043_p11 }
  0xbb   : > { %p5046_p5 = pnand %p5045_p4, %p5039_p7 }
  0xbd   : > { %5049 = shalt.err (!%p5046_p5)
}
  0xbe   : > { %s5050_s27 = scalar_lea.vmem %s5421_s23, 12288  ;;  %s5159_s13 = smov [#allocation6]  }
  0xbf   : > { %p5051_p12 = scmp.ne.s32.totalorder %s5421_s23, %s5050_s27  ;;  %s5055_s17 = sshll.u32 %s5159_s13, 4  ;;  %s5056_s17 = int_to_ptr.vmem [resolvable:$false] %s5055_s17 }
  0xc0   : > { %s5057_s19 = scalar_lea.vmem %s5056_s17, 24576  ;;  %p5058_p13 = scmp.lt.s32.totalorder %s5421_s23, %s5056_s17 }
  0xc1   : > { %p5053_p0 = pnand %p5051_p12, %p5007_p6  ;;  %p5059_p3 = scmp.lt.s32.totalorder %s5057_s19, %s5050_s27 }
  0xc3   : > { %p5054_p2 = pneg %p5053_p0  ;;  %p5060_p10 = por %p5059_p3, %p5058_p13 }
  0xc5   : > { %p5061_p9 = pnand %p5060_p10, %p5054_p2 }
  0xc7   : > { %5064 = shalt.err (!%p5061_p9)
}
  0xc8   : > { %s7092_s3 = smov 24   ;;  %p7093_p6 = scmp.ne.s32.totalorder %s7084_s30, 0 }
  0xc9   : > { %4145 = dma.hbm_to_vmem [thread:$0]  (!%p5380_p8), %s5419_s15, 12288, %s5421_s23, %s5425_s0, %s7091_s18, %s7091_s18, %s7092_s3  }
  0xca   : > { %326 = sbr.rel (%p7093_p6) target bundleno = 3329 (0xd01), region = 48  ;;  %s328_s12 = sand.u32 (!%p7093_p6), 1, %s5137_s25  }
  0xcb   : > { %s3776_s11 = sshll.u32 (!%p7093_p6), %s328_s12, 6  ;;  %s329_s2 = scalar_lea.sflag (!%p7093_p6), [#allocation4], %s328_s12 }
  0xcc   : > { %s5457_s21 = scalar_lea.vmem (!%p7093_p6), [#allocation3], %s3776_s11  ;;  %p7094_p7 = scmp.ne.s32.totalorder (!%p7093_p6), %s7083_s29, 0 }
  0xd1   : > { %5108 = dma.done.wait (%p7094_p7), %s329_s2, 1024  }
  0xd2   : > { %5110 = vsyncadd (%p7094_p7), %s329_s2, 4294966272  ;;  %s337_s8 = sand.u32 1, %s5221_s28   ;;  %s4094_s22 = smul.u32 768, %s328_s12 }
  0xd3   : > { %s338_s0 = scalar_lea.sflag [#allocation7], %s337_s8 }
  0xd4   : > { %s5464_s18 = scalar_lea.vmem [#allocation6], %s4094_s22 }
  0xd5   : > { %5112 = dma.done.wait (%p7094_p7), %s338_s0, 12288  }
  0xd6   : > { %5114 = vsyncadd (%p7094_p7), %s338_s0, 4294955008  ;;  %p7095_p8 = scmp.eq.s32.totalorder %s5221_s28, 0 }
  0xd8   : > { %5116 = dma.done.wait (%p7095_p8), [#allocation7], 96   ;;  %p7096_p11 = pmov %p7095_p8 }
  0xd9   : > { %p7097_p1 = pmov %p7095_p8 }
  0xda   : > { %5118 = vsyncadd (%p7096_p11), [#allocation7], 4294967200 }
  0xdb   : > { %5120 = dma.done.wait (%p7097_p1), [#allocation10], 12320   ;;  %p7098_p4 = pmov %p7097_p1 }
  0xdc   : > { %p7099_p5 = pmov %p7097_p1 }
  0xdd   : > { %5122 = vsyncadd (%p7098_p4), [#allocation10], 4294954976 }
  0xde   : > { %5124 = dma.done.wait (%p7099_p5), [#allocation13], 2064   ;;  %p7100_p12 = pmov %p7097_p1 }
  0xdf   : > { %p7101_p0 = scmp.ne.s32.totalorder %s5221_s28, 0 }
  0xe0   : > { %5126 = vsyncadd (%p7100_p12), [#allocation13], 4294965232  ;;  %v401_v0 = vlaneseq (!%p7101_p0)  ;;  %v399_v2 = vld [vmem:[#allocation8] sm:$0x3f] (!%p7101_p0) }
  0xe1   : > { %398 = sbr.rel (%p7101_p0) target bundleno = 256 (0x100), region = 80 }
  0xe2   : > { %v402_v1 = vshrl.u32 (!%p7101_p0), %v401_v0, 7 }
  0xe4   : > { %v403_v3 = vsub.s32 (!%p7101_p0), 0, %v402_v1  ;;  %v407_v4 = vsub.s32 (!%p7101_p0), 1, %v402_v1  ;;  %v411_v5 = vsub.s32 (!%p7101_p0), 2, %v402_v1  ;;  %v415_v6 = vsub.s32 (!%p7101_p0), 3, %v402_v1 }
  0xe5   : > { %v419_v7 = vsub.s32 (!%p7101_p0), 4, %v402_v1  ;;  %v423_v8 = vsub.s32 (!%p7101_p0), 5, %v402_v1 }
  0xe6   : > { %v404_v9 = vrot.slane (!%p7101_p0), %v399_v2, %v403_v3  ;;  %v408_v10 = vrot.slane (!%p7101_p0), %v399_v2, %v407_v4  ;;  %v412_v11 = vrot.slane (!%p7101_p0), %v399_v2, %v411_v5  ;;  %v416_v12 = vrot.slane (!%p7101_p0), %v399_v2, %v415_v6 }
  0xe7   : > { %v420_v13 = vrot.slane (!%p7101_p0), %v399_v2, %v419_v7  ;;  %v424_v14 = vrot.slane (!%p7101_p0), %v399_v2, %v423_v8 }
  0xe8   : > { %431 = vst [vmem:[#allocation2] sm:$0xff] %v404_v9  ;;  %437 = vst [vmem:[#allocation2 + $0x30] sm:$0xff] %v404_v9 }
  0xe9   : > { %443 = vst [vmem:[#allocation2 + $0x60] sm:$0xff] %v404_v9  ;;  %449 = vst [vmem:[#allocation2 + $0x90] sm:$0xff] %v404_v9 }
  0xea   : > { %455 = vst [vmem:[#allocation2 + $0xc0] sm:$0xff] %v404_v9  ;;  %461 = vst [vmem:[#allocation2 + $0xf0] sm:$0xff] %v404_v9 }
  0xeb   : > { %467 = vst [vmem:[#allocation2 + $0x120] sm:$0xff] %v404_v9  ;;  %473 = vst [vmem:[#allocation2 + $0x150] sm:$0xff] %v404_v9 }
  0xec   : > { %432 = vst [vmem:[#allocation2 + $0x8] sm:$0xff] %v408_v10  ;;  %438 = vst [vmem:[#allocation2 + $0x38] sm:$0xff] %v408_v10 }
  0xed   : > { %444 = vst [vmem:[#allocation2 + $0x68] sm:$0xff] %v408_v10  ;;  %450 = vst [vmem:[#allocation2 + $0x98] sm:$0xff] %v408_v10 }
  0xee   : > { %456 = vst [vmem:[#allocation2 + $0xc8] sm:$0xff] %v408_v10  ;;  %462 = vst [vmem:[#allocation2 + $0xf8] sm:$0xff] %v408_v10 }
  0xef   : > { %468 = vst [vmem:[#allocation2 + $0x128] sm:$0xff] %v408_v10  ;;  %474 = vst [vmem:[#allocation2 + $0x158] sm:$0xff] %v408_v10 }
  0xf0   : > { %433 = vst [vmem:[#allocation2 + $0x10] sm:$0xff] %v412_v11  ;;  %439 = vst [vmem:[#allocation2 + $0x40] sm:$0xff] %v412_v11 }
  0xf1   : > { %445 = vst [vmem:[#allocation2 + $0x70] sm:$0xff] %v412_v11  ;;  %451 = vst [vmem:[#allocation2 + $0xa0] sm:$0xff] %v412_v11 }
  0xf2   : > { %457 = vst [vmem:[#allocation2 + $0xd0] sm:$0xff] %v412_v11  ;;  %463 = vst [vmem:[#allocation2 + $0x100] sm:$0xff] %v412_v11 }
  0xf3   : > { %469 = vst [vmem:[#allocation2 + $0x130] sm:$0xff] %v412_v11  ;;  %475 = vst [vmem:[#allocation2 + $0x160] sm:$0xff] %v412_v11 }
  0xf4   : > { %434 = vst [vmem:[#allocation2 + $0x18] sm:$0xff] %v416_v12  ;;  %440 = vst [vmem:[#allocation2 + $0x48] sm:$0xff] %v416_v12 }
  0xf5   : > { %446 = vst [vmem:[#allocation2 + $0x78] sm:$0xff] %v416_v12  ;;  %452 = vst [vmem:[#allocation2 + $0xa8] sm:$0xff] %v416_v12 }
  0xf6   : > { %458 = vst [vmem:[#allocation2 + $0xd8] sm:$0xff] %v416_v12  ;;  %464 = vst [vmem:[#allocation2 + $0x108] sm:$0xff] %v416_v12 }
  0xf7   : > { %470 = vst [vmem:[#allocation2 + $0x138] sm:$0xff] %v416_v12  ;;  %476 = vst [vmem:[#allocation2 + $0x168] sm:$0xff] %v416_v12 }
  0xf8   : > { %435 = vst [vmem:[#allocation2 + $0x20] sm:$0xff] %v420_v13  ;;  %441 = vst [vmem:[#allocation2 + $0x50] sm:$0xff] %v420_v13 }
  0xf9   : > { %447 = vst [vmem:[#allocation2 + $0x80] sm:$0xff] %v420_v13  ;;  %453 = vst [vmem:[#allocation2 + $0xb0] sm:$0xff] %v420_v13 }
  0xfa   : > { %459 = vst [vmem:[#allocation2 + $0xe0] sm:$0xff] %v420_v13  ;;  %465 = vst [vmem:[#allocation2 + $0x110] sm:$0xff] %v420_v13 }
  0xfb   : > { %471 = vst [vmem:[#allocation2 + $0x140] sm:$0xff] %v420_v13  ;;  %477 = vst [vmem:[#allocation2 + $0x170] sm:$0xff] %v420_v13 }
  0xfc   : > { %436 = vst [vmem:[#allocation2 + $0x28] sm:$0xff] %v424_v14  ;;  %442 = vst [vmem:[#allocation2 + $0x58] sm:$0xff] %v424_v14 }
  0xfd   : > { %448 = vst [vmem:[#allocation2 + $0x88] sm:$0xff] %v424_v14  ;;  %454 = vst [vmem:[#allocation2 + $0xb8] sm:$0xff] %v424_v14 }
  0xfe   : > { %460 = vst [vmem:[#allocation2 + $0xe8] sm:$0xff] %v424_v14  ;;  %466 = vst [vmem:[#allocation2 + $0x118] sm:$0xff] %v424_v14 }
  0xff   : > { %472 = vst [vmem:[#allocation2 + $0x148] sm:$0xff] %v424_v14  ;;  %478 = vst [vmem:[#allocation2 + $0x178] sm:$0xff] %v424_v14 }
 0x100 PF: > { %v4204_v15 = vld [vmem:[%s5464_s18 + $0x4] ss:$24 sps:$4 sm:$0xff]   ;;  %v4208_v17 = vld [vmem:[%s5464_s18] ss:$24 sps:$4 sm:$0xff]   ;;  %v4210_v19 = vld [vmem:[%s5464_s18 + $0x34] ss:$24 sps:$4 sm:$0xff]  }
 0x101   : > { %v4206_v16 = vld [vmem:[%s5464_s18 + $0xc] ss:$24 sps:$4 sm:$0xff]   ;;  %1151 = vmatprep.subr.bf16.mxu0 %v4204_v15  ;;  %v4209_v18 = vld [vmem:[%s5464_s18 + $0x8] ss:$24 sps:$4 sm:$0xff]   ;;  %v4212_v20 = vld [vmem:[%s5464_s18 + $0x3c] ss:$24 sps:$4 sm:$0xff]  }
 0x102   : > { %1224 = vmatprep.subr.bf16.mxu1 %v4206_v16  ;;  %1152 = vmatpush1.bf16.msra.mxu0 %v4208_v17  ;;  %v4214_v21 = vld [vmem:[%s5464_s18 + $0x30] ss:$24 sps:$4 sm:$0xff]   ;;  %v4216_v23 = vld [vmem:[%s5464_s18 + $0x64] ss:$24 sps:$4 sm:$0xff]   ;;  %v4220_v25 = vld [vmem:[%s5464_s18 + $0x60] ss:$24 sps:$4 sm:$0xff]  }
 0x103   : > { %1225 = vmatpush1.bf16.msra.mxu1 %v4209_v18  ;;  %1153 = vmatprep.subr.bf16.mxu0 %v4210_v19  ;;  %v4215_v22 = vld [vmem:[%s5464_s18 + $0x38] ss:$24 sps:$4 sm:$0xff]   ;;  %v4218_v24 = vld [vmem:[%s5464_s18 + $0x6c] ss:$24 sps:$4 sm:$0xff]   ;;  %v4221_v26 = vld [vmem:[%s5464_s18 + $0x68] ss:$24 sps:$4 sm:$0xff]  }
 0x104   : > { %1226 = vmatprep.subr.bf16.mxu1 %v4212_v20  ;;  %v4222_v27 = vld [vmem:[%s5464_s18 + $0x94] ss:$24 sps:$4 sm:$0xff]   ;;  %v4226_v29 = vld [vmem:[%s5464_s18 + $0x90] ss:$24 sps:$4 sm:$0xff]   ;;  %v4228_v31 = vld [vmem:[%s5464_s18 + $0xc4] ss:$24 sps:$4 sm:$0xff]  }
 0x105   : > { %v4224_v28 = vld [vmem:[%s5464_s18 + $0x9c] ss:$24 sps:$4 sm:$0xff]   ;;  %v4227_v30 = vld [vmem:[%s5464_s18 + $0x98] ss:$24 sps:$4 sm:$0xff]   ;;  %v4230_v32 = vld [vmem:[%s5464_s18 + $0xcc] ss:$24 sps:$4 sm:$0xff]  }
 0x106   : > { %1154 = vmatpush1.bf16.msra.mxu0 %v4214_v21  ;;  %v4232_v33 = vld [vmem:[%s5464_s18 + $0xc0] ss:$24 sps:$4 sm:$0xff]   ;;  %v4234_v35 = vld [vmem:[%s5464_s18 + $0xf4] ss:$24 sps:$4 sm:$0xff]   ;;  %v4238_v37 = vld [vmem:[%s5464_s18 + $0xf0] ss:$24 sps:$4 sm:$0xff]  }
 0x107   : > { %1227 = vmatpush1.bf16.msra.mxu1 %v4215_v22  ;;  %1155 = vmatprep.subr.bf16.mxu0 %v4216_v23  ;;  %v4233_v34 = vld [vmem:[%s5464_s18 + $0xc8] ss:$24 sps:$4 sm:$0xff]   ;;  %v4236_v36 = vld [vmem:[%s5464_s18 + $0xfc] ss:$24 sps:$4 sm:$0xff]   ;;  %v4239_v38 = vld [vmem:[%s5464_s18 + $0xf8] ss:$24 sps:$4 sm:$0xff]  }
 0x108   : > { %1228 = vmatprep.subr.bf16.mxu1 %v4218_v24  ;;  %v4240_v39 = vld [vmem:[%s5464_s18 + $0x124] ss:$24 sps:$4 sm:$0xff]   ;;  %v4244_v41 = vld [vmem:[%s5464_s18 + $0x120] ss:$24 sps:$4 sm:$0xff]   ;;  %v4246_v43 = vld [vmem:[%s5464_s18 + $0x154] ss:$24 sps:$4 sm:$0xff]  }
 0x109   : > { %v4242_v40 = vld [vmem:[%s5464_s18 + $0x12c] ss:$24 sps:$4 sm:$0xff]   ;;  %v4245_v42 = vld [vmem:[%s5464_s18 + $0x128] ss:$24 sps:$4 sm:$0xff]   ;;  %v4248_v44 = vld [vmem:[%s5464_s18 + $0x15c] ss:$24 sps:$4 sm:$0xff]  }
 0x10a   : > { %1156 = vmatpush1.bf16.msra.mxu0 %v4220_v25  ;;  %v4250_v45 = vld [vmem:[%s5464_s18 + $0x150] ss:$24 sps:$4 sm:$0xff]   ;;  %v4252_v47 = vld [vmem:[%s5464_s18 + $0x184] ss:$24 sps:$4 sm:$0xff]   ;;  %v4256_v49 = vld [vmem:[%s5464_s18 + $0x180] ss:$24 sps:$4 sm:$0xff]  }
 0x10b   : > { %1229 = vmatpush1.bf16.msra.mxu1 %v4221_v26  ;;  %1157 = vmatprep.subr.bf16.mxu0 %v4222_v27  ;;  %v4251_v46 = vld [vmem:[%s5464_s18 + $0x158] ss:$24 sps:$4 sm:$0xff]   ;;  %v4254_v48 = vld [vmem:[%s5464_s18 + $0x18c] ss:$24 sps:$4 sm:$0xff]   ;;  %v4257_v50 = vld [vmem:[%s5464_s18 + $0x188] ss:$24 sps:$4 sm:$0xff]  }
 0x10c   : > { %1230 = vmatprep.subr.bf16.mxu1 %v4224_v28  ;;  %v4258_v51 = vld [vmem:[%s5464_s18 + $0x1b4] ss:$24 sps:$4 sm:$0xff]   ;;  %v4262_v53 = vld [vmem:[%s5464_s18 + $0x1b0] ss:$24 sps:$4 sm:$0xff]   ;;  %v4264_v55 = vld [vmem:[%s5464_s18 + $0x1e4] ss:$24 sps:$4 sm:$0xff]  }
 0x10d   : > { %v4260_v52 = vld [vmem:[%s5464_s18 + $0x1bc] ss:$24 sps:$4 sm:$0xff]   ;;  %v4263_v54 = vld [vmem:[%s5464_s18 + $0x1b8] ss:$24 sps:$4 sm:$0xff]   ;;  %v4266_v56 = vld [vmem:[%s5464_s18 + $0x1ec] ss:$24 sps:$4 sm:$0xff]  }
 0x10e   : > { %1158 = vmatpush1.bf16.msra.mxu0 %v4226_v29  ;;  %v4268_v57 = vld [vmem:[%s5464_s18 + $0x1e0] ss:$24 sps:$4 sm:$0xff]   ;;  %v4270_v59 = vld [vmem:[%s5464_s18 + $0x214] ss:$24 sps:$4 sm:$0xff]   ;;  %v4274_v61 = vld [vmem:[%s5464_s18 + $0x210] ss:$24 sps:$4 sm:$0xff]  }
 0x10f   : > { %1231 = vmatpush1.bf16.msra.mxu1 %v4227_v30  ;;  %1159 = vmatprep.subr.bf16.mxu0 %v4228_v31  ;;  %v4269_v58 = vld [vmem:[%s5464_s18 + $0x1e8] ss:$24 sps:$4 sm:$0xff]   ;;  %v4272_v60 = vld [vmem:[%s5464_s18 + $0x21c] ss:$24 sps:$4 sm:$0xff]   ;;  %v4275_v62 = vld [vmem:[%s5464_s18 + $0x218] ss:$24 sps:$4 sm:$0xff]  }
 0x110   : > { %1232 = vmatprep.subr.bf16.mxu1 %v4230_v32  ;;  %v5533_v63 = vld [vmem:[%s5457_s21 + $0x4] ss:$8 sps:$4 sm:$0xff]   ;;  %v4280_v2 = vld [vmem:[%s5464_s18 + $0x240] ss:$24 sps:$4 sm:$0xff]   ;;  %v4284_v5 = vld [vmem:[%s5464_s18 + $0x27c] ss:$24 sps:$4 sm:$0xff]  }
 0x111   : > { %v4276_v0 = vld [vmem:[%s5464_s18 + $0x244] ss:$24 sps:$4 sm:$0xff]   ;;  %1183 = vmatprep.mubr.bf16.mxu0 %v5533_v63  ;;  %1256 = vmatprep.mubr.bf16.mxu1 %v5533_v63  ;;  %v4281_v3 = vld [vmem:[%s5464_s18 + $0x248] ss:$24 sps:$4 sm:$0xff]   ;;  %v4282_v4 = vld [vmem:[%s5464_s18 + $0x274] ss:$24 sps:$4 sm:$0xff]  }
 0x112   : > { %1160 = vmatpush1.bf16.msra.mxu0 %v4232_v33  ;;  %v4278_v1 = vld [vmem:[%s5464_s18 + $0x24c] ss:$24 sps:$4 sm:$0xff]   ;;  %v4286_v6 = vld [vmem:[%s5464_s18 + $0x270] ss:$24 sps:$4 sm:$0xff]   ;;  %v4292_v10 = vld [vmem:[%s5464_s18 + $0x2a0] ss:$24 sps:$4 sm:$0xff]  }
 0x113   : > { %1233 = vmatpush1.bf16.msra.mxu1 %v4233_v34  ;;  %1161 = vmatprep.subr.bf16.mxu0 %v4234_v35  ;;  %v4287_v7 = vld [vmem:[%s5464_s18 + $0x278] ss:$24 sps:$4 sm:$0xff]   ;;  %v4288_v8 = vld [vmem:[%s5464_s18 + $0x2a4] ss:$24 sps:$4 sm:$0xff]   ;;  %v4293_v11 = vld [vmem:[%s5464_s18 + $0x2a8] ss:$24 sps:$4 sm:$0xff]  }
 0x114   : > { %1234 = vmatprep.subr.bf16.mxu1 %v4236_v36  ;;  %v4290_v9 = vld [vmem:[%s5464_s18 + $0x2ac] ss:$24 sps:$4 sm:$0xff]   ;;  %v4296_v13 = vld [vmem:[%s5464_s18 + $0x2dc] ss:$24 sps:$4 sm:$0xff]   ;;  %v4298_v14 = vld [vmem:[%s5464_s18 + $0x2d0] ss:$24 sps:$4 sm:$0xff]  }
 0x115   : > { %v4294_v12 = vld [vmem:[%s5464_s18 + $0x2d4] ss:$24 sps:$4 sm:$0xff]   ;;  %v4299_v15 = vld [vmem:[%s5464_s18 + $0x2d8] ss:$24 sps:$4 sm:$0xff]   ;;  %v5555_v17 = vld [vmem:[%s5457_s21] ss:$8 sps:$4 sm:$0xff]  }
 0x116   : > { %1162 = vmatpush1.bf16.msra.mxu0 %v4238_v37  ;;  %v4305_v16 = vld [vmem:[%s5464_s18 + $0x14] ss:$24 sps:$4 sm:$0xff]   ;;  %v4303_v18 = vld [vmem:[%s5464_s18 + $0x10] ss:$24 sps:$4 sm:$0xff]   ;;  %v4308_v19 = vld [vmem:[%s5464_s18 + $0x44] ss:$24 sps:$4 sm:$0xff]  }
 0x117   : > { %1235 = vmatpush1.bf16.msra.mxu1 %v4239_v38  ;;  %1163 = vmatprep.subr.bf16.mxu0 %v4240_v39  ;;  %v5560_v20 = vld [vmem:[%s5457_s21 + $0x14] ss:$8 sps:$4 sm:$0xff]   ;;  %v4306_v21 = vld [vmem:[%s5464_s18 + $0x40] ss:$24 sps:$4 sm:$0xff]   ;;  %v4309_v24 = vld [vmem:[%s5464_s18 + $0x70] ss:$24 sps:$4 sm:$0xff]  }
 0x118   : > { %1236 = vmatprep.subr.bf16.mxu1 %v4242_v40  ;;  %v4311_v22 = vld [vmem:[%s5464_s18 + $0x74] ss:$24 sps:$4 sm:$0xff]   ;;  %v5569_v23 = vld [vmem:[%s5457_s21 + $0x10] ss:$8 sps:$4 sm:$0xff]   ;;  %v4314_v25 = vld [vmem:[%s5464_s18 + $0xa4] ss:$24 sps:$4 sm:$0xff]  }
 0x119   : > { %v4339_v26 = vld [vmem:[%s5457_s21 + $0x24] ss:$8 sps:$4 sm:$0xff]   ;;  %v4312_v27 = vld [vmem:[%s5464_s18 + $0xa0] ss:$24 sps:$4 sm:$0xff]   ;;  %v4315_v30 = vld [vmem:[%s5464_s18 + $0xd0] ss:$24 sps:$4 sm:$0xff]  }
 0x11a   : > { %1164 = vmatpush1.bf16.msra.mxu0 %v4244_v41  ;;  %v4317_v28 = vld [vmem:[%s5464_s18 + $0xd4] ss:$24 sps:$4 sm:$0xff]   ;;  %v5579_v29 = vld [vmem:[%s5457_s21 + $0x20] ss:$8 sps:$4 sm:$0xff]   ;;  %v4320_v31 = vld [vmem:[%s5464_s18 + $0x104] ss:$24 sps:$4 sm:$0xff]  }
 0x11b   : > { %1237 = vmatpush1.bf16.msra.mxu1 %v4245_v42  ;;  %1165 = vmatprep.subr.bf16.mxu0 %v4246_v43  ;;  %v5584_v32 = vld [vmem:[%s5457_s21 + $0x34] ss:$8 sps:$4 sm:$0xff]   ;;  %v4318_v33 = vld [vmem:[%s5464_s18 + $0x100] ss:$24 sps:$4 sm:$0xff]   ;;  %v4321_v36 = vld [vmem:[%s5464_s18 + $0x130] ss:$24 sps:$4 sm:$0xff]  }
 0x11c   : > { %1238 = vmatprep.subr.bf16.mxu1 %v4248_v44  ;;  %v4323_v34 = vld [vmem:[%s5464_s18 + $0x134] ss:$24 sps:$4 sm:$0xff]   ;;  %v5593_v35 = vld [vmem:[%s5457_s21 + $0x30] ss:$8 sps:$4 sm:$0xff]   ;;  %v4326_v37 = vld [vmem:[%s5464_s18 + $0x164] ss:$24 sps:$4 sm:$0xff]  }
 0x11d   : > { %v4324_v38 = vld [vmem:[%s5464_s18 + $0x160] ss:$24 sps:$4 sm:$0xff]   ;;  %v4329_v39 = vld [vmem:[%s5464_s18 + $0x194] ss:$24 sps:$4 sm:$0xff]   ;;  %v4327_v40 = vld [vmem:[%s5464_s18 + $0x190] ss:$24 sps:$4 sm:$0xff]  }
 0x11e   : > { %1166 = vmatpush1.bf16.msra.mxu0 %v4250_v45  ;;  %v4334_v41 = vld [vmem:[%s5464_s18 + $0x1c4] ss:$24 sps:$4 sm:$0xff]   ;;  %v4332_v42 = vld [vmem:[%s5464_s18 + $0x1c0] ss:$24 sps:$4 sm:$0xff]   ;;  %v4338_v43 = vld [vmem:[%s5464_s18 + $0x1f4] ss:$24 sps:$4 sm:$0xff]  }
 0x11f   : > { %1239 = vmatpush1.bf16.msra.mxu1 %v4251_v46  ;;  %1167 = vmatprep.subr.bf16.mxu0 %v4252_v47  ;;  %v4336_v44 = vld [vmem:[%s5464_s18 + $0x1f0] ss:$24 sps:$4 sm:$0xff]   ;;  %v4343_v45 = vld [vmem:[%s5464_s18 + $0x224] ss:$24 sps:$4 sm:$0xff]   ;;  %v4341_v46 = vld [vmem:[%s5464_s18 + $0x220] ss:$24 sps:$4 sm:$0xff]  }
 0x120   : > { %1240 = vmatprep.subr.bf16.mxu1 %v4254_v48  ;;  %v4347_v47 = vld [vmem:[%s5464_s18 + $0x254] ss:$24 sps:$4 sm:$0xff]   ;;  %v4345_v48 = vld [vmem:[%s5464_s18 + $0x250] ss:$24 sps:$4 sm:$0xff]   ;;  %p3887_p2 = scmp.ne.s32.totalorder %s5221_s28, 2 }
 0x122   : > { %1168 = vmatpush1.bf16.msra.mxu0 %v4256_v49  ;;  %v4352_v49 = vld [vmem:[%s5464_s18 + $0x284] ss:$24 sps:$4 sm:$0xff]  }
 0x123   : > { %1241 = vmatpush1.bf16.msra.mxu1 %v4257_v50  ;;  %1169 = vmatprep.subr.bf16.mxu0 %v4258_v51  ;;  %v4350_v50 = vld [vmem:[%s5464_s18 + $0x280] ss:$24 sps:$4 sm:$0xff]   ;;  %v4356_v51 = vld [vmem:[%s5464_s18 + $0x2b4] ss:$24 sps:$4 sm:$0xff]  }
 0x124   : > { %1242 = vmatprep.subr.bf16.mxu1 %v4260_v52  ;;  %v4354_v52 = vld [vmem:[%s5464_s18 + $0x2b0] ss:$24 sps:$4 sm:$0xff]  }
 0x126   : > { %1170 = vmatpush1.bf16.msra.mxu0 %v4262_v53  ;;  %v4359_v53 = vld [vmem:[%s5464_s18 + $0x2e4] ss:$24 sps:$4 sm:$0xff]  }
 0x127   : > { %1243 = vmatpush1.bf16.msra.mxu1 %v4263_v54  ;;  %1171 = vmatprep.subr.bf16.mxu0 %v4264_v55  ;;  %v4357_v54 = vld [vmem:[%s5464_s18 + $0x2e0] ss:$24 sps:$4 sm:$0xff]  }
 0x128   : > { %1244 = vmatprep.subr.bf16.mxu1 %v4266_v56  ;;  %v479_v55 = vld [vmem:[#allocation2] sm:$0xff]  ;;  %v481_v56 = vld [vmem:[#allocation2 + $0x10] sm:$0xff] }
 0x12a   : > { %1172 = vmatpush1.bf16.msra.mxu0 %v4268_v57  ;;  %v480_v57 = vld [vmem:[#allocation2 + $0x8] sm:$0xff] }
 0x12b   : > { %1245 = vmatpush1.bf16.msra.mxu1 %v4269_v58  ;;  %1173 = vmatprep.subr.bf16.mxu0 %v4270_v59  ;;  %v482_v58 = vld [vmem:[#allocation2 + $0x18] sm:$0xff] }
 0x12c   : > { %1246 = vmatprep.subr.bf16.mxu1 %v4272_v60 }
 0x12e   : > { %1174 = vmatpush1.bf16.msra.mxu0 %v4274_v61  ;;  %v485_v61 = vld [vmem:[#allocation2 + $0x30] sm:$0xff] }
 0x12f   : > { %1247 = vmatpush1.bf16.msra.mxu1 %v4275_v62  ;;  %1175 = vmatprep.subr.bf16.mxu0 %v4276_v0  ;;  %v487_v62 = vld [vmem:[#allocation2 + $0x40] sm:$0xff] }
 0x130   : > { %1248 = vmatprep.subr.bf16.mxu1 %v4278_v1 }
 0x132   : > { %1176 = vmatpush1.bf16.msra.mxu0 %v4280_v2 }
 0x133   : > { %1249 = vmatpush1.bf16.msra.mxu1 %v4281_v3  ;;  %1177 = vmatprep.subr.bf16.mxu0 %v4282_v4  ;;  %v486_v3 = vld [vmem:[#allocation2 + $0x38] sm:$0xff]  ;;  %v488_v4 = vld [vmem:[#allocation2 + $0x48] sm:$0xff] }
 0x134   : > { %1250 = vmatprep.subr.bf16.mxu1 %v4284_v5 }
 0x136   : > { %1178 = vmatpush1.bf16.msra.mxu0 %v4286_v6 }
 0x137   : > { %1251 = vmatpush1.bf16.msra.mxu1 %v4287_v7  ;;  %1179 = vmatprep.subr.bf16.mxu0 %v4288_v8 }
 0x138   : > { %1252 = vmatprep.subr.bf16.mxu1 %v4290_v9 }
 0x13a   : > { %1180 = vmatpush1.bf16.msra.mxu0 %v4292_v10 }
 0x13b   : > { %1253 = vmatpush1.bf16.msra.mxu1 %v4293_v11  ;;  %1181 = vmatprep.subr.bf16.mxu0 %v4294_v12 }
 0x13c   : > { %1254 = vmatprep.subr.bf16.mxu1 %v4296_v13 }
 0x13e   : > { %1182 = vmatpush1.bf16.msra.mxu0 %v4298_v14 }
 0x13f   : > { %1255 = vmatpush1.bf16.msra.mxu1 %v4299_v15  ;;  %1297 = vmatprep.subr.bf16.mxu0 %v4305_v16  ;;  %v491_v15 = vld [vmem:[#allocation2 + $0x60] sm:$0xff] }
 0x140   : > { %4060 = vmatprep.subr.bf16.mxu1 %v4305_v16  ;;  %v493_v16 = vld [vmem:[#allocation2 + $0x70] sm:$0xff] }
 0x141   : > { %1184 = vmatmul.mubr.bf16.vlgmr.msra.gmra.mrb[0].mxu0 %v5555_v17 }
 0x142   : > { %1257 = vmatmul.mubr.bf16.vlgmr.msra.gmra.mrb[0].mxu1 %v5555_v17  ;;  %1298 = vmatpush1.bf16.msra.mxu0 %v4303_v18 }
 0x143   : > { %4076 = vmatpush1.bf16.msra.mxu1 %v4303_v18  ;;  %1299 = vmatprep.subr.bf16.mxu0 %v4308_v19  ;;  %v494_v18 = vld [vmem:[#allocation2 + $0x78] sm:$0xff] }
 0x144   : > { %4061 = vmatprep.subr.bf16.mxu1 %v4308_v19  ;;  %1193 = vmatprep.mubr.bf16.mxu0 %v5560_v20 }
 0x145   : > { %1266 = vmatprep.mubr.bf16.mxu1 %v5560_v20 }
 0x146   : > { %1300 = vmatpush1.bf16.msra.mxu0 %v4306_v21 }
 0x147   : > { %4077 = vmatpush1.bf16.msra.mxu1 %v4306_v21  ;;  %1301 = vmatprep.subr.bf16.mxu0 %v4311_v22  ;;  %v497_v21 = vld [vmem:[#allocation2 + $0x90] sm:$0xff] }
 0x148   : > { %4062 = vmatprep.subr.bf16.mxu1 %v4311_v22  ;;  %v499_v22 = vld [vmem:[#allocation2 + $0xa0] sm:$0xff] }
 0x149   : > { %1194 = vmatmul.mubr.bf16.gmra.mrb[4].mxu0 %v5569_v23 }
 0x14a   : > { %1267 = vmatmul.mubr.bf16.gmra.mrb[4].mxu1 %v5569_v23  ;;  %1302 = vmatpush1.bf16.msra.mxu0 %v4309_v24 }
 0x14b   : > { %4078 = vmatpush1.bf16.msra.mxu1 %v4309_v24  ;;  %1303 = vmatprep.subr.bf16.mxu0 %v4314_v25 }
 0x14c   : > { %4063 = vmatprep.subr.bf16.mxu1 %v4314_v25  ;;  %1203 = vmatprep.mubr.bf16.mxu0 %v4339_v26 }
 0x14d   : > { %1276 = vmatprep.mubr.bf16.mxu1 %v4339_v26 }
 0x14e   : > { %1304 = vmatpush1.bf16.msra.mxu0 %v4312_v27 }
 0x14f   : > { %4079 = vmatpush1.bf16.msra.mxu1 %v4312_v27  ;;  %1305 = vmatprep.subr.bf16.mxu0 %v4317_v28  ;;  %v498_v27 = vld [vmem:[#allocation2 + $0x98] sm:$0xff] }
 0x150   : > { %4064 = vmatprep.subr.bf16.mxu1 %v4317_v28  ;;  %v500_v28 = vld [vmem:[#allocation2 + $0xa8] sm:$0xff] }
 0x151   : > { %1204 = vmatmul.mubr.bf16.gmra.mrb[8].mxu0 %v5579_v29 }
 0x152   : > { %1277 = vmatmul.mubr.bf16.gmra.mrb[8].mxu1 %v5579_v29  ;;  %1306 = vmatpush1.bf16.msra.mxu0 %v4315_v30 }
 0x153   : > { %4080 = vmatpush1.bf16.msra.mxu1 %v4315_v30  ;;  %1307 = vmatprep.subr.bf16.mxu0 %v4320_v31 }
 0x154   : > { %4065 = vmatprep.subr.bf16.mxu1 %v4320_v31  ;;  %1213 = vmatprep.mubr.bf16.mxu0 %v5584_v32 }
 0x155   : > { %1286 = vmatprep.mubr.bf16.mxu1 %v5584_v32 }
 0x156   : > { %1308 = vmatpush1.bf16.msra.mxu0 %v4318_v33 }
 0x157   : > { %4081 = vmatpush1.bf16.msra.mxu1 %v4318_v33  ;;  %1309 = vmatprep.subr.bf16.mxu0 %v4323_v34 }
 0x158   : > { %4066 = vmatprep.subr.bf16.mxu1 %v4323_v34 }
 0x159   : > { %1214 = vmatmul.mubr.bf16.gmra.mrb[12].mxu0 %v5593_v35 }
 0x15a   : > { %1287 = vmatmul.mubr.bf16.gmra.mrb[12].mxu1 %v5593_v35  ;;  %1310 = vmatpush1.bf16.msra.mxu0 %v4321_v36 }
 0x15b   : > { %4082 = vmatpush1.bf16.msra.mxu1 %v4321_v36  ;;  %1311 = vmatprep.subr.bf16.mxu0 %v4326_v37 }
 0x15c   : > { %4067 = vmatprep.subr.bf16.mxu1 %v4326_v37  ;;  %1329 = vmatprep.mubr.bf16.mxu0 %v5533_v63 }
 0x15d   : > { %1349 = vmatprep.mubr.bf16.mxu1 %v4339_v26 }
 0x15e   : > { %1312 = vmatpush1.bf16.msra.mxu0 %v4324_v38 }
 0x15f   : > { %4083 = vmatpush1.bf16.msra.mxu1 %v4324_v38  ;;  %1313 = vmatprep.subr.bf16.mxu0 %v4329_v39 }
 0x160   : > { %4068 = vmatprep.subr.bf16.mxu1 %v4329_v39  ;;  %v503_v39 = vld [vmem:[#allocation2 + $0xc0] sm:$0xff] }
 0x162   : > { %1314 = vmatpush1.bf16.msra.mxu0 %v4327_v40 }
 0x163   : > { %4084 = vmatpush1.bf16.msra.mxu1 %v4327_v40  ;;  %1315 = vmatprep.subr.bf16.mxu0 %v4334_v41  ;;  %v505_v40 = vld [vmem:[#allocation2 + $0xd0] sm:$0xff] }
 0x164   : > { %4069 = vmatprep.subr.bf16.mxu1 %v4334_v41  ;;  %v504_v41 = vld [vmem:[#allocation2 + $0xc8] sm:$0xff] }
 0x166   : > { %1316 = vmatpush1.bf16.msra.mxu0 %v4332_v42 }
 0x167   : > { %4085 = vmatpush1.bf16.msra.mxu1 %v4332_v42  ;;  %1317 = vmatprep.subr.bf16.mxu0 %v4338_v43  ;;  %v506_v42 = vld [vmem:[#allocation2 + $0xd8] sm:$0xff] }
 0x168   : > { %4070 = vmatprep.subr.bf16.mxu1 %v4338_v43 }
 0x16a   : > { %1318 = vmatpush1.bf16.msra.mxu0 %v4336_v44 }
 0x16b   : > { %4086 = vmatpush1.bf16.msra.mxu1 %v4336_v44  ;;  %1319 = vmatprep.subr.bf16.mxu0 %v4343_v45 }
 0x16c   : > { %4071 = vmatprep.subr.bf16.mxu1 %v4343_v45  ;;  %v509_v45 = vld [vmem:[#allocation2 + $0xf0] sm:$0xff] }
 0x16e   : > { %1320 = vmatpush1.bf16.msra.mxu0 %v4341_v46 }
 0x16f   : > { %4087 = vmatpush1.bf16.msra.mxu1 %v4341_v46  ;;  %1321 = vmatprep.subr.bf16.mxu0 %v4347_v47  ;;  %v511_v46 = vld [vmem:[#allocation2 + $0x100] sm:$0xff] }
 0x170   : > { %4072 = vmatprep.subr.bf16.mxu1 %v4347_v47 }
 0x172   : > { %1322 = vmatpush1.bf16.msra.mxu0 %v4345_v48 }
 0x173   : > { %4088 = vmatpush1.bf16.msra.mxu1 %v4345_v48  ;;  %1323 = vmatprep.subr.bf16.mxu0 %v4352_v49 }
 0x174   : > { %4073 = vmatprep.subr.bf16.mxu1 %v4352_v49 }
 0x176   : > { %1324 = vmatpush1.bf16.msra.mxu0 %v4350_v50 }
 0x177   : > { %4089 = vmatpush1.bf16.msra.mxu1 %v4350_v50  ;;  %1325 = vmatprep.subr.bf16.mxu0 %v4356_v51 }
 0x178   : > { %4074 = vmatprep.subr.bf16.mxu1 %v4356_v51  ;;  %v510_v51 = vld [vmem:[#allocation2 + $0xf8] sm:$0xff] }
 0x17a   : > { %1326 = vmatpush1.bf16.msra.mxu0 %v4354_v52 }
 0x17b   : > { %4090 = vmatpush1.bf16.msra.mxu1 %v4354_v52  ;;  %1327 = vmatprep.subr.bf16.mxu0 %v4359_v53  ;;  %v512_v52 = vld [vmem:[#allocation2 + $0x108] sm:$0xff] }
 0x17c   : > { %4075 = vmatprep.subr.bf16.mxu1 %v4359_v53 }
 0x17e   : > { %1328 = vmatpush1.bf16.msra.mxu0 %v4357_v54 }
 0x17f   : > { %4091 = vmatpush1.bf16.msra.mxu1 %v4357_v54 }
 0x181   : > { %1330 = vmatmul.mubr.bf16.vlgmr.msra.gmra.mrb[16].mxu0 %v5555_v17  ;;  %v492_v17 = vld [vmem:[#allocation2 + $0x68] sm:$0xff] }
 0x182   : > { %1350 = vmatmul.mubr.bf16.vlgmr.msra.gmra.mrb[16].mxu1 %v5579_v29  ;;  %1339 = vmatprep.mubr.bf16.mxu0 %v5560_v20 }
 0x183   : > { %1359 = vmatprep.mubr.bf16.mxu1 %v5584_v32 }
 0x189   : > { %1340 = vmatmul.mubr.bf16.gmra.mrb[20].mxu0 %v5569_v23 }
 0x18a   : > { %1360 = vmatmul.mubr.bf16.gmra.mrb[20].mxu1 %v5593_v35 }
 0x214   : > { %v1185_v59 = vpop.f32.mrb[0].mxu0 }
 0x215   : > { %v1258_v60 = vpop.f32.mrb[0].mxu1  ;;  %v1370_v63 = vadd.f32 %v1185_v59, %v479_v55  ;;  %v1187_v1 = vpop.f32.mrb[1].mxu0 }
 0x216   : > { %v1372_v0 = vadd.f32 %v1258_v60, %v481_v56  ;;  %v1260_v2 = vpop.f32.mrb[1].mxu1  ;;  %v1371_v5 = vadd.f32 %v1187_v1, %v480_v57  ;;  %v1189_v7 = vpop.f32.mrb[2].mxu0  ;;  %v516_v1 = vld [vmem:[#allocation2 + $0x128] sm:$0xff] }
 0x217   : > { %v1373_v6 = vadd.f32 %v1260_v2, %v482_v58  ;;  %v1262_v8 = vpop.f32.mrb[2].mxu1  ;;  %1418 = vst [vmem:[#allocation2] sm:$0xff] %v1370_v63  ;;  %v1376_v9 = vadd.f32 %v1189_v7, %v485_v61  ;;  %v1191_v11 = vpop.f32.mrb[3].mxu0  ;;  %v515_v63 = vld [vmem:[#allocation2 + $0x120] sm:$0xff]  ;;  %v518_v2 = vld [vmem:[#allocation2 + $0x138] sm:$0xff] }
 0x218   : > { %1420 = vst [vmem:[#allocation2 + $0x10] sm:$0xff] %v1372_v0  ;;  %v1378_v10 = vadd.f32 %v1262_v8, %v487_v62  ;;  %v1264_v12 = vpop.f32.mrb[3].mxu1  ;;  %1419 = vst [vmem:[#allocation2 + $0x8] sm:$0xff] %v1371_v5  ;;  %v1377_v13 = vadd.f32 %v1191_v11, %v486_v3  ;;  %v517_v0 = vld [vmem:[#allocation2 + $0x130] sm:$0xff]  ;;  %v522_v11 = vld [vmem:[#allocation2 + $0x158] sm:$0xff] }
 0x219   : > { %1421 = vst [vmem:[#allocation2 + $0x18] sm:$0xff] %v1373_v6  ;;  %v1379_v14 = vadd.f32 %v1264_v12, %v488_v4  ;;  %1424 = vst [vmem:[#allocation2 + $0x30] sm:$0xff] %v1376_v9  ;;  %v521_v5 = vld [vmem:[#allocation2 + $0x150] sm:$0xff]  ;;  %v523_v6 = vld [vmem:[#allocation2 + $0x160] sm:$0xff] }
 0x21a   : > { %1426 = vst [vmem:[#allocation2 + $0x40] sm:$0xff] %v1378_v10  ;;  %1425 = vst [vmem:[#allocation2 + $0x38] sm:$0xff] %v1377_v13  ;;  %v524_v12 = vld [vmem:[#allocation2 + $0x168] sm:$0xff] }
 0x21b   : > { %1427 = vst [vmem:[#allocation2 + $0x48] sm:$0xff] %v1379_v14 }
 0x21c   : > { %v1195_v19 = vpop.f32.mrb[4].mxu0 }
 0x21d   : > { %v1268_v20 = vpop.f32.mrb[4].mxu1  ;;  %v1382_v23 = vadd.f32 %v1195_v19, %v491_v15  ;;  %v1197_v25 = vpop.f32.mrb[5].mxu0 }
 0x21e   : > { %v1384_v24 = vadd.f32 %v1268_v20, %v493_v16  ;;  %v1270_v26 = vpop.f32.mrb[5].mxu1  ;;  %v1383_v29 = vadd.f32 %v1197_v25, %v492_v17  ;;  %v1199_v31 = vpop.f32.mrb[6].mxu0  ;;  %v484_v25 = vld [vmem:[#allocation2 + $0x28] sm:$0xff] }
 0x21f   : > { %v1385_v30 = vadd.f32 %v1270_v26, %v494_v18  ;;  %v1272_v32 = vpop.f32.mrb[6].mxu1  ;;  %1430 = vst [vmem:[#allocation2 + $0x60] sm:$0xff] %v1382_v23  ;;  %v1388_v33 = vadd.f32 %v1199_v31, %v497_v21  ;;  %v1201_v35 = vpop.f32.mrb[7].mxu0  ;;  %v483_v23 = vld [vmem:[#allocation2 + $0x20] sm:$0xff]  ;;  %v508_v26 = vld [vmem:[#allocation2 + $0xe8] sm:$0xff] }
 0x220   : > { %1432 = vst [vmem:[#allocation2 + $0x70] sm:$0xff] %v1384_v24  ;;  %v1390_v34 = vadd.f32 %v1272_v32, %v499_v22  ;;  %v1274_v36 = vpop.f32.mrb[7].mxu1  ;;  %1431 = vst [vmem:[#allocation2 + $0x68] sm:$0xff] %v1383_v29  ;;  %v1389_v37 = vadd.f32 %v1201_v35, %v498_v27  ;;  %v507_v24 = vld [vmem:[#allocation2 + $0xe0] sm:$0xff]  ;;  %v489_v29 = vld [vmem:[#allocation2 + $0x50] sm:$0xff] }
 0x221   : > { %1433 = vst [vmem:[#allocation2 + $0x78] sm:$0xff] %v1385_v30  ;;  %v1391_v38 = vadd.f32 %v1274_v36, %v500_v28  ;;  %1436 = vst [vmem:[#allocation2 + $0x90] sm:$0xff] %v1388_v33  ;;  %v513_v30 = vld [vmem:[#allocation2 + $0x110] sm:$0xff]  ;;  %v490_v35 = vld [vmem:[#allocation2 + $0x58] sm:$0xff] }
 0x222   : > { %1438 = vst [vmem:[#allocation2 + $0xa0] sm:$0xff] %v1390_v34  ;;  %1437 = vst [vmem:[#allocation2 + $0x98] sm:$0xff] %v1389_v37  ;;  %v514_v36 = vld [vmem:[#allocation2 + $0x118] sm:$0xff] }
 0x223   : > { %1439 = vst [vmem:[#allocation2 + $0xa8] sm:$0xff] %v1391_v38 }
 0x224   : > { %v1205_v43 = vpop.f32.mrb[8].mxu0 }
 0x225   : > { %v1278_v44 = vpop.f32.mrb[8].mxu1  ;;  %v1394_v47 = vadd.f32 %v1205_v43, %v503_v39  ;;  %v1207_v49 = vpop.f32.mrb[9].mxu0 }
 0x226   : > { %v1396_v48 = vadd.f32 %v1278_v44, %v505_v40  ;;  %v1280_v50 = vpop.f32.mrb[9].mxu1  ;;  %v1395_v53 = vadd.f32 %v1207_v49, %v504_v41  ;;  %v1209_v55 = vpop.f32.mrb[10].mxu0  ;;  %v496_v49 = vld [vmem:[#allocation2 + $0x88] sm:$0xff] }
 0x227   : > { %v1397_v54 = vadd.f32 %v1280_v50, %v506_v42  ;;  %v1282_v56 = vpop.f32.mrb[10].mxu1  ;;  %1442 = vst [vmem:[#allocation2 + $0xc0] sm:$0xff] %v1394_v47  ;;  %v1400_v57 = vadd.f32 %v1209_v55, %v509_v45  ;;  %v1211_v59 = vpop.f32.mrb[11].mxu0  ;;  %v495_v47 = vld [vmem:[#allocation2 + $0x80] sm:$0xff]  ;;  %v520_v50 = vld [vmem:[#allocation2 + $0x148] sm:$0xff] }
 0x228   : > { %1444 = vst [vmem:[#allocation2 + $0xd0] sm:$0xff] %v1396_v48  ;;  %v1402_v58 = vadd.f32 %v1282_v56, %v511_v46  ;;  %v1284_v60 = vpop.f32.mrb[11].mxu1  ;;  %1443 = vst [vmem:[#allocation2 + $0xc8] sm:$0xff] %v1395_v53  ;;  %v1401_v61 = vadd.f32 %v1211_v59, %v510_v51  ;;  %v519_v48 = vld [vmem:[#allocation2 + $0x140] sm:$0xff]  ;;  %v501_v53 = vld [vmem:[#allocation2 + $0xb0] sm:$0xff] }
 0x229   : > { %1445 = vst [vmem:[#allocation2 + $0xd8] sm:$0xff] %v1397_v54  ;;  %v1403_v62 = vadd.f32 %v1284_v60, %v512_v52  ;;  %1448 = vst [vmem:[#allocation2 + $0xf0] sm:$0xff] %v1400_v57  ;;  %v525_v54 = vld [vmem:[#allocation2 + $0x170] sm:$0xff]  ;;  %v502_v59 = vld [vmem:[#allocation2 + $0xb8] sm:$0xff] }
 0x22a   : > { %1450 = vst [vmem:[#allocation2 + $0x100] sm:$0xff] %v1402_v58  ;;  %1449 = vst [vmem:[#allocation2 + $0xf8] sm:$0xff] %v1401_v61  ;;  %v526_v60 = vld [vmem:[#allocation2 + $0x178] sm:$0xff] }
 0x22b   : > { %1451 = vst [vmem:[#allocation2 + $0x108] sm:$0xff] %v1403_v62 }
 0x22c   : > { %v1215_v3 = vpop.f32.mrb[12].mxu0 }
 0x22d   : > { %v1288_v4 = vpop.f32.mrb[12].mxu1  ;;  %v1406_v7 = vadd.f32 %v1215_v3, %v515_v63  ;;  %v1217_v9 = vpop.f32.mrb[13].mxu0 }
 0x22e   : > { %v1408_v8 = vadd.f32 %v1288_v4, %v517_v0  ;;  %v1290_v10 = vpop.f32.mrb[13].mxu1  ;;  %v1407_v13 = vadd.f32 %v1217_v9, %v516_v1  ;;  %v1219_v15 = vpop.f32.mrb[14].mxu0 }
 0x22f   : > { %v1409_v14 = vadd.f32 %v1290_v10, %v518_v2  ;;  %v1292_v16 = vpop.f32.mrb[14].mxu1  ;;  %1454 = vst [vmem:[#allocation2 + $0x120] sm:$0xff] %v1406_v7  ;;  %v1412_v17 = vadd.f32 %v1219_v15, %v521_v5  ;;  %v1221_v19 = vpop.f32.mrb[15].mxu0 }
 0x230   : > { %1456 = vst [vmem:[#allocation2 + $0x130] sm:$0xff] %v1408_v8  ;;  %v1414_v18 = vadd.f32 %v1292_v16, %v523_v6  ;;  %v1294_v20 = vpop.f32.mrb[15].mxu1  ;;  %1455 = vst [vmem:[#allocation2 + $0x128] sm:$0xff] %v1407_v13  ;;  %v1413_v21 = vadd.f32 %v1221_v19, %v522_v11 }
 0x231   : > { %1457 = vst [vmem:[#allocation2 + $0x138] sm:$0xff] %v1409_v14  ;;  %v1415_v22 = vadd.f32 %v1294_v20, %v524_v12  ;;  %1460 = vst [vmem:[#allocation2 + $0x150] sm:$0xff] %v1412_v17 }
 0x232   : > { %1462 = vst [vmem:[#allocation2 + $0x160] sm:$0xff] %v1414_v18  ;;  %1461 = vst [vmem:[#allocation2 + $0x158] sm:$0xff] %v1413_v21 }
 0x233   : > { %1463 = vst [vmem:[#allocation2 + $0x168] sm:$0xff] %v1415_v22 }
 0x254   : > { %v1331_v27 = vpop.f32.mrb[16].mxu0 }
 0x255   : > { %v1351_v28 = vpop.f32.mrb[16].mxu1  ;;  %v1374_v31 = vadd.f32 %v1331_v27, %v483_v23  ;;  %v1333_v33 = vpop.f32.mrb[17].mxu0 }
 0x256   : > { %v1398_v32 = vadd.f32 %v1351_v28, %v507_v24  ;;  %v1353_v34 = vpop.f32.mrb[17].mxu1  ;;  %v1375_v37 = vadd.f32 %v1333_v33, %v484_v25  ;;  %v1335_v39 = vpop.f32.mrb[18].mxu0 }
 0x257   : > { %v1399_v38 = vadd.f32 %v1353_v34, %v508_v26  ;;  %v1355_v40 = vpop.f32.mrb[18].mxu1  ;;  %1422 = vst [vmem:[#allocation2 + $0x20] sm:$0xff] %v1374_v31  ;;  %v1380_v41 = vadd.f32 %v1335_v39, %v489_v29  ;;  %v1337_v43 = vpop.f32.mrb[19].mxu0 }
 0x258   : > { %1446 = vst [vmem:[#allocation2 + $0xe0] sm:$0xff] %v1398_v32  ;;  %v1404_v42 = vadd.f32 %v1355_v40, %v513_v30  ;;  %v1357_v44 = vpop.f32.mrb[19].mxu1  ;;  %1423 = vst [vmem:[#allocation2 + $0x28] sm:$0xff] %v1375_v37  ;;  %v1381_v45 = vadd.f32 %v1337_v43, %v490_v35 }
 0x259   : > { %1447 = vst [vmem:[#allocation2 + $0xe8] sm:$0xff] %v1399_v38  ;;  %v1405_v46 = vadd.f32 %v1357_v44, %v514_v36  ;;  %1428 = vst [vmem:[#allocation2 + $0x50] sm:$0xff] %v1380_v41 }
 0x25a   : > { %1452 = vst [vmem:[#allocation2 + $0x110] sm:$0xff] %v1404_v42  ;;  %1429 = vst [vmem:[#allocation2 + $0x58] sm:$0xff] %v1381_v45 }
 0x25b   : > { %1453 = vst [vmem:[#allocation2 + $0x118] sm:$0xff] %v1405_v46 }
 0x25c   : > { %v1341_v51 = vpop.f32.mrb[20].mxu0 }
 0x25d   : > { %v1361_v52 = vpop.f32.mrb[20].mxu1  ;;  %v1386_v55 = vadd.f32 %v1341_v51, %v495_v47  ;;  %v1343_v57 = vpop.f32.mrb[21].mxu0  ;;  %1469 = sbr.rel (%p3887_p2) target bundleno = 3304 (0xce8), region = 84 }
 0x25e   : > { %v1410_v56 = vadd.f32 %v1361_v52, %v519_v48  ;;  %v1363_v58 = vpop.f32.mrb[21].mxu1  ;;  %v1387_v61 = vadd.f32 %v1343_v57, %v496_v49  ;;  %v1345_v63 = vpop.f32.mrb[22].mxu0 }
 0x25f   : > { %v1411_v62 = vadd.f32 %v1363_v58, %v520_v50  ;;  %v1365_v0 = vpop.f32.mrb[22].mxu1  ;;  %1434 = vst [vmem:[#allocation2 + $0x80] sm:$0xff] %v1386_v55  ;;  %v1392_v1 = vadd.f32 %v1345_v63, %v501_v53  ;;  %v1347_v3 = vpop.f32.mrb[23].mxu0 }
 0x260   : > { %1458 = vst [vmem:[#allocation2 + $0x140] sm:$0xff] %v1410_v56  ;;  %v1416_v2 = vadd.f32 %v1365_v0, %v525_v54  ;;  %v1367_v4 = vpop.f32.mrb[23].mxu1  ;;  %1435 = vst [vmem:[#allocation2 + $0x88] sm:$0xff] %v1387_v61  ;;  %v1393_v5 = vadd.f32 %v1347_v3, %v502_v59 }
 0x261   : > { %1459 = vst [vmem:[#allocation2 + $0x148] sm:$0xff] %v1411_v62  ;;  %v1417_v6 = vadd.f32 %v1367_v4, %v526_v60  ;;  %1440 = vst [vmem:[#allocation2 + $0xb0] sm:$0xff] %v1392_v1 }
 0x262   : > { %1464 = vst [vmem:[#allocation2 + $0x170] sm:$0xff] %v1416_v2  ;;  %1441 = vst [vmem:[#allocation2 + $0xb8] sm:$0xff] %v1393_v5 }
 0x263   : > { %1465 = vst [vmem:[#allocation2 + $0x178] sm:$0xff] %v1417_v6 }
 0x264   : > { %v5624_v7 = vld [vmem:[#allocation9 + $0x4] ss:$24 sps:$4 sm:$0xff]   ;;  %v5626_v8 = vld [vmem:[#allocation9] ss:$24 sps:$4 sm:$0xff]   ;;  %v6882_v9 = vmov 0  }
 0x265   : > { %2096 = vmatprep.mubr.bf16.mxu0 %v6882_v9  ;;  %2137 = vmatprep.mubr.bf16.mxu1 %v6882_v9  ;;  %v5631_v10 = vld [vmem:[#allocation9 + $0x34] ss:$24 sps:$4 sm:$0xff]   ;;  %v5634_v11 = vld [vmem:[#allocation9 + $0x30] ss:$24 sps:$4 sm:$0xff]   ;;  %v5637_v12 = vld [vmem:[#allocation9 + $0x64] ss:$24 sps:$4 sm:$0xff]  }
 0x266   : > { %2064 = vmatprep.subr.bf16.mxu0 %v5624_v7  ;;  %v5640_v13 = vld [vmem:[#allocation9 + $0x60] ss:$24 sps:$4 sm:$0xff]   ;;  %v5643_v14 = vld [vmem:[#allocation9 + $0x94] ss:$24 sps:$4 sm:$0xff]   ;;  %v5646_v15 = vld [vmem:[#allocation9 + $0x90] ss:$24 sps:$4 sm:$0xff]  }
 0x267   : > { %2065 = vmatpush1.bf16.msra.mxu0 %v5626_v8  ;;  %v5649_v16 = vld [vmem:[#allocation9 + $0xc4] ss:$24 sps:$4 sm:$0xff]   ;;  %v5652_v17 = vld [vmem:[#allocation9 + $0xc0] ss:$24 sps:$4 sm:$0xff]   ;;  %v5655_v18 = vld [vmem:[#allocation9 + $0xf4] ss:$24 sps:$4 sm:$0xff]  }
 0x268   : > { %2066 = vmatprep.subr.bf16.mxu0 %v5631_v10  ;;  %v5657_v19 = vld [vmem:[#allocation9 + $0xc] ss:$24 sps:$4 sm:$0xff]   ;;  %v5659_v20 = vld [vmem:[#allocation9 + $0x8] ss:$24 sps:$4 sm:$0xff]   ;;  %v5669_v23 = vld [vmem:[#allocation9 + $0x3c] ss:$24 sps:$4 sm:$0xff]  }
 0x269   : > { %v5662_v21 = vld [vmem:[#allocation9 + $0xf0] ss:$24 sps:$4 sm:$0xff]   ;;  %2105 = vmatprep.subr.bf16.mxu1 %v5657_v19  ;;  %v5666_v22 = vld [vmem:[#allocation9 + $0x124] ss:$24 sps:$4 sm:$0xff]   ;;  %v5675_v25 = vld [vmem:[#allocation9 + $0x120] ss:$24 sps:$4 sm:$0xff]  }
 0x26a   : > { %2106 = vmatpush1.bf16.msra.mxu1 %v5659_v20  ;;  %v5671_v24 = vld [vmem:[#allocation9 + $0x38] ss:$24 sps:$4 sm:$0xff]   ;;  %v5677_v26 = vld [vmem:[#allocation9 + $0x154] ss:$24 sps:$4 sm:$0xff]   ;;  %v5683_v28 = vld [vmem:[#allocation9 + $0x68] ss:$24 sps:$4 sm:$0xff]  }
 0x26b   : > { %2067 = vmatpush1.bf16.msra.mxu0 %v5634_v11  ;;  %7102 = vst [vmem:[#allocation22_spill] sm:$0xff] %v5671_v24  ;;  %2107 = vmatprep.subr.bf16.mxu1 %v5669_v23  ;;  %v5679_v27 = vld [vmem:[#allocation9 + $0x6c] ss:$24 sps:$4 sm:$0xff]   ;;  %7104 = vst [vmem:[#allocation24_spill] sm:$0xff] %v5683_v28  ;;  %v5686_v29 = vld [vmem:[#allocation9 + $0x9c] ss:$24 sps:$4 sm:$0xff]  }
 0x26c   : > { %2068 = vmatprep.subr.bf16.mxu0 %v5637_v12  ;;  %7103 = vst [vmem:[#allocation23_spill] sm:$0xff] %v5679_v27  ;;  %7105 = vst [vmem:[#allocation25_spill] sm:$0xff] %v5686_v29  ;;  %v5689_v30 = vld [vmem:[#allocation9 + $0x150] ss:$24 sps:$4 sm:$0xff]   ;;  %v5692_v31 = vld [vmem:[#allocation9 + $0x184] ss:$24 sps:$4 sm:$0xff]  }
 0x26d   : > { %v5695_v32 = vld [vmem:[#allocation9 + $0x98] ss:$24 sps:$4 sm:$0xff]   ;;  %v5698_v33 = vld [vmem:[#allocation9 + $0xcc] ss:$24 sps:$4 sm:$0xff]   ;;  %v5707_v36 = vld [vmem:[#allocation9 + $0xc8] ss:$24 sps:$4 sm:$0xff]  }
 0x26e   : > { %2108 = vmatpush1.bf16.msra.mxu1 %v5671_v24  ;;  %7106 = vst [vmem:[#allocation26_spill] sm:$0xff] %v5695_v32  ;;  %7107 = vst [vmem:[#allocation27_spill] sm:$0xff] %v5698_v33  ;;  %v5701_v34 = vld [vmem:[#allocation9 + $0x180] ss:$24 sps:$4 sm:$0xff]   ;;  %v5703_v35 = vld [vmem:[#allocation9 + $0x1b4] ss:$24 sps:$4 sm:$0xff]  }
 0x26f   : > { %2069 = vmatpush1.bf16.msra.mxu0 %v5640_v13  ;;  %2109 = vmatprep.subr.bf16.mxu1 %v5679_v27  ;;  %7108 = vst [vmem:[#allocation28_spill] sm:$0xff] %v5707_v36  ;;  %v5710_v37 = vld [vmem:[#allocation9 + $0xfc] ss:$24 sps:$4 sm:$0xff]   ;;  %v5713_v38 = vld [vmem:[#allocation9 + $0x1b0] ss:$24 sps:$4 sm:$0xff]  }
 0x270   : > { %2070 = vmatprep.subr.bf16.mxu0 %v5643_v14  ;;  %7109 = vst [vmem:[#allocation29_spill] sm:$0xff] %v5710_v37  ;;  %v5716_v39 = vld [vmem:[#allocation9 + $0x1e4] ss:$24 sps:$4 sm:$0xff]   ;;  %v5719_v40 = vld [vmem:[#allocation9 + $0xf8] ss:$24 sps:$4 sm:$0xff]  }
 0x271   : > { %7110 = vst [vmem:[#allocation30_spill] sm:$0xff] %v5719_v40  ;;  %v5722_v41 = vld [vmem:[#allocation9 + $0x12c] ss:$24 sps:$4 sm:$0xff]   ;;  %v5725_v42 = vld [vmem:[#allocation9 + $0x1e0] ss:$24 sps:$4 sm:$0xff]  }
 0x272   : > { %2110 = vmatpush1.bf16.msra.mxu1 %v5683_v28  ;;  %7111 = vst [vmem:[#allocation31_spill] sm:$0xff] %v5722_v41  ;;  %v5727_v43 = vld [vmem:[#allocation9 + $0x214] ss:$24 sps:$4 sm:$0xff]   ;;  %v5731_v44 = vld [vmem:[#allocation9 + $0x128] ss:$24 sps:$4 sm:$0xff]  }
 0x273   : > { %2071 = vmatpush1.bf16.msra.mxu0 %v5646_v15  ;;  %2111 = vmatprep.subr.bf16.mxu1 %v5686_v29  ;;  %7112 = vst [vmem:[#allocation32_spill] sm:$0xff] %v5731_v44  ;;  %v5734_v45 = vld [vmem:[#allocation9 + $0x15c] ss:$24 sps:$4 sm:$0xff]   ;;  %v5737_v46 = vld [vmem:[#allocation9 + $0x210] ss:$24 sps:$4 sm:$0xff]  }
 0x274   : > { %2072 = vmatprep.subr.bf16.mxu0 %v5649_v16  ;;  %7113 = vst [vmem:[#allocation33_spill] sm:$0xff] %v5734_v45  ;;  %v5740_v47 = vld [vmem:[#allocation9 + $0x244] ss:$24 sps:$4 sm:$0xff]   ;;  %v5743_v48 = vld [vmem:[#allocation9 + $0x158] ss:$24 sps:$4 sm:$0xff]  }
 0x275   : > { %7114 = vst [vmem:[#allocation34_spill] sm:$0xff] %v5743_v48  ;;  %v5746_v49 = vld [vmem:[#allocation9 + $0x18c] ss:$24 sps:$4 sm:$0xff]   ;;  %v5749_v50 = vld [vmem:[#allocation9 + $0x240] ss:$24 sps:$4 sm:$0xff]  }
 0x276   : > { %2112 = vmatpush1.bf16.msra.mxu1 %v5695_v32  ;;  %7115 = vst [vmem:[#allocation35_spill] sm:$0xff] %v5746_v49  ;;  %v5751_v51 = vld [vmem:[#allocation9 + $0x274] ss:$24 sps:$4 sm:$0xff]   ;;  %v5755_v52 = vld [vmem:[#allocation9 + $0x188] ss:$24 sps:$4 sm:$0xff]  }
 0x277   : > { %2073 = vmatpush1.bf16.msra.mxu0 %v5652_v17  ;;  %2113 = vmatprep.subr.bf16.mxu1 %v5698_v33  ;;  %7116 = vst [vmem:[#allocation36_spill] sm:$0xff] %v5755_v52  ;;  %v5758_v53 = vld [vmem:[#allocation9 + $0x1bc] ss:$24 sps:$4 sm:$0xff]   ;;  %v5761_v54 = vld [vmem:[#allocation9 + $0x270] ss:$24 sps:$4 sm:$0xff]  }
 0x278   : > { %2074 = vmatprep.subr.bf16.mxu0 %v5655_v18  ;;  %7117 = vst [vmem:[#allocation37_spill] sm:$0xff] %v5758_v53  ;;  %v5764_v55 = vld [vmem:[#allocation9 + $0x2a4] ss:$24 sps:$4 sm:$0xff]   ;;  %v5767_v56 = vld [vmem:[#allocation9 + $0x1b8] ss:$24 sps:$4 sm:$0xff]  }
 0x279   : > { %7118 = vst [vmem:[#allocation38_spill] sm:$0xff] %v5767_v56  ;;  %v5770_v57 = vld [vmem:[#allocation9 + $0x1ec] ss:$24 sps:$4 sm:$0xff]   ;;  %v5773_v58 = vld [vmem:[#allocation9 + $0x2a0] ss:$24 sps:$4 sm:$0xff]  }
 0x27a   : > { %2114 = vmatpush1.bf16.msra.mxu1 %v5707_v36  ;;  %7119 = vst [vmem:[#allocation39_spill] sm:$0xff] %v5770_v57  ;;  %v5775_v59 = vld [vmem:[#allocation9 + $0x2d4] ss:$24 sps:$4 sm:$0xff]   ;;  %v5779_v60 = vld [vmem:[#allocation9 + $0x1e8] ss:$24 sps:$4 sm:$0xff]  }
 0x27b   : > { %2075 = vmatpush1.bf16.msra.mxu0 %v5662_v21  ;;  %2115 = vmatprep.subr.bf16.mxu1 %v5710_v37  ;;  %7120 = vst [vmem:[#allocation40_spill] sm:$0xff] %v5779_v60  ;;  %v5782_v61 = vld [vmem:[#allocation9 + $0x21c] ss:$24 sps:$4 sm:$0xff]   ;;  %v5785_v62 = vld [vmem:[#allocation9 + $0x2d0] ss:$24 sps:$4 sm:$0xff]  }
 0x27c   : > { %2076 = vmatprep.subr.bf16.mxu0 %v5666_v22  ;;  %7121 = vst [vmem:[#allocation41_spill] sm:$0xff] %v5782_v61  ;;  %v5787_v63 = vld [vmem:[#allocation9 + $0x14] ss:$24 sps:$4 sm:$0xff]   ;;  %v5791_v0 = vld [vmem:[#allocation9 + $0x218] ss:$24 sps:$4 sm:$0xff]  }
 0x27d   : > { %7122 = vst [vmem:[#allocation42_spill] sm:$0xff] %v5791_v0  ;;  %v5794_v1 = vld [vmem:[#allocation9 + $0x24c] ss:$24 sps:$4 sm:$0xff]   ;;  %v5796_v2 = vld [vmem:[#allocation9 + $0x10] ss:$24 sps:$4 sm:$0xff]  }
 0x27e   : > { %2116 = vmatpush1.bf16.msra.mxu1 %v5719_v40  ;;  %7123 = vst [vmem:[#allocation43_spill] sm:$0xff] %v5794_v1  ;;  %7124 = vst [vmem:[#allocation44_spill] sm:$0xff] %v5796_v2  ;;  %v5799_v3 = vld [vmem:[#allocation9 + $0x44] ss:$24 sps:$4 sm:$0xff]   ;;  %v5801_v4 = vld [vmem:[#allocation9 + $0x248] ss:$24 sps:$4 sm:$0xff]  }
 0x27f   : > { %2077 = vmatpush1.bf16.msra.mxu0 %v5675_v25  ;;  %2117 = vmatprep.subr.bf16.mxu1 %v5722_v41  ;;  %7125 = vst [vmem:[#allocation45_spill] sm:$0xff] %v5799_v3  ;;  %7126 = vst [vmem:[#allocation46_spill] sm:$0xff] %v5801_v4  ;;  %v5805_v5 = vld [vmem:[#allocation9 + $0x27c] ss:$24 sps:$4 sm:$0xff]   ;;  %v5807_v6 = vld [vmem:[#allocation9 + $0x40] ss:$24 sps:$4 sm:$0xff]  }
 0x280   : > { %2078 = vmatprep.subr.bf16.mxu0 %v5677_v26  ;;  %7127 = vst [vmem:[#allocation47_spill] sm:$0xff] %v5805_v5  ;;  %7128 = vst [vmem:[#allocation48_spill] sm:$0xff] %v5807_v6 }
 0x282   : > { %2118 = vmatpush1.bf16.msra.mxu1 %v5731_v44 }
 0x283   : > { %2079 = vmatpush1.bf16.msra.mxu0 %v5689_v30  ;;  %2119 = vmatprep.subr.bf16.mxu1 %v5734_v45 }
 0x284   : > { %2080 = vmatprep.subr.bf16.mxu0 %v5692_v31 }
 0x286   : > { %2120 = vmatpush1.bf16.msra.mxu1 %v5743_v48 }
 0x287   : > { %2081 = vmatpush1.bf16.msra.mxu0 %v5701_v34  ;;  %2121 = vmatprep.subr.bf16.mxu1 %v5746_v49 }
 0x288   : > { %2082 = vmatprep.subr.bf16.mxu0 %v5703_v35 }
 0x28a   : > { %2122 = vmatpush1.bf16.msra.mxu1 %v5755_v52 }
 0x28b   : > { %2083 = vmatpush1.bf16.msra.mxu0 %v5713_v38  ;;  %2123 = vmatprep.subr.bf16.mxu1 %v5758_v53  ;;  %v5829_v53 = vld [vmem:[#allocation9 + $0x2dc] ss:$24 sps:$4 sm:$0xff]  }
 0x28c   : > { %2084 = vmatprep.subr.bf16.mxu0 %v5716_v39  ;;  %7135 = vst [vmem:[#allocation55_spill] sm:$0xff] %v5829_v53 }
 0x28e   : > { %2124 = vmatpush1.bf16.msra.mxu1 %v5767_v56  ;;  %v5826_v56 = vld [vmem:[#allocation9 + $0x2a8] ss:$24 sps:$4 sm:$0xff]  }
 0x28f   : > { %2085 = vmatpush1.bf16.msra.mxu0 %v5725_v42  ;;  %2125 = vmatprep.subr.bf16.mxu1 %v5770_v57  ;;  %v5816_v57 = vld [vmem:[#allocation9 + $0x2ac] ss:$24 sps:$4 sm:$0xff]   ;;  %7134 = vst [vmem:[#allocation54_spill] sm:$0xff] %v5826_v56 }
 0x290   : > { %2086 = vmatprep.subr.bf16.mxu0 %v5727_v43  ;;  %7131 = vst [vmem:[#allocation51_spill] sm:$0xff] %v5816_v57 }
 0x292   : > { %2126 = vmatpush1.bf16.msra.mxu1 %v5779_v60  ;;  %v5813_v60 = vld [vmem:[#allocation9 + $0x278] ss:$24 sps:$4 sm:$0xff]  }
 0x293   : > { %2087 = vmatpush1.bf16.msra.mxu0 %v5737_v46  ;;  %2127 = vmatprep.subr.bf16.mxu1 %v5782_v61  ;;  %v5811_v61 = vld [vmem:[#allocation9 + $0x74] ss:$24 sps:$4 sm:$0xff]   ;;  %7130 = vst [vmem:[#allocation50_spill] sm:$0xff] %v5813_v60 }
 0x294   : > { %2088 = vmatprep.subr.bf16.mxu0 %v5740_v47  ;;  %7129 = vst [vmem:[#allocation49_spill] sm:$0xff] %v5811_v61 }
 0x296   : > { %2128 = vmatpush1.bf16.msra.mxu1 %v5791_v0  ;;  %v5821_v0 = vld [vmem:[#allocation9 + $0x70] ss:$24 sps:$4 sm:$0xff]  }
 0x297   : > { %2089 = vmatpush1.bf16.msra.mxu0 %v5749_v50  ;;  %2129 = vmatprep.subr.bf16.mxu1 %v5794_v1  ;;  %7132 = vst [vmem:[#allocation52_spill] sm:$0xff] %v5821_v0  ;;  %v5824_v1 = vld [vmem:[#allocation9 + $0xa4] ss:$24 sps:$4 sm:$0xff]  }
 0x298   : > { %2090 = vmatprep.subr.bf16.mxu0 %v5751_v51  ;;  %7133 = vst [vmem:[#allocation53_spill] sm:$0xff] %v5824_v1 }
 0x29a   : > { %2130 = vmatpush1.bf16.msra.mxu1 %v5801_v4 }
 0x29b   : > { %2091 = vmatpush1.bf16.msra.mxu0 %v5761_v54  ;;  %2131 = vmatprep.subr.bf16.mxu1 %v5805_v5 }
 0x29c   : > { %2092 = vmatprep.subr.bf16.mxu0 %v5764_v55 }
 0x29e   : > { %2132 = vmatpush1.bf16.msra.mxu1 %v5813_v60 }
 0x29f   : > { %2093 = vmatpush1.bf16.msra.mxu0 %v5773_v58  ;;  %2133 = vmatprep.subr.bf16.mxu1 %v5816_v57 }
 0x2a0   : > { %2094 = vmatprep.subr.bf16.mxu0 %v5775_v59 }
 0x2a2   : > { %2134 = vmatpush1.bf16.msra.mxu1 %v5826_v56 }
 0x2a3   : > { %2095 = vmatpush1.bf16.msra.mxu0 %v5785_v62  ;;  %2135 = vmatprep.subr.bf16.mxu1 %v5829_v53  ;;  %v5857_v53 = vld [vmem:[#allocation9 + $0x134] ss:$24 sps:$4 sm:$0xff]  }
 0x2a4   : > { %2146 = vmatprep.subr.bf16.mxu0 %v5787_v63  ;;  %7143 = vst [vmem:[#allocation62_spill] sm:$0xff] %v5857_v53 }
 0x2a6   : > { %2097 = vmatmul.mubr.bf16.vlgmr.msra.gmra.mrb[0].mxu0 %v6882_v9 }
 0x2a7   : > { %2147 = vmatpush1.bf16.msra.mxu0 %v5796_v2  ;;  %2178 = vmatprep.mubr.bf16.mxu0 %v6882_v9  ;;  %v5835_v9 = vld [vmem:[#allocation9 + $0xa0] ss:$24 sps:$4 sm:$0xff]  }
 0x2a8   : > { %2148 = vmatprep.subr.bf16.mxu0 %v5799_v3  ;;  %7136 = vst [vmem:[#allocation56_spill] sm:$0xff] %v5835_v9  ;;  %v5838_v3 = vld [vmem:[#allocation9 + $0xd4] ss:$24 sps:$4 sm:$0xff]   ;;  %v5841_v2 = vld [vmem:[#allocation9 + $0x2d8] ss:$24 sps:$4 sm:$0xff]  }
 0x2a9   : > { %7137 = vst [vmem:[#allocation57_spill] sm:$0xff] %v5838_v3  ;;  %7138 = vst [vmem:[#allocation58_spill] sm:$0xff] %v5841_v2  ;;  %2136 = vmatpush1.bf16.msra.mxu1 %v5841_v2 }
 0x2aa   : > { %2239 = vmatprep.subr.bf16.mxu1 %v5624_v7 }
 0x2ab   : > { %2149 = vmatpush1.bf16.msra.mxu0 %v5807_v6  ;;  %v5848_v6 = vld [vmem:[#allocation9 + $0x104] ss:$24 sps:$4 sm:$0xff]  }
 0x2ac   : > { %2150 = vmatprep.subr.bf16.mxu0 %v5811_v61  ;;  %v5845_v61 = vld [vmem:[#allocation9 + $0xd0] ss:$24 sps:$4 sm:$0xff]   ;;  %7140 = vst [vmem:[#allocation60_spill] sm:$0xff] %v5848_v6 }
 0x2ad   : > { %7139 = vst [vmem:[#allocation59_spill] sm:$0xff] %v5845_v61 }
 0x2af   : > { %2151 = vmatpush1.bf16.msra.mxu0 %v5821_v0  ;;  %v7142_v0 = vmov 0  }
 0x2b0   : > { %2152 = vmatprep.subr.bf16.mxu0 %v5824_v1  ;;  %v5853_v1 = vld [vmem:[#allocation9 + $0x100] ss:$24 sps:$4 sm:$0xff]   ;;  %2138 = vmatmul.mubr.bf16.vlgmr.msra.gmra.mrb[0].mxu1 %v7142_v0 }
 0x2b1   : > { %7141 = vst [vmem:[#allocation61_spill] sm:$0xff] %v5853_v1  ;;  %2240 = vmatpush1.bf16.msra.mxu1 %v5626_v8 }
 0x2b2   : > { %2241 = vmatprep.subr.bf16.mxu1 %v5631_v10 }
 0x2b3   : > { %2153 = vmatpush1.bf16.msra.mxu0 %v5835_v9  ;;  %v5865_v9 = vld [vmem:[#allocation9 + $0x164] ss:$24 sps:$4 sm:$0xff]  }
 0x2b4   : > { %2154 = vmatprep.subr.bf16.mxu0 %v5838_v3  ;;  %v5862_v3 = vld [vmem:[#allocation9 + $0x130] ss:$24 sps:$4 sm:$0xff]   ;;  %7145 = vst [vmem:[#allocation64_spill] sm:$0xff] %v5865_v9 }
 0x2b5   : > { %7144 = vst [vmem:[#allocation63_spill] sm:$0xff] %v5862_v3  ;;  %2242 = vmatpush1.bf16.msra.mxu1 %v5634_v11 }
 0x2b6   : > { %2243 = vmatprep.subr.bf16.mxu1 %v5637_v12 }
 0x2b7   : > { %2155 = vmatpush1.bf16.msra.mxu0 %v5845_v61  ;;  %v5873_v61 = vld [vmem:[#allocation9 + $0x194] ss:$24 sps:$4 sm:$0xff]  }
 0x2b8   : > { %2156 = vmatprep.subr.bf16.mxu0 %v5848_v6  ;;  %v5870_v6 = vld [vmem:[#allocation9 + $0x160] ss:$24 sps:$4 sm:$0xff]   ;;  %7147 = vst [vmem:[#allocation66_spill] sm:$0xff] %v5873_v61 }
 0x2b9   : > { %7146 = vst [vmem:[#allocation65_spill] sm:$0xff] %v5870_v6  ;;  %2244 = vmatpush1.bf16.msra.mxu1 %v5640_v13 }
 0x2ba   : > { %2245 = vmatprep.subr.bf16.mxu1 %v5643_v14 }
 0x2bb   : > { %2157 = vmatpush1.bf16.msra.mxu0 %v5853_v1  ;;  %v5881_v1 = vld [vmem:[#allocation9 + $0x1c4] ss:$24 sps:$4 sm:$0xff]  }
 0x2bc   : > { %2158 = vmatprep.subr.bf16.mxu0 %v5857_v53  ;;  %v5878_v53 = vld [vmem:[#allocation9 + $0x190] ss:$24 sps:$4 sm:$0xff]   ;;  %7149 = vst [vmem:[#allocation68_spill] sm:$0xff] %v5881_v1 }
 0x2bd   : > { %7148 = vst [vmem:[#allocation67_spill] sm:$0xff] %v5878_v53  ;;  %2246 = vmatpush1.bf16.msra.mxu1 %v5646_v15 }
 0x2be   : > { %2247 = vmatprep.subr.bf16.mxu1 %v5649_v16 }
 0x2bf   : > { %2159 = vmatpush1.bf16.msra.mxu0 %v5862_v3  ;;  %v5889_v3 = vld [vmem:[#allocation9 + $0x1f4] ss:$24 sps:$4 sm:$0xff]  }
 0x2c0   : > { %2160 = vmatprep.subr.bf16.mxu0 %v5865_v9  ;;  %v5886_v9 = vld [vmem:[#allocation9 + $0x1c0] ss:$24 sps:$4 sm:$0xff]   ;;  %7151 = vst [vmem:[#allocation70_spill] sm:$0xff] %v5889_v3 }
 0x2c1   : > { %7150 = vst [vmem:[#allocation69_spill] sm:$0xff] %v5886_v9  ;;  %2248 = vmatpush1.bf16.msra.mxu1 %v5652_v17 }
 0x2c2   : > { %2249 = vmatprep.subr.bf16.mxu1 %v5655_v18 }
 0x2c3   : > { %2161 = vmatpush1.bf16.msra.mxu0 %v5870_v6  ;;  %v5897_v6 = vld [vmem:[#allocation9 + $0x224] ss:$24 sps:$4 sm:$0xff]  }
 0x2c4   : > { %2162 = vmatprep.subr.bf16.mxu0 %v5873_v61  ;;  %v5894_v61 = vld [vmem:[#allocation9 + $0x1f0] ss:$24 sps:$4 sm:$0xff]   ;;  %7153 = vst [vmem:[#allocation72_spill] sm:$0xff] %v5897_v6 }
 0x2c5   : > { %7152 = vst [vmem:[#allocation71_spill] sm:$0xff] %v5894_v61  ;;  %2250 = vmatpush1.bf16.msra.mxu1 %v5662_v21 }
 0x2c6   : > { %2251 = vmatprep.subr.bf16.mxu1 %v5666_v22 }
 0x2c7   : > { %2163 = vmatpush1.bf16.msra.mxu0 %v5878_v53  ;;  %v5905_v53 = vld [vmem:[#allocation9 + $0x254] ss:$24 sps:$4 sm:$0xff]  }
 0x2c8   : > { %2164 = vmatprep.subr.bf16.mxu0 %v5881_v1  ;;  %v5902_v1 = vld [vmem:[#allocation9 + $0x220] ss:$24 sps:$4 sm:$0xff]   ;;  %7155 = vst [vmem:[#allocation74_spill] sm:$0xff] %v5905_v53 }
 0x2c9   : > { %7154 = vst [vmem:[#allocation73_spill] sm:$0xff] %v5902_v1  ;;  %2252 = vmatpush1.bf16.msra.mxu1 %v5675_v25 }
 0x2ca   : > { %2253 = vmatprep.subr.bf16.mxu1 %v5677_v26 }
 0x2cb   : > { %2165 = vmatpush1.bf16.msra.mxu0 %v5886_v9  ;;  %v5913_v9 = vld [vmem:[#allocation9 + $0x284] ss:$24 sps:$4 sm:$0xff]  }
 0x2cc   : > { %2166 = vmatprep.subr.bf16.mxu0 %v5889_v3  ;;  %v5910_v3 = vld [vmem:[#allocation9 + $0x250] ss:$24 sps:$4 sm:$0xff]   ;;  %7156 = vst [vmem:[#allocation75_spill] sm:$0xff] %v5913_v9 }
 0x2cd   : > { %2254 = vmatpush1.bf16.msra.mxu1 %v5689_v30 }
 0x2ce   : > { %2255 = vmatprep.subr.bf16.mxu1 %v5692_v31 }
 0x2cf   : > { %2167 = vmatpush1.bf16.msra.mxu0 %v5894_v61  ;;  %v5921_v61 = vld [vmem:[#allocation9 + $0x2b4] ss:$24 sps:$4 sm:$0xff]  }
 0x2d0   : > { %2168 = vmatprep.subr.bf16.mxu0 %v5897_v6  ;;  %v5918_v6 = vld [vmem:[#allocation9 + $0x280] ss:$24 sps:$4 sm:$0xff]  }
 0x2d1   : > { %2256 = vmatpush1.bf16.msra.mxu1 %v5701_v34 }
 0x2d2   : > { %2257 = vmatprep.subr.bf16.mxu1 %v5703_v35 }
 0x2d3   : > { %2169 = vmatpush1.bf16.msra.mxu0 %v5902_v1  ;;  %v5929_v1 = vld [vmem:[#allocation9 + $0x2e4] ss:$24 sps:$4 sm:$0xff]  }
 0x2d4   : > { %2170 = vmatprep.subr.bf16.mxu0 %v5905_v53  ;;  %v5926_v53 = vld [vmem:[#allocation9 + $0x2b0] ss:$24 sps:$4 sm:$0xff]  }
 0x2d5   : > { %2258 = vmatpush1.bf16.msra.mxu1 %v5713_v38 }
 0x2d6   : > { %2259 = vmatprep.subr.bf16.mxu1 %v5716_v39 }
 0x2d7   : > { %2171 = vmatpush1.bf16.msra.mxu0 %v5910_v3 }
 0x2d8   : > { %2172 = vmatprep.subr.bf16.mxu0 %v5913_v9  ;;  %v5934_v9 = vld [vmem:[#allocation9 + $0x2e0] ss:$24 sps:$4 sm:$0xff]  }
 0x2d9   : > { %2260 = vmatpush1.bf16.msra.mxu1 %v5725_v42 }
 0x2da   : > { %2261 = vmatprep.subr.bf16.mxu1 %v5727_v43 }
 0x2db   : > { %2173 = vmatpush1.bf16.msra.mxu0 %v5918_v6 }
 0x2dc   : > { %2174 = vmatprep.subr.bf16.mxu0 %v5921_v61 }
 0x2dd   : > { %2262 = vmatpush1.bf16.msra.mxu1 %v5737_v46 }
 0x2de   : > { %2263 = vmatprep.subr.bf16.mxu1 %v5740_v47 }
 0x2df   : > { %2175 = vmatpush1.bf16.msra.mxu0 %v5926_v53 }
 0x2e0   : > { %2176 = vmatprep.subr.bf16.mxu0 %v5929_v1 }
 0x2e1   : > { %2264 = vmatpush1.bf16.msra.mxu1 %v5749_v50 }
 0x2e2   : > { %2265 = vmatprep.subr.bf16.mxu1 %v5751_v51 }
 0x2e3   : > { %2177 = vmatpush1.bf16.msra.mxu0 %v5934_v9 }
 0x2e4   : > { %2280 = vmatprep.subr.bf16.mxu0 %v5657_v19 }
 0x2e5   : > { %2266 = vmatpush1.bf16.msra.mxu1 %v5761_v54 }
 0x2e6   : > { %2179 = vmatmul.mubr.bf16.vlgmr.msra.gmra.mrb[4].mxu0 %v7142_v0  ;;  %2267 = vmatprep.subr.bf16.mxu1 %v5764_v55  ;;  %v7157_v0 = vld [vmem:[#allocation37_spill] sm:$0xff] }
 0x2e7   : > { %2281 = vmatpush1.bf16.msra.mxu0 %v5659_v20 }
 0x2e8   : > { %2282 = vmatprep.subr.bf16.mxu0 %v5669_v23 }
 0x2e9   : > { %2268 = vmatpush1.bf16.msra.mxu1 %v5773_v58 }
 0x2ea   : > { %2269 = vmatprep.subr.bf16.mxu1 %v5775_v59 }
 0x2eb   : > { %2283 = vmatpush1.bf16.msra.mxu0 %v5671_v24 }
 0x2ec   : > { %2284 = vmatprep.subr.bf16.mxu0 %v5679_v27 }
 0x2ed   : > { %2270 = vmatpush1.bf16.msra.mxu1 %v5785_v62 }
 0x2ee   : > { %2321 = vmatprep.subr.bf16.mxu1 %v5787_v63 }
 0x2ef   : > { %2285 = vmatpush1.bf16.msra.mxu0 %v5683_v28 }
 0x2f0   : > { %2286 = vmatprep.subr.bf16.mxu0 %v5686_v29 }
 0x2f3   : > { %2287 = vmatpush1.bf16.msra.mxu0 %v5695_v32 }
 0x2f4   : > { %2288 = vmatprep.subr.bf16.mxu0 %v5698_v33  ;;  %v7158_v33 = vld [vmem:[#allocation38_spill] sm:$0xff] }
 0x2f7   : > { %2289 = vmatpush1.bf16.msra.mxu0 %v5707_v36  ;;  %v7159_v36 = vld [vmem:[#allocation39_spill] sm:$0xff] }
 0x2f8   : > { %2290 = vmatprep.subr.bf16.mxu0 %v5710_v37  ;;  %v7160_v37 = vld [vmem:[#allocation40_spill] sm:$0xff] }
 0x2fb   : > { %2291 = vmatpush1.bf16.msra.mxu0 %v5719_v40  ;;  %v7161_v40 = vld [vmem:[#allocation41_spill] sm:$0xff] }
 0x2fc   : > { %2292 = vmatprep.subr.bf16.mxu0 %v5722_v41  ;;  %v7162_v41 = vld [vmem:[#allocation42_spill] sm:$0xff] }
 0x2ff   : > { %2293 = vmatpush1.bf16.msra.mxu0 %v5731_v44  ;;  %v7163_v44 = vld [vmem:[#allocation43_spill] sm:$0xff] }
 0x300   : > { %2294 = vmatprep.subr.bf16.mxu0 %v5734_v45  ;;  %v1580_v45 = vld [vmem:[#allocation2 + $0x10] sm:$0xff] }
 0x303   : > { %2295 = vmatpush1.bf16.msra.mxu0 %v5743_v48 }
 0x304   : > { %2296 = vmatprep.subr.bf16.mxu0 %v5746_v49 }
 0x307   : > { %2297 = vmatpush1.bf16.msra.mxu0 %v5755_v52  ;;  %v1578_v52 = vld [vmem:[#allocation2] sm:$0xff] }
 0x308   : > { %2298 = vmatprep.subr.bf16.mxu0 %v7157_v0 }
 0x30b   : > { %2299 = vmatpush1.bf16.msra.mxu0 %v7158_v33  ;;  %v7164_v33 = vld [vmem:[#allocation55_spill] sm:$0xff] }
 0x30c   : > { %2300 = vmatprep.subr.bf16.mxu0 %v7159_v36 }
 0x30f   : > { %2301 = vmatpush1.bf16.msra.mxu0 %v7160_v37 }
 0x310   : > { %2302 = vmatprep.subr.bf16.mxu0 %v7161_v40 }
 0x313   : > { %2303 = vmatpush1.bf16.msra.mxu0 %v7162_v41 }
 0x314   : > { %2304 = vmatprep.subr.bf16.mxu0 %v7163_v44 }
 0x317   : > { %2305 = vmatpush1.bf16.msra.mxu0 %v5801_v4 }
 0x318   : > { %2306 = vmatprep.subr.bf16.mxu0 %v5805_v5 }
 0x31b   : > { %2307 = vmatpush1.bf16.msra.mxu0 %v5813_v60  ;;  %v1579_v60 = vld [vmem:[#allocation2 + $0x8] sm:$0xff] }
 0x31c   : > { %2308 = vmatprep.subr.bf16.mxu0 %v5816_v57 }
 0x31f   : > { %2309 = vmatpush1.bf16.msra.mxu0 %v5826_v56 }
 0x320   : > { %2310 = vmatprep.subr.bf16.mxu0 %v7164_v33  ;;  %v1581_v33 = vld [vmem:[#allocation2 + $0x18] sm:$0xff] }
 0x323   : > { %2311 = vmatpush1.bf16.msra.mxu0 %v5841_v2 }
 0x324   : > { %2414 = vmatprep.subr.bf16.mxu0 %v5624_v7 }
 0x379   : > { %v2098_v40 = vpop.f32.mrb[0].mxu0 }
 0x37a   : > { %v2100_v41 = vpop.f32.mrb[1].mxu0  ;;  %v2187_v49 = vadd.f32 %v2098_v40, %v1578_v52 }
 0x37b   : > { %v2102_v37 = vpop.f32.mrb[2].mxu0  ;;  %v2188_v57 = vadd.f32 %v2100_v41, %v1579_v60 }
 0x37c   : > { %v2103_v44 = vpop.f32.mrb[3].mxu0  ;;  %v3984_v48 = vmul.f32 -1.442695, %v2187_v49  ;;  %v1566_v49 = vld [vmem:[#allocation11] sm:$0x3] }
 0x37d   : > { %v3985_v56 = vmul.f32 -1.442695, %v2188_v57  ;;  %v1568_v44 = vlaneseq }
 0x37e   : > { %4520 = vpow2.f32 %v3984_v48 }
 0x37f   : > { %4522 = vpow2.f32 %v3985_v56  ;;  %v1569_v27 = vshrl.u32 %v1568_v44, 7 }
 0x381   : > { %v1570_v40 = vsub.s32 0, %v1569_v27  ;;  %v1574_v52 = vsub.s32 1, %v1569_v27 }
 0x383   : > { %v2139_v36 = vpop.f32.mrb[0].mxu1 }
 0x384   : > { %v2141_v4 = vpop.f32.mrb[1].mxu1  ;;  %v2201_v2 = vadd.f32 %v2139_v36, %v1580_v45  ;;  %v5984_v36 = vrot.slane %v1566_v49, %v1570_v40  ;;  %v5986_v45 = vrot.slane %v1566_v49, %v1574_v52 }
 0x385   : > { %v2143_v0 = vpop.f32.mrb[2].mxu1  ;;  %v2202_v7 = vadd.f32 %v2141_v4, %v1581_v33 }
 0x386   : > { %v2144_v5 = vpop.f32.mrb[3].mxu1  ;;  %v3986_v32 = vmul.f32 -1.442695, %v2201_v2  ;;  %7165 = vst [vmem:[#allocation76_spill] sm:$0xff] %v5984_v36  ;;  %v1582_v2 = vld [vmem:[#allocation2 + $0x20] sm:$0xff] }
 0x387   : > { %v3987_v29 = vmul.f32 -1.442695, %v2202_v7 }
 0x388   : > { %4524 = vpow2.f32 %v3986_v32  ;;  %v4521_v37 = vpop.eup %4520 }
 0x389   : > { %4526 = vpow2.f32 %v3987_v29  ;;  %v4523_v0 = vpop.eup %4522  ;;  %v2195_v5 = vadd.f32 1.0, %v4521_v37  ;;  %v1583_v37 = vld [vmem:[#allocation2 + $0x28] sm:$0xff] }
 0x38a   : > { %v2196_v28 = vadd.f32 1.0, %v4523_v0 }
 0x38b   : > { %4528 = vrcp.f32 %v2195_v5 }
 0x38c   : > { %4530 = vrcp.f32 %v2196_v28 }
 0x392   : > { %v4525_v41 = vpop.eup %4524 }
 0x393   : > { %v4527_v48 = vpop.eup %4526  ;;  %v2209_v56 = vadd.f32 1.0, %v4525_v41 }
 0x394   : > { %v2210_v33 = vadd.f32 1.0, %v4527_v48 }
 0x395   : > { %4532 = vrcp.f32 %v2209_v56  ;;  %v4529_v60 = vpop.eup %4528 }
 0x396   : > { %4534 = vrcp.f32 %v2210_v33  ;;  %v4531_v7 = vpop.eup %4530 }
 0x39f   : > { %v4533_v41 = vpop.eup %4532 }
 0x3a0   : > { %v4535_v49 = vpop.eup %4534  ;;  %v2223_v52 = vsub.f32 1.0, %v4533_v41 }
 0x3a1   : > { %v2224_v48 = vsub.f32 1.0, %v4535_v49 }
 0x3b9   : > { %v2180_v32 = vpop.f32.mrb[4].mxu0 }
 0x3ba   : > { %v2215_v29 = vadd.f32 %v2180_v32, %v5984_v36  ;;  %v2182_v57 = vpop.f32.mrb[5].mxu0  ;;  %v2227_v36 = vmul.f32 0.0, %v4533_v41  ;;  %v7209_v41 = vld [vmem:[#allocation40_spill] sm:$0xff] }
 0x3bb   : > { %v2216_v28 = vadd.f32 %v2182_v57, %v5986_v45  ;;  %v2184_v4 = vpop.f32.mrb[6].mxu0  ;;  %v2228_v57 = vmul.f32 0.0, %v4535_v49  ;;  %v7210_v49 = vld [vmem:[#allocation41_spill] sm:$0xff] }
 0x3bc   : > { %v2217_v27 = vmul.f32 %v4529_v60, %v2215_v29  ;;  %v2185_v44 = vpop.f32.mrb[7].mxu0 }
 0x3bd   : > { %v2218_v0 = vmul.f32 %v4531_v7, %v2216_v28  ;;  %v7166_v28 = vld [vmem:[#allocation44_spill] sm:$0xff]  ;;  %v7169_v7 = vld [vmem:[#allocation49_spill] sm:$0xff] }
 0x3be   : > { %v2219_v5 = vadd.f32 %v2217_v27, %v1582_v2  ;;  %v7170_v27 = vld [vmem:[#allocation52_spill] sm:$0xff] }
 0x3bf   : > { %v2220_v40 = vadd.f32 %v2218_v0, %v1583_v37  ;;  %v7171_v37 = vld [vmem:[#allocation53_spill] sm:$0xff]  ;;  %v7172_v44 = vld [vmem:[#allocation56_spill] sm:$0xff] }
 0x3c0   : > { %4536 = vtanh.f32 %v2219_v5  ;;  %v7206_v0 = vld [vmem:[#allocation37_spill] sm:$0xff]  ;;  %v7207_v5 = vld [vmem:[#allocation38_spill] sm:$0xff] }
 0x3c1   : > { %4538 = vtanh.f32 %v2220_v40  ;;  %v7208_v40 = vld [vmem:[#allocation39_spill] sm:$0xff] }
 0x3ca   : > { %v4537_v56 = vpop.eup %4536 }
 0x3cb   : > { %v4539_v32 = vpop.eup %4538  ;;  %v2225_v33 = vmul.f32 %v4537_v56, %v2223_v52  ;;  %v7211_v52 = vld [vmem:[#allocation42_spill] sm:$0xff] }
 0x3cc   : > { %v2226_v24 = vmul.f32 %v4539_v32, %v2224_v48  ;;  %v7212_v48 = vld [vmem:[#allocation43_spill] sm:$0xff]  ;;  %v7213_v56 = vld [vmem:[#allocation46_spill] sm:$0xff] }
 0x3cd   : > { %v5990_v4 = vadd.f32 %v2227_v36, %v2225_v33  ;;  %v7167_v36 = vld [vmem:[#allocation45_spill] sm:$0xff]  ;;  %v7214_v32 = vld [vmem:[#allocation47_spill] sm:$0xff]  ;;  %v7215_v33 = vld [vmem:[#allocation50_spill] sm:$0xff] }
 0x3ce   : > { %v5992_v29 = vadd.f32 %v2228_v57, %v2226_v24  ;;  %v7168_v24 = vld [vmem:[#allocation48_spill] sm:$0xff]  ;;  %v7216_v57 = vld [vmem:[#allocation51_spill] sm:$0xff] }
 0x3cf   : > { %v5998_v2 = vpack.c.bf16 %v5990_v4, %v5990_v4 }
 0x3d0   : > { %v2238_v60 = vpack.c.bf16 %v5992_v29, %v5992_v29 }
 0x3d2   : > { %2271 = vmatprep.mubr.bf16.mxu1 %v2238_v60  ;;  %2312 = vmatprep.mubr.bf16.mxu0 %v2238_v60 }
 0x3d3   : > { %2272 = vmatmul.mubr.bf16.vlgmr.msra.gmra.mrb[4].mxu1 %v5998_v2  ;;  %2313 = vmatmul.mubr.bf16.vlgmr.msra.gmra.mrb[8].mxu0 %v5998_v2 }
 0x3d4   : > { %2322 = vmatpush1.bf16.msra.mxu1 %v7166_v28  ;;  %2353 = vmatprep.mubr.bf16.mxu1 %v2238_v60  ;;  %v7217_v60 = vld [vmem:[#allocation54_spill] sm:$0xff] }
 0x3d5   : > { %2323 = vmatprep.subr.bf16.mxu1 %v7167_v36  ;;  %2415 = vmatpush1.bf16.msra.mxu0 %v5626_v8  ;;  %v7173_v8 = vld [vmem:[#allocation57_spill] sm:$0xff] }
 0x3d6   : > { %2416 = vmatprep.subr.bf16.mxu0 %v5631_v10  ;;  %v7174_v10 = vld [vmem:[#allocation59_spill] sm:$0xff] }
 0x3d8   : > { %2324 = vmatpush1.bf16.msra.mxu1 %v7168_v24 }
 0x3d9   : > { %2325 = vmatprep.subr.bf16.mxu1 %v7169_v7  ;;  %2417 = vmatpush1.bf16.msra.mxu0 %v5634_v11  ;;  %v7175_v11 = vld [vmem:[#allocation60_spill] sm:$0xff] }
 0x3da   : > { %2418 = vmatprep.subr.bf16.mxu0 %v5637_v12  ;;  %v7176_v12 = vld [vmem:[#allocation61_spill] sm:$0xff] }
 0x3dc   : > { %2326 = vmatpush1.bf16.msra.mxu1 %v7170_v27 }
 0x3dd   : > { %2327 = vmatprep.subr.bf16.mxu1 %v7171_v37  ;;  %2419 = vmatpush1.bf16.msra.mxu0 %v5640_v13  ;;  %v7177_v13 = vld [vmem:[#allocation62_spill] sm:$0xff] }
 0x3de   : > { %2420 = vmatprep.subr.bf16.mxu0 %v5643_v14  ;;  %v7178_v14 = vld [vmem:[#allocation63_spill] sm:$0xff] }
 0x3e0   : > { %2328 = vmatpush1.bf16.msra.mxu1 %v7172_v44 }
 0x3e1   : > { %2329 = vmatprep.subr.bf16.mxu1 %v7173_v8  ;;  %2421 = vmatpush1.bf16.msra.mxu0 %v5646_v15  ;;  %v7179_v15 = vld [vmem:[#allocation64_spill] sm:$0xff] }
 0x3e2   : > { %2422 = vmatprep.subr.bf16.mxu0 %v5649_v16  ;;  %v7180_v16 = vld [vmem:[#allocation65_spill] sm:$0xff] }
 0x3e4   : > { %2330 = vmatpush1.bf16.msra.mxu1 %v7174_v10 }
 0x3e5   : > { %2331 = vmatprep.subr.bf16.mxu1 %v7175_v11  ;;  %2423 = vmatpush1.bf16.msra.mxu0 %v5652_v17  ;;  %v7181_v17 = vld [vmem:[#allocation66_spill] sm:$0xff] }
 0x3e6   : > { %2424 = vmatprep.subr.bf16.mxu0 %v5655_v18  ;;  %v7182_v18 = vld [vmem:[#allocation67_spill] sm:$0xff] }
 0x3e8   : > { %2332 = vmatpush1.bf16.msra.mxu1 %v7176_v12 }
 0x3e9   : > { %2333 = vmatprep.subr.bf16.mxu1 %v7177_v13  ;;  %2425 = vmatpush1.bf16.msra.mxu0 %v5662_v21  ;;  %v7183_v21 = vld [vmem:[#allocation68_spill] sm:$0xff] }
 0x3ea   : > { %2426 = vmatprep.subr.bf16.mxu0 %v5666_v22  ;;  %v7184_v22 = vld [vmem:[#allocation69_spill] sm:$0xff] }
 0x3ec   : > { %2334 = vmatpush1.bf16.msra.mxu1 %v7178_v14 }
 0x3ed   : > { %2335 = vmatprep.subr.bf16.mxu1 %v7179_v15  ;;  %2427 = vmatpush1.bf16.msra.mxu0 %v5675_v25  ;;  %v7185_v25 = vld [vmem:[#allocation70_spill] sm:$0xff] }
 0x3ee   : > { %2428 = vmatprep.subr.bf16.mxu0 %v5677_v26  ;;  %v7186_v26 = vld [vmem:[#allocation71_spill] sm:$0xff] }
 0x3f0   : > { %2336 = vmatpush1.bf16.msra.mxu1 %v7180_v16 }
 0x3f1   : > { %2337 = vmatprep.subr.bf16.mxu1 %v7181_v17  ;;  %2429 = vmatpush1.bf16.msra.mxu0 %v5689_v30  ;;  %v7187_v30 = vld [vmem:[#allocation72_spill] sm:$0xff] }
 0x3f2   : > { %2430 = vmatprep.subr.bf16.mxu0 %v5692_v31  ;;  %v7188_v31 = vld [vmem:[#allocation73_spill] sm:$0xff] }
 0x3f4   : > { %2338 = vmatpush1.bf16.msra.mxu1 %v7182_v18 }
 0x3f5   : > { %2339 = vmatprep.subr.bf16.mxu1 %v7183_v21  ;;  %2431 = vmatpush1.bf16.msra.mxu0 %v5701_v34  ;;  %v7189_v34 = vld [vmem:[#allocation74_spill] sm:$0xff] }
 0x3f6   : > { %2432 = vmatprep.subr.bf16.mxu0 %v5703_v35  ;;  %v7190_v35 = vld [vmem:[#allocation75_spill] sm:$0xff] }
 0x3f8   : > { %2340 = vmatpush1.bf16.msra.mxu1 %v7184_v22 }
 0x3f9   : > { %2341 = vmatprep.subr.bf16.mxu1 %v7185_v25  ;;  %2433 = vmatpush1.bf16.msra.mxu0 %v5713_v38  ;;  %v7191_v38 = vld [vmem:[#allocation22_spill] sm:$0xff] }
 0x3fa   : > { %2434 = vmatprep.subr.bf16.mxu0 %v5716_v39  ;;  %v7192_v39 = vld [vmem:[#allocation23_spill] sm:$0xff] }
 0x3fc   : > { %2342 = vmatpush1.bf16.msra.mxu1 %v7186_v26 }
 0x3fd   : > { %2343 = vmatprep.subr.bf16.mxu1 %v7187_v30  ;;  %2435 = vmatpush1.bf16.msra.mxu0 %v5725_v42  ;;  %v7193_v42 = vld [vmem:[#allocation24_spill] sm:$0xff] }
 0x3fe   : > { %2436 = vmatprep.subr.bf16.mxu0 %v5727_v43  ;;  %v7194_v43 = vld [vmem:[#allocation25_spill] sm:$0xff] }
 0x400   : > { %2344 = vmatpush1.bf16.msra.mxu1 %v7188_v31 }
 0x401   : > { %2345 = vmatprep.subr.bf16.mxu1 %v7189_v34  ;;  %2437 = vmatpush1.bf16.msra.mxu0 %v5737_v46  ;;  %v7195_v46 = vld [vmem:[#allocation26_spill] sm:$0xff] }
 0x402   : > { %2438 = vmatprep.subr.bf16.mxu0 %v5740_v47  ;;  %v7197_v47 = vld [vmem:[#allocation28_spill] sm:$0xff] }
 0x404   : > { %2346 = vmatpush1.bf16.msra.mxu1 %v5910_v3 }
 0x405   : > { %2347 = vmatprep.subr.bf16.mxu1 %v7190_v35  ;;  %2439 = vmatpush1.bf16.msra.mxu0 %v5749_v50  ;;  %v7198_v50 = vld [vmem:[#allocation29_spill] sm:$0xff] }
 0x406   : > { %2440 = vmatprep.subr.bf16.mxu0 %v5751_v51  ;;  %v7199_v51 = vld [vmem:[#allocation30_spill] sm:$0xff] }
 0x408   : > { %2348 = vmatpush1.bf16.msra.mxu1 %v5918_v6 }
 0x409   : > { %2349 = vmatprep.subr.bf16.mxu1 %v5921_v61  ;;  %2441 = vmatpush1.bf16.msra.mxu0 %v5761_v54  ;;  %v7202_v54 = vld [vmem:[#allocation33_spill] sm:$0xff] }
 0x40a   : > { %2442 = vmatprep.subr.bf16.mxu0 %v5764_v55  ;;  %v7203_v55 = vld [vmem:[#allocation34_spill] sm:$0xff] }
 0x40c   : > { %2350 = vmatpush1.bf16.msra.mxu1 %v5926_v53 }
 0x40d   : > { %2351 = vmatprep.subr.bf16.mxu1 %v5929_v1  ;;  %2443 = vmatpush1.bf16.msra.mxu0 %v5773_v58  ;;  %v7204_v58 = vld [vmem:[#allocation35_spill] sm:$0xff] }
 0x40e   : > { %2444 = vmatprep.subr.bf16.mxu0 %v5775_v59  ;;  %v7205_v59 = vld [vmem:[#allocation36_spill] sm:$0xff] }
 0x410   : > { %2352 = vmatpush1.bf16.msra.mxu1 %v5934_v9 }
 0x411   : > { %2455 = vmatprep.subr.bf16.mxu1 %v5657_v19  ;;  %2445 = vmatpush1.bf16.msra.mxu0 %v5785_v62  ;;  %v7196_v19 = vld [vmem:[#allocation27_spill] sm:$0xff] }
 0x412   : > { %2496 = vmatprep.subr.bf16.mxu0 %v5787_v63 }
 0x413   : > { %2354 = vmatmul.mubr.bf16.vlgmr.msra.gmra.mrb[8].mxu1 %v5998_v2  ;;  %v7218_v2 = vld [vmem:[#allocation55_spill] sm:$0xff] }
 0x414   : > { %2456 = vmatpush1.bf16.msra.mxu1 %v5659_v20  ;;  %v7200_v20 = vld [vmem:[#allocation31_spill] sm:$0xff] }
 0x415   : > { %2457 = vmatprep.subr.bf16.mxu1 %v5669_v23  ;;  %v7201_v23 = vld [vmem:[#allocation32_spill] sm:$0xff] }
 0x418   : > { %2458 = vmatpush1.bf16.msra.mxu1 %v7191_v38  ;;  %v7219_v38 = vld [vmem:[#allocation58_spill] sm:$0xff] }
 0x419   : > { %2459 = vmatprep.subr.bf16.mxu1 %v7192_v39  ;;  %v6098_v39 = vld [vmem:[#allocation9 + $0x4] ss:$24 sps:$4 sm:$0xff]  }
 0x41a   : > { %7220 = vst [vmem:[#allocation44_spill] sm:$0xff] %v6098_v39 }
 0x41c   : > { %2460 = vmatpush1.bf16.msra.mxu1 %v7193_v42 }
 0x41d   : > { %2461 = vmatprep.subr.bf16.mxu1 %v7194_v43 }
 0x420   : > { %2462 = vmatpush1.bf16.msra.mxu1 %v7195_v46 }
 0x421   : > { %2463 = vmatprep.subr.bf16.mxu1 %v7196_v19 }
 0x424   : > { %2464 = vmatpush1.bf16.msra.mxu1 %v7197_v47 }
 0x425   : > { %2465 = vmatprep.subr.bf16.mxu1 %v7198_v50 }
 0x428   : > { %2466 = vmatpush1.bf16.msra.mxu1 %v7199_v51 }
 0x429   : > { %2467 = vmatprep.subr.bf16.mxu1 %v7200_v20 }
 0x42c   : > { %2468 = vmatpush1.bf16.msra.mxu1 %v7201_v23  ;;  %v2231_v23 = vld [vmem:[#allocation2 + $0x30] sm:$0xff] }
 0x42d   : > { %2469 = vmatprep.subr.bf16.mxu1 %v7202_v54  ;;  %v2232_v54 = vld [vmem:[#allocation2 + $0x38] sm:$0xff] }
 0x430   : > { %2470 = vmatpush1.bf16.msra.mxu1 %v7203_v55 }
 0x431   : > { %2471 = vmatprep.subr.bf16.mxu1 %v7204_v58 }
 0x434   : > { %2472 = vmatpush1.bf16.msra.mxu1 %v7205_v59 }
 0x435   : > { %2473 = vmatprep.subr.bf16.mxu1 %v7206_v0 }
 0x438   : > { %2474 = vmatpush1.bf16.msra.mxu1 %v7207_v5  ;;  %v2233_v5 = vld [vmem:[#allocation2 + $0x40] sm:$0xff] }
 0x439   : > { %2475 = vmatprep.subr.bf16.mxu1 %v7208_v40  ;;  %v2234_v40 = vld [vmem:[#allocation2 + $0x48] sm:$0xff] }
 0x43c   : > { %2476 = vmatpush1.bf16.msra.mxu1 %v7209_v41 }
 0x43d   : > { %2477 = vmatprep.subr.bf16.mxu1 %v7210_v49 }
 0x440   : > { %2478 = vmatpush1.bf16.msra.mxu1 %v7211_v52 }
 0x441   : > { %2479 = vmatprep.subr.bf16.mxu1 %v7212_v48 }
 0x444   : > { %2480 = vmatpush1.bf16.msra.mxu1 %v7213_v56 }
 0x445   : > { %2481 = vmatprep.subr.bf16.mxu1 %v7214_v32 }
 0x448   : > { %2482 = vmatpush1.bf16.msra.mxu1 %v7215_v33 }
 0x449   : > { %2483 = vmatprep.subr.bf16.mxu1 %v7216_v57 }
 0x44c   : > { %2484 = vmatpush1.bf16.msra.mxu1 %v7217_v60 }
 0x44d   : > { %2485 = vmatprep.subr.bf16.mxu1 %v7218_v2 }
 0x450   : > { %2486 = vmatpush1.bf16.msra.mxu1 %v7219_v38 }
 0x451   : > { %2589 = vmatprep.subr.bf16.mxu1 %v6098_v39 }
 0x4a6   : > { %v2273_v42 = vpop.f32.mrb[4].mxu1  ;;  %v2314_v43 = vpop.f32.mrb[8].mxu0 }
 0x4a7   : > { %v2275_v46 = vpop.f32.mrb[5].mxu1  ;;  %v2316_v19 = vpop.f32.mrb[9].mxu0  ;;  %v2362_v55 = vadd.f32 %v2273_v42, %v2231_v23  ;;  %v2376_v41 = vadd.f32 %v2314_v43, %v2233_v5 }
 0x4a8   : > { %v2277_v47 = vpop.f32.mrb[6].mxu1  ;;  %v2318_v50 = vpop.f32.mrb[10].mxu0  ;;  %v2363_v58 = vadd.f32 %v2275_v46, %v2232_v54  ;;  %v2377_v49 = vadd.f32 %v2316_v19, %v2234_v40  ;;  %v7221_v54 = vld [vmem:[#allocation76_spill] sm:$0xff]  ;;  %v2235_v19 = vld [vmem:[#allocation2 + $0x50] sm:$0xff] }
 0x4a9   : > { %v2278_v51 = vpop.f32.mrb[7].mxu1  ;;  %v2319_v20 = vpop.f32.mrb[11].mxu0  ;;  %v3988_v59 = vmul.f32 -1.442695, %v2362_v55  ;;  %v3990_v52 = vmul.f32 -1.442695, %v2376_v41 }
 0x4aa   : > { %v3989_v0 = vmul.f32 -1.442695, %v2363_v58  ;;  %v3991_v48 = vmul.f32 -1.442695, %v2377_v49  ;;  %v2236_v41 = vld [vmem:[#allocation2 + $0x58] sm:$0xff] }
 0x4ab   : > { %4540 = vpow2.f32 %v3988_v59 }
 0x4ac   : > { %4542 = vpow2.f32 %v3989_v0 }
 0x4ad   : > { %4544 = vpow2.f32 %v3990_v52 }
 0x4ae   : > { %4546 = vpow2.f32 %v3991_v48 }
 0x4b5   : > { %v4541_v56 = vpop.eup %4540 }
 0x4b6   : > { %v4543_v32 = vpop.eup %4542  ;;  %v2370_v47 = vadd.f32 1.0, %v4541_v56 }
 0x4b7   : > { %v2371_v50 = vadd.f32 1.0, %v4543_v32  ;;  %v4545_v42 = vpop.eup %4544 }
 0x4b8   : > { %4548 = vrcp.f32 %v2370_v47  ;;  %v4547_v46 = vpop.eup %4546  ;;  %v2384_v51 = vadd.f32 1.0, %v4545_v42 }
 0x4b9   : > { %4550 = vrcp.f32 %v2371_v50  ;;  %v2385_v20 = vadd.f32 1.0, %v4547_v46 }
 0x4ba   : > { %4552 = vrcp.f32 %v2384_v51 }
 0x4bb   : > { %4554 = vrcp.f32 %v2385_v20 }
 0x4c2   : > { %v4549_v43 = vpop.eup %4548 }
 0x4c3   : > { %v4551_v5 = vpop.eup %4550 }
 0x4c4   : > { %v4553_v32 = vpop.eup %4552 }
 0x4c5   : > { %v4555_v47 = vpop.eup %4554  ;;  %v2398_v50 = vsub.f32 1.0, %v4553_v32 }
 0x4c6   : > { %v2399_v46 = vsub.f32 1.0, %v4555_v47  ;;  %v2403_v51 = vmul.f32 %v4555_v47, %v5992_v29  ;;  %v6122_v29 = vld [vmem:[#allocation9 + $0x34] ss:$24 sps:$4 sm:$0xff]   ;;  %v6286_v47 = vld [vmem:[#allocation9 + $0x158] ss:$24 sps:$4 sm:$0xff]  }
 0x4c7   : > { %7248 = vst [vmem:[#allocation24_spill] sm:$0xff] %v6286_v47 }
 0x4e6   : > { %v2355_v23 = vpop.f32.mrb[8].mxu1 }
 0x4e7   : > { %v2390_v55 = vadd.f32 %v2355_v23, %v7221_v54  ;;  %v2357_v58 = vpop.f32.mrb[9].mxu1 }
 0x4e8   : > { %v2391_v59 = vadd.f32 %v2357_v58, %v5986_v45  ;;  %v2359_v0 = vpop.f32.mrb[10].mxu1  ;;  %v2402_v58 = vmul.f32 %v4553_v32, %v5990_v4  ;;  %v6119_v4 = vld [vmem:[#allocation9] ss:$24 sps:$4 sm:$0xff]   ;;  %v6283_v32 = vld [vmem:[#allocation9 + $0x15c] ss:$24 sps:$4 sm:$0xff]  }
 0x4e9   : > { %v2392_v40 = vmul.f32 %v4549_v43, %v2390_v55  ;;  %v2360_v49 = vpop.f32.mrb[11].mxu1  ;;  %7247 = vst [vmem:[#allocation23_spill] sm:$0xff] %v6283_v32 }
 0x4ea   : > { %v2393_v52 = vmul.f32 %v4551_v5, %v2391_v59  ;;  %v6138_v59 = vld [vmem:[#allocation9 + $0x94] ss:$24 sps:$4 sm:$0xff]   ;;  %v6262_v5 = vld [vmem:[#allocation9 + $0x98] ss:$24 sps:$4 sm:$0xff]  }
 0x4eb   : > { %v2394_v48 = vadd.f32 %v2392_v40, %v2235_v19  ;;  %7240 = vst [vmem:[#allocation70_spill] sm:$0xff] %v6262_v5  ;;  %v6265_v40 = vld [vmem:[#allocation9 + $0xcc] ss:$24 sps:$4 sm:$0xff]   ;;  %v6271_v49 = vld [vmem:[#allocation9 + $0xfc] ss:$24 sps:$4 sm:$0xff]  }
 0x4ec   : > { %v2395_v56 = vadd.f32 %v2393_v52, %v2236_v41  ;;  %7241 = vst [vmem:[#allocation71_spill] sm:$0xff] %v6265_v40  ;;  %v6268_v41 = vld [vmem:[#allocation9 + $0xc8] ss:$24 sps:$4 sm:$0xff]   ;;  %7243 = vst [vmem:[#allocation73_spill] sm:$0xff] %v6271_v49  ;;  %v6274_v52 = vld [vmem:[#allocation9 + $0xf8] ss:$24 sps:$4 sm:$0xff]  }
 0x4ed   : > { %4556 = vtanh.f32 %v2394_v48  ;;  %7242 = vst [vmem:[#allocation72_spill] sm:$0xff] %v6268_v41  ;;  %7244 = vst [vmem:[#allocation74_spill] sm:$0xff] %v6274_v52  ;;  %v6277_v48 = vld [vmem:[#allocation9 + $0x12c] ss:$24 sps:$4 sm:$0xff]  }
 0x4ee   : > { %4558 = vtanh.f32 %v2395_v56  ;;  %7245 = vst [vmem:[#allocation75_spill] sm:$0xff] %v6277_v48  ;;  %v6280_v56 = vld [vmem:[#allocation9 + $0x128] ss:$24 sps:$4 sm:$0xff]  }
 0x4ef   : > { %7246 = vst [vmem:[#allocation22_spill] sm:$0xff] %v6280_v56 }
 0x4f7   : > { %v4557_v42 = vpop.eup %4556 }
 0x4f8   : > { %v4559_v23 = vpop.eup %4558  ;;  %v2400_v54 = vmul.f32 %v4557_v42, %v2398_v50  ;;  %v6289_v50 = vld [vmem:[#allocation9 + $0x18c] ss:$24 sps:$4 sm:$0xff]   ;;  %v6292_v42 = vld [vmem:[#allocation9 + $0x188] ss:$24 sps:$4 sm:$0xff]  }
 0x4f9   : > { %v2401_v0 = vmul.f32 %v4559_v23, %v2399_v46  ;;  %7249 = vst [vmem:[#allocation25_spill] sm:$0xff] %v6289_v50  ;;  %7250 = vst [vmem:[#allocation26_spill] sm:$0xff] %v6292_v42  ;;  %v6295_v46 = vld [vmem:[#allocation9 + $0x1bc] ss:$24 sps:$4 sm:$0xff]   ;;  %v6298_v23 = vld [vmem:[#allocation9 + $0x1b8] ss:$24 sps:$4 sm:$0xff]  }
 0x4fa   : > { %v6105_v55 = vadd.f32 %v2402_v58, %v2400_v54  ;;  %v6127_v54 = vld [vmem:[#allocation9 + $0x30] ss:$24 sps:$4 sm:$0xff]   ;;  %7251 = vst [vmem:[#allocation27_spill] sm:$0xff] %v6295_v46  ;;  %7252 = vst [vmem:[#allocation28_spill] sm:$0xff] %v6298_v23  ;;  %v6301_v58 = vld [vmem:[#allocation9 + $0x1ec] ss:$24 sps:$4 sm:$0xff]  }
 0x4fb   : > { %v6107_v20 = vadd.f32 %v2403_v51, %v2401_v0  ;;  %7253 = vst [vmem:[#allocation29_spill] sm:$0xff] %v6301_v58  ;;  %v6304_v0 = vld [vmem:[#allocation9 + $0x1e8] ss:$24 sps:$4 sm:$0xff]   ;;  %v6307_v51 = vld [vmem:[#allocation9 + $0x21c] ss:$24 sps:$4 sm:$0xff]  }
 0x4fc   : > { %v6113_v19 = vpack.c.bf16 %v6105_v55, %v6105_v55  ;;  %7254 = vst [vmem:[#allocation30_spill] sm:$0xff] %v6304_v0  ;;  %7255 = vst [vmem:[#allocation31_spill] sm:$0xff] %v6307_v51 }
 0x4fd   : > { %v2413_v43 = vpack.c.bf16 %v6107_v20, %v6107_v20 }
 0x4ff   : > { %2446 = vmatprep.mubr.bf16.mxu0 %v2413_v43  ;;  %2487 = vmatprep.mubr.bf16.mxu1 %v2413_v43 }
 0x500   : > { %2447 = vmatmul.mubr.bf16.vlgmr.msra.gmra.mrb[12].mxu0 %v6113_v19  ;;  %2488 = vmatmul.mubr.bf16.vlgmr.msra.gmra.mrb[12].mxu1 %v6113_v19 }
 0x501   : > { %2497 = vmatpush1.bf16.msra.mxu0 %v7166_v28  ;;  %2528 = vmatprep.mubr.bf16.mxu0 %v2413_v43  ;;  %v6130_v28 = vld [vmem:[#allocation9 + $0x64] ss:$24 sps:$4 sm:$0xff]   ;;  %v6310_v43 = vld [vmem:[#allocation9 + $0x218] ss:$24 sps:$4 sm:$0xff]  }
 0x502   : > { %2498 = vmatprep.subr.bf16.mxu0 %v7167_v36  ;;  %2590 = vmatpush1.bf16.msra.mxu1 %v6119_v4  ;;  %v6135_v36 = vld [vmem:[#allocation9 + $0x60] ss:$24 sps:$4 sm:$0xff]   ;;  %7256 = vst [vmem:[#allocation32_spill] sm:$0xff] %v6310_v43 }
 0x503   : > { %2591 = vmatprep.subr.bf16.mxu1 %v6122_v29 }
 0x505   : > { %2499 = vmatpush1.bf16.msra.mxu0 %v7168_v24  ;;  %v6143_v24 = vld [vmem:[#allocation9 + $0x90] ss:$24 sps:$4 sm:$0xff]  }
 0x506   : > { %2500 = vmatprep.subr.bf16.mxu0 %v7169_v7  ;;  %2592 = vmatpush1.bf16.msra.mxu1 %v6127_v54  ;;  %v6146_v7 = vld [vmem:[#allocation9 + $0xc4] ss:$24 sps:$4 sm:$0xff]  }
 0x507   : > { %2593 = vmatprep.subr.bf16.mxu1 %v6130_v28 }
 0x509   : > { %2501 = vmatpush1.bf16.msra.mxu0 %v7170_v27  ;;  %v6151_v27 = vld [vmem:[#allocation9 + $0xc0] ss:$24 sps:$4 sm:$0xff]  }
 0x50a   : > { %2502 = vmatprep.subr.bf16.mxu0 %v7171_v37  ;;  %2594 = vmatpush1.bf16.msra.mxu1 %v6135_v36  ;;  %v6154_v37 = vld [vmem:[#allocation9 + $0xf4] ss:$24 sps:$4 sm:$0xff]  }
 0x50b   : > { %2595 = vmatprep.subr.bf16.mxu1 %v6138_v59 }
 0x50d   : > { %2503 = vmatpush1.bf16.msra.mxu0 %v7172_v44  ;;  %v6159_v44 = vld [vmem:[#allocation9 + $0xf0] ss:$24 sps:$4 sm:$0xff]  }
 0x50e   : > { %2504 = vmatprep.subr.bf16.mxu0 %v7173_v8  ;;  %2596 = vmatpush1.bf16.msra.mxu1 %v6143_v24  ;;  %v6162_v8 = vld [vmem:[#allocation9 + $0x124] ss:$24 sps:$4 sm:$0xff]  }
 0x50f   : > { %2597 = vmatprep.subr.bf16.mxu1 %v6146_v7 }
 0x511   : > { %2505 = vmatpush1.bf16.msra.mxu0 %v7174_v10  ;;  %v6167_v10 = vld [vmem:[#allocation9 + $0x120] ss:$24 sps:$4 sm:$0xff]  }
 0x512   : > { %2506 = vmatprep.subr.bf16.mxu0 %v7175_v11  ;;  %2598 = vmatpush1.bf16.msra.mxu1 %v6151_v27  ;;  %v6170_v11 = vld [vmem:[#allocation9 + $0x154] ss:$24 sps:$4 sm:$0xff]  }
 0x513   : > { %2599 = vmatprep.subr.bf16.mxu1 %v6154_v37 }
 0x515   : > { %2507 = vmatpush1.bf16.msra.mxu0 %v7176_v12  ;;  %v6175_v12 = vld [vmem:[#allocation9 + $0x150] ss:$24 sps:$4 sm:$0xff]  }
 0x516   : > { %2508 = vmatprep.subr.bf16.mxu0 %v7177_v13  ;;  %2600 = vmatpush1.bf16.msra.mxu1 %v6159_v44  ;;  %v6178_v13 = vld [vmem:[#allocation9 + $0x184] ss:$24 sps:$4 sm:$0xff]  }
 0x517   : > { %2601 = vmatprep.subr.bf16.mxu1 %v6162_v8 }
 0x519   : > { %2509 = vmatpush1.bf16.msra.mxu0 %v7178_v14  ;;  %v6183_v14 = vld [vmem:[#allocation9 + $0x180] ss:$24 sps:$4 sm:$0xff]  }
 0x51a   : > { %2510 = vmatprep.subr.bf16.mxu0 %v7179_v15  ;;  %2602 = vmatpush1.bf16.msra.mxu1 %v6167_v10  ;;  %v6186_v15 = vld [vmem:[#allocation9 + $0x1b4] ss:$24 sps:$4 sm:$0xff]  }
 0x51b   : > { %2603 = vmatprep.subr.bf16.mxu1 %v6170_v11 }
 0x51d   : > { %2511 = vmatpush1.bf16.msra.mxu0 %v7180_v16  ;;  %v6191_v16 = vld [vmem:[#allocation9 + $0x1b0] ss:$24 sps:$4 sm:$0xff]  }
 0x51e   : > { %2512 = vmatprep.subr.bf16.mxu0 %v7181_v17  ;;  %2604 = vmatpush1.bf16.msra.mxu1 %v6175_v12  ;;  %v6194_v17 = vld [vmem:[#allocation9 + $0x1e4] ss:$24 sps:$4 sm:$0xff]  }
 0x51f   : > { %2605 = vmatprep.subr.bf16.mxu1 %v6178_v13  ;;  %7222 = vst [vmem:[#allocation45_spill] sm:$0xff] %v6194_v17 }
 0x521   : > { %2513 = vmatpush1.bf16.msra.mxu0 %v7182_v18  ;;  %v6199_v18 = vld [vmem:[#allocation9 + $0x1e0] ss:$24 sps:$4 sm:$0xff]  }
 0x522   : > { %2514 = vmatprep.subr.bf16.mxu0 %v7183_v21  ;;  %2606 = vmatpush1.bf16.msra.mxu1 %v6183_v14  ;;  %7223 = vst [vmem:[#allocation48_spill] sm:$0xff] %v6199_v18  ;;  %v6202_v21 = vld [vmem:[#allocation9 + $0x214] ss:$24 sps:$4 sm:$0xff]  }
 0x523   : > { %2607 = vmatprep.subr.bf16.mxu1 %v6186_v15  ;;  %7224 = vst [vmem:[#allocation49_spill] sm:$0xff] %v6202_v21 }
 0x525   : > { %2515 = vmatpush1.bf16.msra.mxu0 %v7184_v22  ;;  %v6207_v22 = vld [vmem:[#allocation9 + $0x210] ss:$24 sps:$4 sm:$0xff]  }
 0x526   : > { %2516 = vmatprep.subr.bf16.mxu0 %v7185_v25  ;;  %2608 = vmatpush1.bf16.msra.mxu1 %v6191_v16  ;;  %7225 = vst [vmem:[#allocation52_spill] sm:$0xff] %v6207_v22  ;;  %v6210_v25 = vld [vmem:[#allocation9 + $0x244] ss:$24 sps:$4 sm:$0xff]  }
 0x527   : > { %2609 = vmatprep.subr.bf16.mxu1 %v6194_v17  ;;  %7226 = vst [vmem:[#allocation53_spill] sm:$0xff] %v6210_v25 }
 0x529   : > { %2517 = vmatpush1.bf16.msra.mxu0 %v7186_v26  ;;  %v6215_v26 = vld [vmem:[#allocation9 + $0x240] ss:$24 sps:$4 sm:$0xff]  }
 0x52a   : > { %2518 = vmatprep.subr.bf16.mxu0 %v7187_v30  ;;  %2610 = vmatpush1.bf16.msra.mxu1 %v6199_v18  ;;  %7227 = vst [vmem:[#allocation56_spill] sm:$0xff] %v6215_v26  ;;  %v6218_v30 = vld [vmem:[#allocation9 + $0x274] ss:$24 sps:$4 sm:$0xff]  }
 0x52b   : > { %2611 = vmatprep.subr.bf16.mxu1 %v6202_v21  ;;  %7228 = vst [vmem:[#allocation57_spill] sm:$0xff] %v6218_v30 }
 0x52d   : > { %2519 = vmatpush1.bf16.msra.mxu0 %v7188_v31  ;;  %v6223_v31 = vld [vmem:[#allocation9 + $0x270] ss:$24 sps:$4 sm:$0xff]  }
 0x52e   : > { %2520 = vmatprep.subr.bf16.mxu0 %v7189_v34  ;;  %2612 = vmatpush1.bf16.msra.mxu1 %v6207_v22  ;;  %7229 = vst [vmem:[#allocation59_spill] sm:$0xff] %v6223_v31  ;;  %v6226_v34 = vld [vmem:[#allocation9 + $0x2a4] ss:$24 sps:$4 sm:$0xff]  }
 0x52f   : > { %2613 = vmatprep.subr.bf16.mxu1 %v6210_v25  ;;  %7230 = vst [vmem:[#allocation60_spill] sm:$0xff] %v6226_v34 }
 0x531   : > { %2521 = vmatpush1.bf16.msra.mxu0 %v5910_v3  ;;  %v6231_v3 = vld [vmem:[#allocation9 + $0x2a0] ss:$24 sps:$4 sm:$0xff]  }
 0x532   : > { %2522 = vmatprep.subr.bf16.mxu0 %v7190_v35  ;;  %2614 = vmatpush1.bf16.msra.mxu1 %v6215_v26  ;;  %7231 = vst [vmem:[#allocation61_spill] sm:$0xff] %v6231_v3  ;;  %v6234_v35 = vld [vmem:[#allocation9 + $0x2d4] ss:$24 sps:$4 sm:$0xff]  }
 0x533   : > { %2615 = vmatprep.subr.bf16.mxu1 %v6218_v30  ;;  %7232 = vst [vmem:[#allocation62_spill] sm:$0xff] %v6234_v35 }
 0x535   : > { %2523 = vmatpush1.bf16.msra.mxu0 %v5918_v6  ;;  %v6250_v6 = vld [vmem:[#allocation9 + $0x38] ss:$24 sps:$4 sm:$0xff]  }
 0x536   : > { %2524 = vmatprep.subr.bf16.mxu0 %v5921_v61  ;;  %2616 = vmatpush1.bf16.msra.mxu1 %v6223_v31  ;;  %v6238_v61 = vld [vmem:[#allocation9 + $0xc] ss:$24 sps:$4 sm:$0xff]   ;;  %7236 = vst [vmem:[#allocation66_spill] sm:$0xff] %v6250_v6 }
 0x537   : > { %2617 = vmatprep.subr.bf16.mxu1 %v6226_v34  ;;  %7233 = vst [vmem:[#allocation63_spill] sm:$0xff] %v6238_v61 }
 0x539   : > { %2525 = vmatpush1.bf16.msra.mxu0 %v5926_v53  ;;  %v6244_v53 = vld [vmem:[#allocation9 + $0x8] ss:$24 sps:$4 sm:$0xff]  }
 0x53a   : > { %2526 = vmatprep.subr.bf16.mxu0 %v5929_v1  ;;  %2618 = vmatpush1.bf16.msra.mxu1 %v6231_v3  ;;  %7234 = vst [vmem:[#allocation64_spill] sm:$0xff] %v6244_v53  ;;  %v6247_v1 = vld [vmem:[#allocation9 + $0x3c] ss:$24 sps:$4 sm:$0xff]  }
 0x53b   : > { %2619 = vmatprep.subr.bf16.mxu1 %v6234_v35  ;;  %7235 = vst [vmem:[#allocation65_spill] sm:$0xff] %v6247_v1 }
 0x53d   : > { %2527 = vmatpush1.bf16.msra.mxu0 %v5934_v9  ;;  %v6253_v9 = vld [vmem:[#allocation9 + $0x6c] ss:$24 sps:$4 sm:$0xff]  }
 0x53e   : > { %2630 = vmatprep.subr.bf16.mxu0 %v6238_v61  ;;  %2620 = vmatpush1.bf16.msra.mxu1 %v5785_v62  ;;  %7237 = vst [vmem:[#allocation67_spill] sm:$0xff] %v6253_v9  ;;  %v6256_v62 = vld [vmem:[#allocation9 + $0x68] ss:$24 sps:$4 sm:$0xff]  }
 0x53f   : > { %2671 = vmatprep.subr.bf16.mxu1 %v5787_v63  ;;  %7238 = vst [vmem:[#allocation68_spill] sm:$0xff] %v6256_v62  ;;  %v6259_v63 = vld [vmem:[#allocation9 + $0x9c] ss:$24 sps:$4 sm:$0xff]  }
 0x540   : > { %2529 = vmatmul.mubr.bf16.vlgmr.msra.gmra.mrb[16].mxu0 %v6113_v19  ;;  %7239 = vst [vmem:[#allocation69_spill] sm:$0xff] %v6259_v63  ;;  %v6313_v19 = vld [vmem:[#allocation9 + $0x24c] ss:$24 sps:$4 sm:$0xff]  }
 0x541   : > { %2631 = vmatpush1.bf16.msra.mxu0 %v6244_v53  ;;  %7257 = vst [vmem:[#allocation33_spill] sm:$0xff] %v6313_v19 }
 0x542   : > { %2632 = vmatprep.subr.bf16.mxu0 %v6247_v1 }
 0x545   : > { %2633 = vmatpush1.bf16.msra.mxu0 %v6250_v6 }
 0x546   : > { %2634 = vmatprep.subr.bf16.mxu0 %v6253_v9 }
 0x549   : > { %2635 = vmatpush1.bf16.msra.mxu0 %v6256_v62 }
 0x54a   : > { %2636 = vmatprep.subr.bf16.mxu0 %v6259_v63 }
 0x54d   : > { %2637 = vmatpush1.bf16.msra.mxu0 %v6262_v5 }
 0x54e   : > { %2638 = vmatprep.subr.bf16.mxu0 %v6265_v40 }
 0x551   : > { %2639 = vmatpush1.bf16.msra.mxu0 %v6268_v41 }
 0x552   : > { %2640 = vmatprep.subr.bf16.mxu0 %v6271_v49 }
 0x555   : > { %2641 = vmatpush1.bf16.msra.mxu0 %v6274_v52 }
 0x556   : > { %2642 = vmatprep.subr.bf16.mxu0 %v6277_v48 }
 0x559   : > { %2643 = vmatpush1.bf16.msra.mxu0 %v6280_v56 }
 0x55a   : > { %2644 = vmatprep.subr.bf16.mxu0 %v6283_v32 }
 0x55d   : > { %2645 = vmatpush1.bf16.msra.mxu0 %v6286_v47 }
 0x55e   : > { %2646 = vmatprep.subr.bf16.mxu0 %v6289_v50  ;;  %v2406_v50 = vld [vmem:[#allocation2 + $0x60] sm:$0xff] }
 0x561   : > { %2647 = vmatpush1.bf16.msra.mxu0 %v6292_v42 }
 0x562   : > { %2648 = vmatprep.subr.bf16.mxu0 %v6295_v46 }
 0x565   : > { %2649 = vmatpush1.bf16.msra.mxu0 %v6298_v23  ;;  %v6316_v23 = vld [vmem:[#allocation9 + $0x248] ss:$24 sps:$4 sm:$0xff]  }
 0x566   : > { %2650 = vmatprep.subr.bf16.mxu0 %v6301_v58  ;;  %7258 = vst [vmem:[#allocation34_spill] sm:$0xff] %v6316_v23  ;;  %v6319_v58 = vld [vmem:[#allocation9 + $0x27c] ss:$24 sps:$4 sm:$0xff]  }
 0x567   : > { %7259 = vst [vmem:[#allocation35_spill] sm:$0xff] %v6319_v58 }
 0x569   : > { %2651 = vmatpush1.bf16.msra.mxu0 %v6304_v0 }
 0x56a   : > { %2652 = vmatprep.subr.bf16.mxu0 %v6307_v51 }
 0x56d   : > { %2653 = vmatpush1.bf16.msra.mxu0 %v6310_v43 }
 0x56e   : > { %2654 = vmatprep.subr.bf16.mxu0 %v6313_v19 }
 0x571   : > { %2655 = vmatpush1.bf16.msra.mxu0 %v6316_v23 }
 0x572   : > { %2656 = vmatprep.subr.bf16.mxu0 %v6319_v58 }
 0x575   : > { %2657 = vmatpush1.bf16.msra.mxu0 %v7215_v33  ;;  %v2407_v33 = vld [vmem:[#allocation2 + $0x68] sm:$0xff] }
 0x576   : > { %2658 = vmatprep.subr.bf16.mxu0 %v7216_v57 }
 0x579   : > { %2659 = vmatpush1.bf16.msra.mxu0 %v7217_v60 }
 0x57a   : > { %2660 = vmatprep.subr.bf16.mxu0 %v7218_v2  ;;  %v2408_v2 = vld [vmem:[#allocation2 + $0x70] sm:$0xff] }
 0x57d   : > { %2661 = vmatpush1.bf16.msra.mxu0 %v7219_v38  ;;  %v2409_v38 = vld [vmem:[#allocation2 + $0x78] sm:$0xff] }
 0x57e   : > { %2764 = vmatprep.subr.bf16.mxu0 %v6098_v39 }
 0x5d3   : > { %v2448_v19 = vpop.f32.mrb[12].mxu0  ;;  %v2489_v43 = vpop.f32.mrb[12].mxu1 }
 0x5d4   : > { %v2450_v51 = vpop.f32.mrb[13].mxu0  ;;  %v2491_v23 = vpop.f32.mrb[13].mxu1  ;;  %v2537_v47 = vadd.f32 %v2448_v19, %v2406_v50  ;;  %v2551_v56 = vadd.f32 %v2489_v43, %v2408_v2 }
 0x5d5   : > { %v2452_v0 = vpop.f32.mrb[14].mxu0  ;;  %v2493_v46 = vpop.f32.mrb[14].mxu1  ;;  %v2538_v57 = vadd.f32 %v2450_v51, %v2407_v33  ;;  %v2552_v39 = vadd.f32 %v2491_v23, %v2409_v38  ;;  %v7260_v51 = vld [vmem:[#allocation76_spill] sm:$0xff] }
 0x5d6   : > { %v2453_v42 = vpop.f32.mrb[15].mxu0  ;;  %v2494_v58 = vpop.f32.mrb[15].mxu1  ;;  %v3992_v32 = vmul.f32 -1.442695, %v2537_v47  ;;  %v3994_v48 = vmul.f32 -1.442695, %v2551_v56 }
 0x5d7   : > { %v3993_v60 = vmul.f32 -1.442695, %v2538_v57  ;;  %v3995_v52 = vmul.f32 -1.442695, %v2552_v39  ;;  %v2410_v23 = vld [vmem:[#allocation2 + $0x80] sm:$0xff] }
 0x5d8   : > { %4560 = vpow2.f32 %v3992_v32 }
 0x5d9   : > { %4562 = vpow2.f32 %v3993_v60 }
 0x5da   : > { %4564 = vpow2.f32 %v3994_v48 }
 0x5db   : > { %4566 = vpow2.f32 %v3995_v52 }
 0x5e2   : > { %v4561_v49 = vpop.eup %4560 }
 0x5e3   : > { %v4563_v41 = vpop.eup %4562  ;;  %v2545_v42 = vadd.f32 1.0, %v4561_v49  ;;  %v2411_v49 = vld [vmem:[#allocation2 + $0x88] sm:$0xff] }
 0x5e4   : > { %v2546_v46 = vadd.f32 1.0, %v4563_v41  ;;  %v4565_v50 = vpop.eup %4564 }
 0x5e5   : > { %4568 = vrcp.f32 %v2545_v42  ;;  %v4567_v58 = vpop.eup %4566  ;;  %v2559_v47 = vadd.f32 1.0, %v4565_v50 }
 0x5e6   : > { %4570 = vrcp.f32 %v2546_v46  ;;  %v2560_v0 = vadd.f32 1.0, %v4567_v58 }
 0x5e7   : > { %4572 = vrcp.f32 %v2559_v47 }
 0x5e8   : > { %4574 = vrcp.f32 %v2560_v0 }
 0x5ef   : > { %v4569_v43 = vpop.eup %4568 }
 0x5f0   : > { %v4571_v57 = vpop.eup %4570 }
 0x5f1   : > { %v4573_v38 = vpop.eup %4572 }
 0x5f2   : > { %v4575_v42 = vpop.eup %4574  ;;  %v2573_v46 = vsub.f32 1.0, %v4573_v38 }
 0x5f3   : > { %v2574_v58 = vsub.f32 1.0, %v4575_v42  ;;  %v2578_v47 = vmul.f32 %v4575_v42, %v6107_v20  ;;  %v6347_v20 = vld [vmem:[#allocation9 + $0x44] ss:$24 sps:$4 sm:$0xff]   ;;  %v6392_v42 = vld [vmem:[#allocation9 + $0x130] ss:$24 sps:$4 sm:$0xff]  }
 0x613   : > { %v2530_v32 = vpop.f32.mrb[16].mxu0 }
 0x614   : > { %v2565_v19 = vadd.f32 %v2530_v32, %v7260_v51  ;;  %v2532_v33 = vpop.f32.mrb[17].mxu0 }
 0x615   : > { %v2566_v39 = vadd.f32 %v2532_v33, %v5986_v45  ;;  %v2534_v56 = vpop.f32.mrb[18].mxu0  ;;  %v2577_v33 = vmul.f32 %v4573_v38, %v6105_v55  ;;  %v6344_v55 = vld [vmem:[#allocation9 + $0x10] ss:$24 sps:$4 sm:$0xff]   ;;  %v6387_v38 = vld [vmem:[#allocation9 + $0x134] ss:$24 sps:$4 sm:$0xff]  }
 0x616   : > { %v2567_v52 = vmul.f32 %v4569_v43, %v2565_v19  ;;  %v2535_v41 = vpop.f32.mrb[19].mxu0 }
 0x617   : > { %v2568_v48 = vmul.f32 %v4571_v57, %v2566_v39  ;;  %v6355_v39 = vld [vmem:[#allocation9 + $0x74] ss:$24 sps:$4 sm:$0xff]   ;;  %v6360_v57 = vld [vmem:[#allocation9 + $0x70] ss:$24 sps:$4 sm:$0xff]  }
 0x618   : > { %v2569_v60 = vadd.f32 %v2567_v52, %v2410_v23  ;;  %v6363_v52 = vld [vmem:[#allocation9 + $0xa4] ss:$24 sps:$4 sm:$0xff]   ;;  %v6371_v41 = vld [vmem:[#allocation9 + $0xd4] ss:$24 sps:$4 sm:$0xff]  }
 0x619   : > { %v2570_v2 = vadd.f32 %v2568_v48, %v2411_v49  ;;  %v6368_v49 = vld [vmem:[#allocation9 + $0xa0] ss:$24 sps:$4 sm:$0xff]   ;;  %v6376_v48 = vld [vmem:[#allocation9 + $0xd0] ss:$24 sps:$4 sm:$0xff]  }
 0x61a   : > { %4576 = vtanh.f32 %v2569_v60  ;;  %v6379_v60 = vld [vmem:[#allocation9 + $0x104] ss:$24 sps:$4 sm:$0xff]  }
 0x61b   : > { %4578 = vtanh.f32 %v2570_v2  ;;  %v6384_v2 = vld [vmem:[#allocation9 + $0x100] ss:$24 sps:$4 sm:$0xff]  }
 0x624   : > { %v4577_v50 = vpop.eup %4576 }
 0x625   : > { %v4579_v32 = vpop.eup %4578  ;;  %v2575_v51 = vmul.f32 %v4577_v50, %v2573_v46  ;;  %v6395_v46 = vld [vmem:[#allocation9 + $0x164] ss:$24 sps:$4 sm:$0xff]   ;;  %v6400_v50 = vld [vmem:[#allocation9 + $0x160] ss:$24 sps:$4 sm:$0xff]  }
 0x626   : > { %v2576_v56 = vmul.f32 %v4579_v32, %v2574_v58  ;;  %v6403_v58 = vld [vmem:[#allocation9 + $0x194] ss:$24 sps:$4 sm:$0xff]   ;;  %v6408_v32 = vld [vmem:[#allocation9 + $0x190] ss:$24 sps:$4 sm:$0xff]  }
 0x627   : > { %v6332_v19 = vadd.f32 %v2577_v33, %v2575_v51  ;;  %v6352_v51 = vld [vmem:[#allocation9 + $0x40] ss:$24 sps:$4 sm:$0xff]   ;;  %v6411_v33 = vld [vmem:[#allocation9 + $0x1c4] ss:$24 sps:$4 sm:$0xff]  }
 0x628   : > { %v6334_v0 = vadd.f32 %v2578_v47, %v2576_v56  ;;  %7261 = vst [vmem:[#allocation36_spill] sm:$0xff] %v6411_v33  ;;  %v6416_v56 = vld [vmem:[#allocation9 + $0x1c0] ss:$24 sps:$4 sm:$0xff]   ;;  %v6419_v47 = vld [vmem:[#allocation9 + $0x1f4] ss:$24 sps:$4 sm:$0xff]  }
 0x629   : > { %v6340_v23 = vpack.c.bf16 %v6332_v19, %v6332_v19  ;;  %7262 = vst [vmem:[#allocation37_spill] sm:$0xff] %v6416_v56  ;;  %7263 = vst [vmem:[#allocation38_spill] sm:$0xff] %v6419_v47 }
 0x62a   : > { %v2588_v43 = vpack.c.bf16 %v6334_v0, %v6334_v0 }
 0x62c   : > { %2621 = vmatprep.mubr.bf16.mxu1 %v2588_v43  ;;  %2662 = vmatprep.mubr.bf16.mxu0 %v2588_v43 }
 0x62d   : > { %2622 = vmatmul.mubr.bf16.vlgmr.msra.gmra.mrb[16].mxu1 %v6340_v23  ;;  %2663 = vmatmul.mubr.bf16.vlgmr.msra.gmra.mrb[20].mxu0 %v6340_v23 }
 0x62e   : > { %2672 = vmatpush1.bf16.msra.mxu1 %v6344_v55  ;;  %2703 = vmatprep.mubr.bf16.mxu1 %v2588_v43  ;;  %v6424_v43 = vld [vmem:[#allocation9 + $0x1f0] ss:$24 sps:$4 sm:$0xff]  }
 0x62f   : > { %2673 = vmatprep.subr.bf16.mxu1 %v6347_v20  ;;  %2765 = vmatpush1.bf16.msra.mxu0 %v6119_v4  ;;  %7264 = vst [vmem:[#allocation39_spill] sm:$0xff] %v6424_v43 }
 0x630   : > { %2766 = vmatprep.subr.bf16.mxu0 %v6122_v29 }
 0x632   : > { %2674 = vmatpush1.bf16.msra.mxu1 %v6352_v51 }
 0x633   : > { %2675 = vmatprep.subr.bf16.mxu1 %v6355_v39  ;;  %2767 = vmatpush1.bf16.msra.mxu0 %v6127_v54 }
 0x634   : > { %2768 = vmatprep.subr.bf16.mxu0 %v6130_v28 }
 0x636   : > { %2676 = vmatpush1.bf16.msra.mxu1 %v6360_v57 }
 0x637   : > { %2677 = vmatprep.subr.bf16.mxu1 %v6363_v52  ;;  %2769 = vmatpush1.bf16.msra.mxu0 %v6135_v36 }
 0x638   : > { %2770 = vmatprep.subr.bf16.mxu0 %v6138_v59 }
 0x63a   : > { %2678 = vmatpush1.bf16.msra.mxu1 %v6368_v49 }
 0x63b   : > { %2679 = vmatprep.subr.bf16.mxu1 %v6371_v41  ;;  %2771 = vmatpush1.bf16.msra.mxu0 %v6143_v24 }
 0x63c   : > { %2772 = vmatprep.subr.bf16.mxu0 %v6146_v7 }
 0x63e   : > { %2680 = vmatpush1.bf16.msra.mxu1 %v6376_v48 }
 0x63f   : > { %2681 = vmatprep.subr.bf16.mxu1 %v6379_v60  ;;  %2773 = vmatpush1.bf16.msra.mxu0 %v6151_v27 }
 0x640   : > { %2774 = vmatprep.subr.bf16.mxu0 %v6154_v37 }
 0x642   : > { %2682 = vmatpush1.bf16.msra.mxu1 %v6384_v2 }
 0x643   : > { %2683 = vmatprep.subr.bf16.mxu1 %v6387_v38  ;;  %2775 = vmatpush1.bf16.msra.mxu0 %v6159_v44 }
 0x644   : > { %2776 = vmatprep.subr.bf16.mxu0 %v6162_v8 }
 0x646   : > { %2684 = vmatpush1.bf16.msra.mxu1 %v6392_v42 }
 0x647   : > { %2685 = vmatprep.subr.bf16.mxu1 %v6395_v46  ;;  %2777 = vmatpush1.bf16.msra.mxu0 %v6167_v10 }
 0x648   : > { %2778 = vmatprep.subr.bf16.mxu0 %v6170_v11 }
 0x64a   : > { %2686 = vmatpush1.bf16.msra.mxu1 %v6400_v50 }
 0x64b   : > { %2687 = vmatprep.subr.bf16.mxu1 %v6403_v58  ;;  %2779 = vmatpush1.bf16.msra.mxu0 %v6175_v12 }
 0x64c   : > { %2780 = vmatprep.subr.bf16.mxu0 %v6178_v13 }
 0x64e   : > { %2688 = vmatpush1.bf16.msra.mxu1 %v6408_v32 }
 0x64f   : > { %2689 = vmatprep.subr.bf16.mxu1 %v6411_v33  ;;  %2781 = vmatpush1.bf16.msra.mxu0 %v6183_v14  ;;  %v6427_v33 = vld [vmem:[#allocation9 + $0x224] ss:$24 sps:$4 sm:$0xff]  }
 0x650   : > { %2782 = vmatprep.subr.bf16.mxu0 %v6186_v15  ;;  %7265 = vst [vmem:[#allocation40_spill] sm:$0xff] %v6427_v33 }
 0x652   : > { %2690 = vmatpush1.bf16.msra.mxu1 %v6416_v56  ;;  %v6432_v56 = vld [vmem:[#allocation9 + $0x220] ss:$24 sps:$4 sm:$0xff]  }
 0x653   : > { %2691 = vmatprep.subr.bf16.mxu1 %v6419_v47  ;;  %2783 = vmatpush1.bf16.msra.mxu0 %v6191_v16  ;;  %7266 = vst [vmem:[#allocation41_spill] sm:$0xff] %v6432_v56  ;;  %v6435_v47 = vld [vmem:[#allocation9 + $0x254] ss:$24 sps:$4 sm:$0xff]  }
 0x654   : > { %2784 = vmatprep.subr.bf16.mxu0 %v6194_v17  ;;  %7267 = vst [vmem:[#allocation42_spill] sm:$0xff] %v6435_v47 }
 0x656   : > { %2692 = vmatpush1.bf16.msra.mxu1 %v6424_v43  ;;  %v6440_v43 = vld [vmem:[#allocation9 + $0x250] ss:$24 sps:$4 sm:$0xff]  }
 0x657   : > { %2693 = vmatprep.subr.bf16.mxu1 %v6427_v33  ;;  %2785 = vmatpush1.bf16.msra.mxu0 %v6199_v18  ;;  %7268 = vst [vmem:[#allocation43_spill] sm:$0xff] %v6440_v43  ;;  %v6443_v33 = vld [vmem:[#allocation9 + $0x284] ss:$24 sps:$4 sm:$0xff]  }
 0x658   : > { %2786 = vmatprep.subr.bf16.mxu0 %v6202_v21  ;;  %7269 = vst [vmem:[#allocation46_spill] sm:$0xff] %v6443_v33 }
 0x65a   : > { %2694 = vmatpush1.bf16.msra.mxu1 %v6432_v56  ;;  %v6448_v56 = vld [vmem:[#allocation9 + $0x280] ss:$24 sps:$4 sm:$0xff]  }
 0x65b   : > { %2695 = vmatprep.subr.bf16.mxu1 %v6435_v47  ;;  %2787 = vmatpush1.bf16.msra.mxu0 %v6207_v22  ;;  %7270 = vst [vmem:[#allocation47_spill] sm:$0xff] %v6448_v56  ;;  %v6451_v47 = vld [vmem:[#allocation9 + $0x2b4] ss:$24 sps:$4 sm:$0xff]  }
 0x65c   : > { %2788 = vmatprep.subr.bf16.mxu0 %v6210_v25  ;;  %7271 = vst [vmem:[#allocation50_spill] sm:$0xff] %v6451_v47 }
 0x65e   : > { %2696 = vmatpush1.bf16.msra.mxu1 %v6440_v43  ;;  %v6456_v43 = vld [vmem:[#allocation9 + $0x2b0] ss:$24 sps:$4 sm:$0xff]  }
 0x65f   : > { %2697 = vmatprep.subr.bf16.mxu1 %v6443_v33  ;;  %2789 = vmatpush1.bf16.msra.mxu0 %v6215_v26  ;;  %7272 = vst [vmem:[#allocation51_spill] sm:$0xff] %v6456_v43  ;;  %v6459_v33 = vld [vmem:[#allocation9 + $0x2e4] ss:$24 sps:$4 sm:$0xff]  }
 0x660   : > { %2790 = vmatprep.subr.bf16.mxu0 %v6218_v30  ;;  %7273 = vst [vmem:[#allocation54_spill] sm:$0xff] %v6459_v33 }
 0x662   : > { %2698 = vmatpush1.bf16.msra.mxu1 %v6448_v56  ;;  %v6464_v56 = vld [vmem:[#allocation9 + $0x2e0] ss:$24 sps:$4 sm:$0xff]  }
 0x663   : > { %2699 = vmatprep.subr.bf16.mxu1 %v6451_v47  ;;  %2791 = vmatpush1.bf16.msra.mxu0 %v6223_v31  ;;  %7274 = vst [vmem:[#allocation55_spill] sm:$0xff] %v6464_v56  ;;  %v6468_v31 = vld [vmem:[#allocation9 + $0x2d0] ss:$24 sps:$4 sm:$0xff]  }
 0x664   : > { %2792 = vmatprep.subr.bf16.mxu0 %v6226_v34  ;;  %7275 = vst [vmem:[#allocation58_spill] sm:$0xff] %v6468_v31  ;;  %v6471_v34 = vld [vmem:[#allocation9 + $0x14] ss:$24 sps:$4 sm:$0xff]  }
 0x665   : > { %7276 = vst [vmem:[#allocation77_spill] sm:$0xff] %v6471_v34 }
 0x666   : > { %2700 = vmatpush1.bf16.msra.mxu1 %v6456_v43  ;;  %v2583_v43 = vld [vmem:[#allocation2 + $0xa0] sm:$0xff] }
 0x667   : > { %2701 = vmatprep.subr.bf16.mxu1 %v6459_v33  ;;  %2793 = vmatpush1.bf16.msra.mxu0 %v6231_v3 }
 0x668   : > { %2794 = vmatprep.subr.bf16.mxu0 %v6234_v35 }
 0x66a   : > { %2702 = vmatpush1.bf16.msra.mxu1 %v6464_v56  ;;  %v2581_v56 = vld [vmem:[#allocation2 + $0x90] sm:$0xff] }
 0x66b   : > { %2805 = vmatprep.subr.bf16.mxu1 %v6238_v61  ;;  %2795 = vmatpush1.bf16.msra.mxu0 %v6468_v31  ;;  %v7277_v31 = vld [vmem:[#allocation72_spill] sm:$0xff] }
 0x66c   : > { %2846 = vmatprep.subr.bf16.mxu0 %v6471_v34  ;;  %v7278_v34 = vld [vmem:[#allocation73_spill] sm:$0xff] }
 0x66d   : > { %2704 = vmatmul.mubr.bf16.vlgmr.msra.gmra.mrb[20].mxu1 %v6340_v23  ;;  %v7279_v23 = vld [vmem:[#allocation74_spill] sm:$0xff] }
 0x66e   : > { %2806 = vmatpush1.bf16.msra.mxu1 %v6244_v53  ;;  %v7280_v53 = vld [vmem:[#allocation75_spill] sm:$0xff] }
 0x66f   : > { %2807 = vmatprep.subr.bf16.mxu1 %v6247_v1  ;;  %v7281_v1 = vld [vmem:[#allocation22_spill] sm:$0xff] }
 0x672   : > { %2808 = vmatpush1.bf16.msra.mxu1 %v6250_v6  ;;  %v7282_v6 = vld [vmem:[#allocation23_spill] sm:$0xff] }
 0x673   : > { %2809 = vmatprep.subr.bf16.mxu1 %v6253_v9  ;;  %v7283_v9 = vld [vmem:[#allocation24_spill] sm:$0xff] }
 0x676   : > { %2810 = vmatpush1.bf16.msra.mxu1 %v6256_v62  ;;  %v7284_v62 = vld [vmem:[#allocation25_spill] sm:$0xff] }
 0x677   : > { %2811 = vmatprep.subr.bf16.mxu1 %v6259_v63  ;;  %v7285_v63 = vld [vmem:[#allocation26_spill] sm:$0xff] }
 0x67a   : > { %2812 = vmatpush1.bf16.msra.mxu1 %v6262_v5  ;;  %v7286_v5 = vld [vmem:[#allocation27_spill] sm:$0xff] }
 0x67b   : > { %2813 = vmatprep.subr.bf16.mxu1 %v6265_v40  ;;  %v7287_v40 = vld [vmem:[#allocation28_spill] sm:$0xff] }
 0x67e   : > { %2814 = vmatpush1.bf16.msra.mxu1 %v7277_v31  ;;  %v7288_v31 = vld [vmem:[#allocation29_spill] sm:$0xff] }
 0x67f   : > { %2815 = vmatprep.subr.bf16.mxu1 %v7278_v34  ;;  %v7289_v34 = vld [vmem:[#allocation30_spill] sm:$0xff] }
 0x682   : > { %2816 = vmatpush1.bf16.msra.mxu1 %v7279_v23  ;;  %v7290_v23 = vld [vmem:[#allocation31_spill] sm:$0xff] }
 0x683   : > { %2817 = vmatprep.subr.bf16.mxu1 %v7280_v53  ;;  %v7291_v53 = vld [vmem:[#allocation32_spill] sm:$0xff] }
 0x686   : > { %2818 = vmatpush1.bf16.msra.mxu1 %v7281_v1  ;;  %v7292_v1 = vld [vmem:[#allocation33_spill] sm:$0xff] }
 0x687   : > { %2819 = vmatprep.subr.bf16.mxu1 %v7282_v6  ;;  %v7293_v6 = vld [vmem:[#allocation34_spill] sm:$0xff] }
 0x68a   : > { %2820 = vmatpush1.bf16.msra.mxu1 %v7283_v9  ;;  %v7294_v9 = vld [vmem:[#allocation35_spill] sm:$0xff] }
 0x68b   : > { %2821 = vmatprep.subr.bf16.mxu1 %v7284_v62  ;;  %v6501_v62 = vld [vmem:[#allocation9 + $0x278] ss:$24 sps:$4 sm:$0xff]  }
 0x68c   : > { %7295 = vst [vmem:[#allocation78_spill] sm:$0xff] %v6501_v62 }
 0x68e   : > { %2822 = vmatpush1.bf16.msra.mxu1 %v7285_v63 }
 0x68f   : > { %2823 = vmatprep.subr.bf16.mxu1 %v7286_v5  ;;  %v6504_v5 = vld [vmem:[#allocation9 + $0x2ac] ss:$24 sps:$4 sm:$0xff]  }
 0x690   : > { %7296 = vst [vmem:[#allocation79_spill] sm:$0xff] %v6504_v5 }
 0x692   : > { %2824 = vmatpush1.bf16.msra.mxu1 %v7287_v40 }
 0x693   : > { %2825 = vmatprep.subr.bf16.mxu1 %v7288_v31  ;;  %v6507_v31 = vld [vmem:[#allocation9 + $0x2a8] ss:$24 sps:$4 sm:$0xff]  }
 0x694   : > { %7297 = vst [vmem:[#allocation80_spill] sm:$0xff] %v6507_v31 }
 0x696   : > { %2826 = vmatpush1.bf16.msra.mxu1 %v7289_v34 }
 0x697   : > { %2827 = vmatprep.subr.bf16.mxu1 %v7290_v23  ;;  %v6510_v23 = vld [vmem:[#allocation9 + $0x2dc] ss:$24 sps:$4 sm:$0xff]  }
 0x698   : > { %7298 = vst [vmem:[#allocation81_spill] sm:$0xff] %v6510_v23 }
 0x69a   : > { %2828 = vmatpush1.bf16.msra.mxu1 %v7291_v53 }
 0x69b   : > { %2829 = vmatprep.subr.bf16.mxu1 %v7292_v1  ;;  %v6513_v1 = vld [vmem:[#allocation9 + $0x2d8] ss:$24 sps:$4 sm:$0xff]  }
 0x69c   : > { %7299 = vst [vmem:[#allocation82_spill] sm:$0xff] %v6513_v1 }
 0x69e   : > { %2830 = vmatpush1.bf16.msra.mxu1 %v7293_v6 }
 0x69f   : > { %2831 = vmatprep.subr.bf16.mxu1 %v7294_v9  ;;  %v7300_v9 = vld [vmem:[#allocation44_spill] sm:$0xff] }
 0x6a2   : > { %2832 = vmatpush1.bf16.msra.mxu1 %v6501_v62 }
 0x6a3   : > { %2833 = vmatprep.subr.bf16.mxu1 %v6504_v5 }
 0x6a6   : > { %2834 = vmatpush1.bf16.msra.mxu1 %v6507_v31  ;;  %v2582_v31 = vld [vmem:[#allocation2 + $0x98] sm:$0xff] }
 0x6a7   : > { %2835 = vmatprep.subr.bf16.mxu1 %v6510_v23 }
 0x6aa   : > { %2836 = vmatpush1.bf16.msra.mxu1 %v6513_v1  ;;  %v2584_v1 = vld [vmem:[#allocation2 + $0xa8] sm:$0xff] }
 0x6ab   : > { %2939 = vmatprep.subr.bf16.mxu1 %v7300_v9 }
 0x700   : > { %v2623_v6 = vpop.f32.mrb[16].mxu1  ;;  %v2664_v62 = vpop.f32.mrb[20].mxu0 }
 0x701   : > { %v2625_v53 = vpop.f32.mrb[17].mxu1  ;;  %v2666_v34 = vpop.f32.mrb[21].mxu0  ;;  %v2712_v35 = vadd.f32 %v2623_v6, %v2581_v56  ;;  %v2726_v47 = vadd.f32 %v2664_v62, %v2583_v43 }
 0x702   : > { %v2627_v40 = vpop.f32.mrb[18].mxu1  ;;  %v2668_v5 = vpop.f32.mrb[22].mxu0  ;;  %v2713_v3 = vadd.f32 %v2625_v53, %v2582_v31  ;;  %v2727_v9 = vadd.f32 %v2666_v34, %v2584_v1  ;;  %v2585_v34 = vld [vmem:[#allocation2 + $0xb0] sm:$0xff] }
 0x703   : > { %v2628_v63 = vpop.f32.mrb[19].mxu1  ;;  %v2669_v61 = vpop.f32.mrb[23].mxu0  ;;  %v3996_v33 = vmul.f32 -1.442695, %v2712_v35  ;;  %v3998_v30 = vmul.f32 -1.442695, %v2726_v47 }
 0x704   : > { %v3997_v23 = vmul.f32 -1.442695, %v2713_v3  ;;  %v3999_v26 = vmul.f32 -1.442695, %v2727_v9  ;;  %v7301_v5 = vld [vmem:[#allocation76_spill] sm:$0xff] }
 0x705   : > { %4580 = vpow2.f32 %v3996_v33 }
 0x706   : > { %4582 = vpow2.f32 %v3997_v23 }
 0x707   : > { %4584 = vpow2.f32 %v3998_v30 }
 0x708   : > { %4586 = vpow2.f32 %v3999_v26 }
 0x70f   : > { %v4581_v25 = vpop.eup %4580 }
 0x710   : > { %v4583_v22 = vpop.eup %4582  ;;  %v2720_v63 = vadd.f32 1.0, %v4581_v25  ;;  %v2586_v25 = vld [vmem:[#allocation2 + $0xb8] sm:$0xff] }
 0x711   : > { %v2721_v61 = vadd.f32 1.0, %v4583_v22  ;;  %v4585_v6 = vpop.eup %4584 }
 0x712   : > { %4588 = vrcp.f32 %v2720_v63  ;;  %v4587_v31 = vpop.eup %4586  ;;  %v2734_v35 = vadd.f32 1.0, %v4585_v6 }
 0x713   : > { %4590 = vrcp.f32 %v2721_v61  ;;  %v2735_v3 = vadd.f32 1.0, %v4587_v31 }
 0x714   : > { %4592 = vrcp.f32 %v2734_v35 }
 0x715   : > { %4594 = vrcp.f32 %v2735_v3 }
 0x71c   : > { %v4589_v62 = vpop.eup %4588 }
 0x71d   : > { %v4591_v56 = vpop.eup %4590 }
 0x71e   : > { %v4593_v23 = vpop.eup %4592 }
 0x71f   : > { %v4595_v63 = vpop.eup %4594  ;;  %v2748_v61 = vsub.f32 1.0, %v4593_v23 }
 0x720   : > { %v2749_v31 = vsub.f32 1.0, %v4595_v63  ;;  %v2753_v35 = vmul.f32 %v4595_v63, %v6334_v0  ;;  %v7303_v0 = vld [vmem:[#allocation37_spill] sm:$0xff] }
 0x721   : > { %v7314_v63 = vld [vmem:[#allocation57_spill] sm:$0xff] }
 0x740   : > { %v2705_v53 = vpop.f32.mrb[20].mxu1 }
 0x741   : > { %v2740_v40 = vadd.f32 %v2705_v53, %v7301_v5  ;;  %v2707_v33 = vpop.f32.mrb[21].mxu1 }
 0x742   : > { %v2741_v1 = vadd.f32 %v2707_v33, %v5986_v45  ;;  %v2709_v9 = vpop.f32.mrb[22].mxu1  ;;  %v2752_v33 = vmul.f32 %v4593_v23, %v6332_v19  ;;  %v7302_v19 = vld [vmem:[#allocation36_spill] sm:$0xff] }
 0x743   : > { %v2742_v26 = vmul.f32 %v4589_v62, %v2740_v40  ;;  %v2710_v22 = vpop.f32.mrb[23].mxu1  ;;  %v7313_v23 = vld [vmem:[#allocation56_spill] sm:$0xff] }
 0x744   : > { %v2743_v30 = vmul.f32 %v4591_v56, %v2741_v1  ;;  %v7305_v1 = vld [vmem:[#allocation39_spill] sm:$0xff]  ;;  %v7306_v56 = vld [vmem:[#allocation40_spill] sm:$0xff] }
 0x745   : > { %v2744_v47 = vadd.f32 %v2742_v26, %v2585_v34  ;;  %v7307_v26 = vld [vmem:[#allocation41_spill] sm:$0xff]  ;;  %v7309_v22 = vld [vmem:[#allocation52_spill] sm:$0xff] }
 0x746   : > { %v2745_v43 = vadd.f32 %v2743_v30, %v2586_v25  ;;  %v7308_v25 = vld [vmem:[#allocation42_spill] sm:$0xff]  ;;  %v7310_v30 = vld [vmem:[#allocation53_spill] sm:$0xff] }
 0x747   : > { %4596 = vtanh.f32 %v2744_v47  ;;  %v7311_v47 = vld [vmem:[#allocation43_spill] sm:$0xff] }
 0x748   : > { %4598 = vtanh.f32 %v2745_v43  ;;  %v7312_v43 = vld [vmem:[#allocation46_spill] sm:$0xff] }
 0x751   : > { %v4597_v6 = vpop.eup %4596 }
 0x752   : > { %v4599_v53 = vpop.eup %4598  ;;  %v2750_v5 = vmul.f32 %v4597_v6, %v2748_v61  ;;  %v7315_v61 = vld [vmem:[#allocation47_spill] sm:$0xff]  ;;  %v7316_v6 = vld [vmem:[#allocation50_spill] sm:$0xff] }
 0x753   : > { %v2751_v9 = vmul.f32 %v4599_v53, %v2749_v31  ;;  %v7317_v31 = vld [vmem:[#allocation59_spill] sm:$0xff]  ;;  %v7318_v53 = vld [vmem:[#allocation60_spill] sm:$0xff] }
 0x754   : > { %v6521_v40 = vadd.f32 %v2752_v33, %v2750_v5  ;;  %v7304_v5 = vld [vmem:[#allocation38_spill] sm:$0xff]  ;;  %v7319_v33 = vld [vmem:[#allocation51_spill] sm:$0xff] }
 0x755   : > { %v6523_v3 = vadd.f32 %v2753_v35, %v2751_v9  ;;  %v7320_v9 = vld [vmem:[#allocation54_spill] sm:$0xff]  ;;  %v7321_v35 = vld [vmem:[#allocation61_spill] sm:$0xff] }
 0x756   : > { %v6529_v34 = vpack.c.bf16 %v6521_v40, %v6521_v40 }
 0x757   : > { %v2763_v62 = vpack.c.bf16 %v6523_v3, %v6523_v3 }
 0x759   : > { %2796 = vmatprep.mubr.bf16.mxu0 %v2763_v62  ;;  %2837 = vmatprep.mubr.bf16.mxu1 %v2763_v62 }
 0x75a   : > { %2797 = vmatmul.mubr.bf16.vlgmr.msra.gmra.mrb[24].mxu0 %v6529_v34  ;;  %2838 = vmatmul.mubr.bf16.vlgmr.msra.gmra.mrb[24].mxu1 %v6529_v34 }
 0x75b   : > { %2847 = vmatpush1.bf16.msra.mxu0 %v6344_v55  ;;  %2878 = vmatprep.mubr.bf16.mxu0 %v2763_v62  ;;  %v7322_v62 = vld [vmem:[#allocation62_spill] sm:$0xff] }
 0x75c   : > { %2848 = vmatprep.subr.bf16.mxu0 %v6347_v20  ;;  %2940 = vmatpush1.bf16.msra.mxu1 %v6119_v4 }
 0x75d   : > { %2941 = vmatprep.subr.bf16.mxu1 %v6122_v29 }
 0x75f   : > { %2849 = vmatpush1.bf16.msra.mxu0 %v6352_v51 }
 0x760   : > { %2850 = vmatprep.subr.bf16.mxu0 %v6355_v39  ;;  %2942 = vmatpush1.bf16.msra.mxu1 %v6127_v54 }
 0x761   : > { %2943 = vmatprep.subr.bf16.mxu1 %v6130_v28 }
 0x763   : > { %2851 = vmatpush1.bf16.msra.mxu0 %v6360_v57 }
 0x764   : > { %2852 = vmatprep.subr.bf16.mxu0 %v6363_v52  ;;  %2944 = vmatpush1.bf16.msra.mxu1 %v6135_v36 }
 0x765   : > { %2945 = vmatprep.subr.bf16.mxu1 %v6138_v59 }
 0x767   : > { %2853 = vmatpush1.bf16.msra.mxu0 %v6368_v49 }
 0x768   : > { %2854 = vmatprep.subr.bf16.mxu0 %v6371_v41  ;;  %2946 = vmatpush1.bf16.msra.mxu1 %v6143_v24 }
 0x769   : > { %2947 = vmatprep.subr.bf16.mxu1 %v6146_v7 }
 0x76b   : > { %2855 = vmatpush1.bf16.msra.mxu0 %v6376_v48 }
 0x76c   : > { %2856 = vmatprep.subr.bf16.mxu0 %v6379_v60  ;;  %2948 = vmatpush1.bf16.msra.mxu1 %v6151_v27 }
 0x76d   : > { %2949 = vmatprep.subr.bf16.mxu1 %v6154_v37 }
 0x76f   : > { %2857 = vmatpush1.bf16.msra.mxu0 %v6384_v2 }
 0x770   : > { %2858 = vmatprep.subr.bf16.mxu0 %v6387_v38  ;;  %2950 = vmatpush1.bf16.msra.mxu1 %v6159_v44 }
 0x771   : > { %2951 = vmatprep.subr.bf16.mxu1 %v6162_v8 }
 0x773   : > { %2859 = vmatpush1.bf16.msra.mxu0 %v6392_v42 }
 0x774   : > { %2860 = vmatprep.subr.bf16.mxu0 %v6395_v46  ;;  %2952 = vmatpush1.bf16.msra.mxu1 %v6167_v10 }
 0x775   : > { %2953 = vmatprep.subr.bf16.mxu1 %v6170_v11 }
 0x777   : > { %2861 = vmatpush1.bf16.msra.mxu0 %v6400_v50 }
 0x778   : > { %2862 = vmatprep.subr.bf16.mxu0 %v6403_v58  ;;  %2954 = vmatpush1.bf16.msra.mxu1 %v6175_v12 }
 0x779   : > { %2955 = vmatprep.subr.bf16.mxu1 %v6178_v13 }
 0x77b   : > { %2863 = vmatpush1.bf16.msra.mxu0 %v6408_v32 }
 0x77c   : > { %2864 = vmatprep.subr.bf16.mxu0 %v7302_v19  ;;  %2956 = vmatpush1.bf16.msra.mxu1 %v6183_v14 }
 0x77d   : > { %2957 = vmatprep.subr.bf16.mxu1 %v6186_v15 }
 0x77f   : > { %2865 = vmatpush1.bf16.msra.mxu0 %v7303_v0 }
 0x780   : > { %2866 = vmatprep.subr.bf16.mxu0 %v7304_v5  ;;  %2958 = vmatpush1.bf16.msra.mxu1 %v6191_v16 }
 0x781   : > { %2959 = vmatprep.subr.bf16.mxu1 %v6194_v17 }
 0x783   : > { %2867 = vmatpush1.bf16.msra.mxu0 %v7305_v1 }
 0x784   : > { %2868 = vmatprep.subr.bf16.mxu0 %v7306_v56  ;;  %2960 = vmatpush1.bf16.msra.mxu1 %v6199_v18 }
 0x785   : > { %2961 = vmatprep.subr.bf16.mxu1 %v6202_v21 }
 0x787   : > { %2869 = vmatpush1.bf16.msra.mxu0 %v7307_v26 }
 0x788   : > { %2870 = vmatprep.subr.bf16.mxu0 %v7308_v25  ;;  %2962 = vmatpush1.bf16.msra.mxu1 %v7309_v22  ;;  %v2756_v22 = vld [vmem:[#allocation2 + $0xc0] sm:$0xff] }
 0x789   : > { %2963 = vmatprep.subr.bf16.mxu1 %v7310_v30 }
 0x78b   : > { %2871 = vmatpush1.bf16.msra.mxu0 %v7311_v47 }
 0x78c   : > { %2872 = vmatprep.subr.bf16.mxu0 %v7312_v43  ;;  %2964 = vmatpush1.bf16.msra.mxu1 %v7313_v23  ;;  %v7323_v43 = vld [vmem:[#allocation55_spill] sm:$0xff] }
 0x78d   : > { %2965 = vmatprep.subr.bf16.mxu1 %v7314_v63  ;;  %v7324_v23 = vld [vmem:[#allocation63_spill] sm:$0xff]  ;;  %v7325_v63 = vld [vmem:[#allocation58_spill] sm:$0xff] }
 0x78f   : > { %2873 = vmatpush1.bf16.msra.mxu0 %v7315_v61  ;;  %v7326_v61 = vld [vmem:[#allocation77_spill] sm:$0xff] }
 0x790   : > { %2874 = vmatprep.subr.bf16.mxu0 %v7316_v6  ;;  %2966 = vmatpush1.bf16.msra.mxu1 %v7317_v31  ;;  %v7327_v31 = vld [vmem:[#allocation64_spill] sm:$0xff] }
 0x791   : > { %2967 = vmatprep.subr.bf16.mxu1 %v7318_v53  ;;  %v7328_v53 = vld [vmem:[#allocation65_spill] sm:$0xff] }
 0x793   : > { %2875 = vmatpush1.bf16.msra.mxu0 %v7319_v33  ;;  %v7329_v33 = vld [vmem:[#allocation66_spill] sm:$0xff] }
 0x794   : > { %2876 = vmatprep.subr.bf16.mxu0 %v7320_v9  ;;  %2968 = vmatpush1.bf16.msra.mxu1 %v7321_v35  ;;  %v7330_v9 = vld [vmem:[#allocation67_spill] sm:$0xff]  ;;  %v7331_v35 = vld [vmem:[#allocation68_spill] sm:$0xff] }
 0x795   : > { %2969 = vmatprep.subr.bf16.mxu1 %v7322_v62  ;;  %v7332_v62 = vld [vmem:[#allocation69_spill] sm:$0xff] }
 0x797   : > { %2877 = vmatpush1.bf16.msra.mxu0 %v7323_v43  ;;  %v7333_v43 = vld [vmem:[#allocation70_spill] sm:$0xff] }
 0x798   : > { %2980 = vmatprep.subr.bf16.mxu0 %v7324_v23  ;;  %2970 = vmatpush1.bf16.msra.mxu1 %v7325_v63  ;;  %v7334_v23 = vld [vmem:[#allocation71_spill] sm:$0xff]  ;;  %v7335_v63 = vld [vmem:[#allocation72_spill] sm:$0xff] }
 0x799   : > { %3021 = vmatprep.subr.bf16.mxu1 %v7326_v61  ;;  %v7336_v61 = vld [vmem:[#allocation73_spill] sm:$0xff] }
 0x79a   : > { %2879 = vmatmul.mubr.bf16.vlgmr.msra.gmra.mrb[28].mxu0 %v6529_v34  ;;  %v7337_v34 = vld [vmem:[#allocation74_spill] sm:$0xff] }
 0x79b   : > { %2981 = vmatpush1.bf16.msra.mxu0 %v7327_v31  ;;  %v7338_v31 = vld [vmem:[#allocation75_spill] sm:$0xff] }
 0x79c   : > { %2982 = vmatprep.subr.bf16.mxu0 %v7328_v53  ;;  %v7339_v53 = vld [vmem:[#allocation22_spill] sm:$0xff] }
 0x79f   : > { %2983 = vmatpush1.bf16.msra.mxu0 %v7329_v33  ;;  %v7340_v33 = vld [vmem:[#allocation23_spill] sm:$0xff] }
 0x7a0   : > { %2984 = vmatprep.subr.bf16.mxu0 %v7330_v9  ;;  %v7341_v9 = vld [vmem:[#allocation24_spill] sm:$0xff] }
 0x7a3   : > { %2985 = vmatpush1.bf16.msra.mxu0 %v7331_v35  ;;  %v7342_v35 = vld [vmem:[#allocation25_spill] sm:$0xff] }
 0x7a4   : > { %2986 = vmatprep.subr.bf16.mxu0 %v7332_v62  ;;  %v7343_v62 = vld [vmem:[#allocation26_spill] sm:$0xff] }
 0x7a7   : > { %2987 = vmatpush1.bf16.msra.mxu0 %v7333_v43  ;;  %v7344_v43 = vld [vmem:[#allocation27_spill] sm:$0xff] }
 0x7a8   : > { %2988 = vmatprep.subr.bf16.mxu0 %v7334_v23  ;;  %v7345_v23 = vld [vmem:[#allocation28_spill] sm:$0xff] }
 0x7ab   : > { %2989 = vmatpush1.bf16.msra.mxu0 %v7335_v63  ;;  %v7346_v63 = vld [vmem:[#allocation29_spill] sm:$0xff] }
 0x7ac   : > { %2990 = vmatprep.subr.bf16.mxu0 %v7336_v61  ;;  %v7347_v61 = vld [vmem:[#allocation30_spill] sm:$0xff] }
 0x7af   : > { %2991 = vmatpush1.bf16.msra.mxu0 %v7337_v34  ;;  %v7348_v34 = vld [vmem:[#allocation31_spill] sm:$0xff] }
 0x7b0   : > { %2992 = vmatprep.subr.bf16.mxu0 %v7338_v31  ;;  %v7349_v31 = vld [vmem:[#allocation32_spill] sm:$0xff] }
 0x7b3   : > { %2993 = vmatpush1.bf16.msra.mxu0 %v7339_v53  ;;  %v7350_v53 = vld [vmem:[#allocation33_spill] sm:$0xff] }
 0x7b4   : > { %2994 = vmatprep.subr.bf16.mxu0 %v7340_v33  ;;  %v7351_v33 = vld [vmem:[#allocation34_spill] sm:$0xff] }
 0x7b7   : > { %2995 = vmatpush1.bf16.msra.mxu0 %v7341_v9  ;;  %v7352_v9 = vld [vmem:[#allocation35_spill] sm:$0xff] }
 0x7b8   : > { %2996 = vmatprep.subr.bf16.mxu0 %v7342_v35  ;;  %v7353_v35 = vld [vmem:[#allocation78_spill] sm:$0xff] }
 0x7bb   : > { %2997 = vmatpush1.bf16.msra.mxu0 %v7343_v62  ;;  %v7354_v62 = vld [vmem:[#allocation79_spill] sm:$0xff] }
 0x7bc   : > { %2998 = vmatprep.subr.bf16.mxu0 %v7344_v43  ;;  %v7355_v43 = vld [vmem:[#allocation80_spill] sm:$0xff] }
 0x7bf   : > { %2999 = vmatpush1.bf16.msra.mxu0 %v7345_v23  ;;  %v7356_v23 = vld [vmem:[#allocation81_spill] sm:$0xff] }
 0x7c0   : > { %3000 = vmatprep.subr.bf16.mxu0 %v7346_v63  ;;  %v7357_v63 = vld [vmem:[#allocation82_spill] sm:$0xff] }
 0x7c3   : > { %3001 = vmatpush1.bf16.msra.mxu0 %v7347_v61  ;;  %v7358_v61 = vld [vmem:[#allocation44_spill] sm:$0xff] }
 0x7c4   : > { %3002 = vmatprep.subr.bf16.mxu0 %v7348_v34 }
 0x7c7   : > { %3003 = vmatpush1.bf16.msra.mxu0 %v7349_v31 }
 0x7c8   : > { %3004 = vmatprep.subr.bf16.mxu0 %v7350_v53 }
 0x7cb   : > { %3005 = vmatpush1.bf16.msra.mxu0 %v7351_v33 }
 0x7cc   : > { %3006 = vmatprep.subr.bf16.mxu0 %v7352_v9 }
 0x7cf   : > { %3007 = vmatpush1.bf16.msra.mxu0 %v7353_v35  ;;  %v2757_v35 = vld [vmem:[#allocation2 + $0xc8] sm:$0xff] }
 0x7d0   : > { %3008 = vmatprep.subr.bf16.mxu0 %v7354_v62 }
 0x7d3   : > { %3009 = vmatpush1.bf16.msra.mxu0 %v7355_v43 }
 0x7d4   : > { %3010 = vmatprep.subr.bf16.mxu0 %v7356_v23  ;;  %v2758_v23 = vld [vmem:[#allocation2 + $0xd0] sm:$0xff] }
 0x7d7   : > { %3011 = vmatpush1.bf16.msra.mxu0 %v7357_v63  ;;  %v2759_v63 = vld [vmem:[#allocation2 + $0xd8] sm:$0xff] }
 0x7d8   : > { %3114 = vmatprep.subr.bf16.mxu0 %v7358_v61 }
 0x82d   : > { %v2798_v34 = vpop.f32.mrb[24].mxu0  ;;  %v2839_v31 = vpop.f32.mrb[24].mxu1 }
 0x82e   : > { %v2800_v6 = vpop.f32.mrb[25].mxu0  ;;  %v2841_v53 = vpop.f32.mrb[25].mxu1  ;;  %v2887_v25 = vadd.f32 %v2798_v34, %v2756_v22  ;;  %v2901_v21 = vadd.f32 %v2839_v31, %v2758_v23 }
 0x82f   : > { %v2802_v47 = vpop.f32.mrb[26].mxu0  ;;  %v2843_v33 = vpop.f32.mrb[26].mxu1  ;;  %v2888_v62 = vadd.f32 %v2800_v6, %v2757_v35  ;;  %v2902_v61 = vadd.f32 %v2841_v53, %v2759_v63  ;;  %v2760_v63 = vld [vmem:[#allocation2 + $0xe0] sm:$0xff] }
 0x830   : > { %v2803_v30 = vpop.f32.mrb[27].mxu0  ;;  %v2844_v9 = vpop.f32.mrb[27].mxu1  ;;  %v4000_v26 = vmul.f32 -1.442695, %v2887_v25  ;;  %v4002_v18 = vmul.f32 -1.442695, %v2901_v21 }
 0x831   : > { %v4001_v43 = vmul.f32 -1.442695, %v2888_v62  ;;  %v4003_v56 = vmul.f32 -1.442695, %v2902_v61  ;;  %v7359_v9 = vld [vmem:[#allocation76_spill] sm:$0xff] }
 0x832   : > { %4600 = vpow2.f32 %v4000_v26 }
 0x833   : > { %4602 = vpow2.f32 %v4001_v43 }
 0x834   : > { %4604 = vpow2.f32 %v4002_v18 }
 0x835   : > { %4606 = vpow2.f32 %v4003_v56 }
 0x83c   : > { %v4601_v1 = vpop.eup %4600 }
 0x83d   : > { %v4603_v17 = vpop.eup %4602  ;;  %v2895_v30 = vadd.f32 1.0, %v4601_v1  ;;  %v2761_v1 = vld [vmem:[#allocation2 + $0xe8] sm:$0xff] }
 0x83e   : > { %v2896_v47 = vadd.f32 1.0, %v4603_v17  ;;  %v4605_v22 = vpop.eup %4604 }
 0x83f   : > { %4608 = vrcp.f32 %v2895_v30  ;;  %v4607_v6 = vpop.eup %4606  ;;  %v2909_v25 = vadd.f32 1.0, %v4605_v22 }
 0x840   : > { %4610 = vrcp.f32 %v2896_v47  ;;  %v2910_v33 = vadd.f32 1.0, %v4607_v6 }
 0x841   : > { %4612 = vrcp.f32 %v2909_v25 }
 0x842   : > { %4614 = vrcp.f32 %v2910_v33 }
 0x849   : > { %v4609_v23 = vpop.eup %4608 }
 0x84a   : > { %v4611_v53 = vpop.eup %4610 }
 0x84b   : > { %v4613_v61 = vpop.eup %4612 }
 0x84c   : > { %v4615_v30 = vpop.eup %4614  ;;  %v2923_v47 = vsub.f32 1.0, %v4613_v61 }
 0x84d   : > { %v2924_v6 = vsub.f32 1.0, %v4615_v30  ;;  %v2928_v25 = vmul.f32 %v4615_v30, %v6523_v3  ;;  %v7380_v3 = vld [vmem:[#allocation62_spill] sm:$0xff] }
 0x84e   : > { %v7391_v30 = vld [vmem:[#allocation70_spill] sm:$0xff] }
 0x86d   : > { %v2880_v26 = vpop.f32.mrb[28].mxu0 }
 0x86e   : > { %v2915_v43 = vadd.f32 %v2880_v26, %v7359_v9  ;;  %v2882_v35 = vpop.f32.mrb[29].mxu0 }
 0x86f   : > { %v2916_v21 = vadd.f32 %v2882_v35, %v5986_v45  ;;  %v2884_v31 = vpop.f32.mrb[30].mxu0  ;;  %v2927_v35 = vmul.f32 %v4613_v61, %v6521_v40  ;;  %v7379_v40 = vld [vmem:[#allocation61_spill] sm:$0xff] }
 0x870   : > { %v2917_v18 = vmul.f32 %v4609_v23, %v2915_v43  ;;  %v2885_v17 = vpop.f32.mrb[31].mxu0  ;;  %v7390_v61 = vld [vmem:[#allocation69_spill] sm:$0xff] }
 0x871   : > { %v2918_v56 = vmul.f32 %v4611_v53, %v2916_v21  ;;  %v7382_v21 = vld [vmem:[#allocation63_spill] sm:$0xff]  ;;  %v7383_v53 = vld [vmem:[#allocation58_spill] sm:$0xff]  ;;  %v7386_v17 = vld [vmem:[#allocation65_spill] sm:$0xff] }
 0x872   : > { %v2919_v62 = vadd.f32 %v2917_v18, %v2760_v63  ;;  %v7384_v18 = vld [vmem:[#allocation77_spill] sm:$0xff] }
 0x873   : > { %v2920_v34 = vadd.f32 %v2918_v56, %v2761_v1  ;;  %v7385_v1 = vld [vmem:[#allocation64_spill] sm:$0xff]  ;;  %v7387_v56 = vld [vmem:[#allocation66_spill] sm:$0xff] }
 0x874   : > { %4616 = vtanh.f32 %v2919_v62  ;;  %v7388_v62 = vld [vmem:[#allocation67_spill] sm:$0xff] }
 0x875   : > { %4618 = vtanh.f32 %v2920_v34  ;;  %v7389_v34 = vld [vmem:[#allocation68_spill] sm:$0xff] }
 0x87e   : > { %v4617_v22 = vpop.eup %4616 }
 0x87f   : > { %v4619_v26 = vpop.eup %4618  ;;  %v2925_v9 = vmul.f32 %v4617_v22, %v2923_v47  ;;  %v7392_v47 = vld [vmem:[#allocation71_spill] sm:$0xff]  ;;  %v7393_v22 = vld [vmem:[#allocation72_spill] sm:$0xff] }
 0x880   : > { %v2926_v31 = vmul.f32 %v4619_v26, %v2924_v6  ;;  %v7394_v6 = vld [vmem:[#allocation73_spill] sm:$0xff]  ;;  %v7395_v26 = vld [vmem:[#allocation74_spill] sm:$0xff] }
 0x881   : > { %v6634_v43 = vadd.f32 %v2927_v35, %v2925_v9  ;;  %v7381_v9 = vld [vmem:[#allocation55_spill] sm:$0xff] }
 0x882   : > { %v6636_v33 = vadd.f32 %v2928_v25, %v2926_v31  ;;  %v7396_v35 = vld [vmem:[#allocation75_spill] sm:$0xff]  ;;  %v7397_v31 = vld [vmem:[#allocation22_spill] sm:$0xff] }
 0x883   : > { %v6642_v63 = vpack.c.bf16 %v6634_v43, %v6634_v43  ;;  %v7398_v25 = vld [vmem:[#allocation23_spill] sm:$0xff] }
 0x884   : > { %v2938_v23 = vpack.c.bf16 %v6636_v33, %v6636_v33 }
 0x886   : > { %2971 = vmatprep.mubr.bf16.mxu1 %v2938_v23  ;;  %3012 = vmatprep.mubr.bf16.mxu0 %v2938_v23 }
 0x887   : > { %2972 = vmatmul.mubr.bf16.vlgmr.msra.gmra.mrb[28].mxu1 %v6642_v63  ;;  %3013 = vmatmul.mubr.bf16.vlgmr.msra.gmra.mrb[32].mxu0 %v6642_v63 }
 0x888   : > { %3022 = vmatpush1.bf16.msra.mxu1 %v6344_v55  ;;  %3053 = vmatprep.mubr.bf16.mxu1 %v2938_v23  ;;  %v7399_v23 = vld [vmem:[#allocation24_spill] sm:$0xff] }
 0x889   : > { %3023 = vmatprep.subr.bf16.mxu1 %v6347_v20  ;;  %3115 = vmatpush1.bf16.msra.mxu0 %v6119_v4  ;;  %v7360_v4 = vld [vmem:[#allocation45_spill] sm:$0xff] }
 0x88a   : > { %3116 = vmatprep.subr.bf16.mxu0 %v6122_v29  ;;  %v7361_v29 = vld [vmem:[#allocation39_spill] sm:$0xff] }
 0x88c   : > { %3024 = vmatpush1.bf16.msra.mxu1 %v6352_v51 }
 0x88d   : > { %3025 = vmatprep.subr.bf16.mxu1 %v6355_v39  ;;  %3117 = vmatpush1.bf16.msra.mxu0 %v6127_v54  ;;  %v7362_v54 = vld [vmem:[#allocation40_spill] sm:$0xff] }
 0x88e   : > { %3118 = vmatprep.subr.bf16.mxu0 %v6130_v28  ;;  %v7363_v28 = vld [vmem:[#allocation48_spill] sm:$0xff] }
 0x890   : > { %3026 = vmatpush1.bf16.msra.mxu1 %v6360_v57 }
 0x891   : > { %3027 = vmatprep.subr.bf16.mxu1 %v6363_v52  ;;  %3119 = vmatpush1.bf16.msra.mxu0 %v6135_v36  ;;  %v7364_v36 = vld [vmem:[#allocation49_spill] sm:$0xff] }
 0x892   : > { %3120 = vmatprep.subr.bf16.mxu0 %v6138_v59  ;;  %v7365_v59 = vld [vmem:[#allocation41_spill] sm:$0xff] }
 0x894   : > { %3028 = vmatpush1.bf16.msra.mxu1 %v6368_v49 }
 0x895   : > { %3029 = vmatprep.subr.bf16.mxu1 %v6371_v41  ;;  %3121 = vmatpush1.bf16.msra.mxu0 %v6143_v24  ;;  %v7366_v24 = vld [vmem:[#allocation42_spill] sm:$0xff] }
 0x896   : > { %3122 = vmatprep.subr.bf16.mxu0 %v6146_v7  ;;  %v7367_v7 = vld [vmem:[#allocation52_spill] sm:$0xff] }
 0x898   : > { %3030 = vmatpush1.bf16.msra.mxu1 %v6376_v48 }
 0x899   : > { %3031 = vmatprep.subr.bf16.mxu1 %v6379_v60  ;;  %3123 = vmatpush1.bf16.msra.mxu0 %v6151_v27  ;;  %v7368_v27 = vld [vmem:[#allocation53_spill] sm:$0xff] }
 0x89a   : > { %3124 = vmatprep.subr.bf16.mxu0 %v6154_v37  ;;  %v7369_v37 = vld [vmem:[#allocation43_spill] sm:$0xff] }
 0x89c   : > { %3032 = vmatpush1.bf16.msra.mxu1 %v6384_v2 }
 0x89d   : > { %3033 = vmatprep.subr.bf16.mxu1 %v6387_v38  ;;  %3125 = vmatpush1.bf16.msra.mxu0 %v6159_v44  ;;  %v7370_v44 = vld [vmem:[#allocation46_spill] sm:$0xff] }
 0x89e   : > { %3126 = vmatprep.subr.bf16.mxu0 %v6162_v8  ;;  %v7371_v8 = vld [vmem:[#allocation56_spill] sm:$0xff] }
 0x8a0   : > { %3034 = vmatpush1.bf16.msra.mxu1 %v6392_v42 }
 0x8a1   : > { %3035 = vmatprep.subr.bf16.mxu1 %v6395_v46  ;;  %3127 = vmatpush1.bf16.msra.mxu0 %v6167_v10  ;;  %v7372_v10 = vld [vmem:[#allocation57_spill] sm:$0xff] }
 0x8a2   : > { %3128 = vmatprep.subr.bf16.mxu0 %v6170_v11  ;;  %v7373_v11 = vld [vmem:[#allocation47_spill] sm:$0xff] }
 0x8a4   : > { %3036 = vmatpush1.bf16.msra.mxu1 %v6400_v50 }
 0x8a5   : > { %3037 = vmatprep.subr.bf16.mxu1 %v6403_v58  ;;  %3129 = vmatpush1.bf16.msra.mxu0 %v6175_v12  ;;  %v7374_v12 = vld [vmem:[#allocation50_spill] sm:$0xff] }
 0x8a6   : > { %3130 = vmatprep.subr.bf16.mxu0 %v6178_v13  ;;  %v7375_v13 = vld [vmem:[#allocation59_spill] sm:$0xff] }
 0x8a8   : > { %3038 = vmatpush1.bf16.msra.mxu1 %v6408_v32 }
 0x8a9   : > { %3039 = vmatprep.subr.bf16.mxu1 %v7302_v19  ;;  %3131 = vmatpush1.bf16.msra.mxu0 %v6183_v14  ;;  %v7376_v14 = vld [vmem:[#allocation60_spill] sm:$0xff] }
 0x8aa   : > { %3132 = vmatprep.subr.bf16.mxu0 %v6186_v15  ;;  %v7377_v15 = vld [vmem:[#allocation51_spill] sm:$0xff] }
 0x8ac   : > { %3040 = vmatpush1.bf16.msra.mxu1 %v7303_v0 }
 0x8ad   : > { %3041 = vmatprep.subr.bf16.mxu1 %v7304_v5  ;;  %3133 = vmatpush1.bf16.msra.mxu0 %v6191_v16  ;;  %v7378_v16 = vld [vmem:[#allocation54_spill] sm:$0xff] }
 0x8ae   : > { %3134 = vmatprep.subr.bf16.mxu0 %v7360_v4  ;;  %v7401_v4 = vld [vmem:[#allocation26_spill] sm:$0xff] }
 0x8b0   : > { %3042 = vmatpush1.bf16.msra.mxu1 %v7361_v29 }
 0x8b1   : > { %3043 = vmatprep.subr.bf16.mxu1 %v7362_v54  ;;  %3135 = vmatpush1.bf16.msra.mxu0 %v7363_v28  ;;  %v7402_v28 = vld [vmem:[#allocation27_spill] sm:$0xff] }
 0x8b2   : > { %3136 = vmatprep.subr.bf16.mxu0 %v7364_v36  ;;  %v7403_v36 = vld [vmem:[#allocation28_spill] sm:$0xff] }
 0x8b4   : > { %3044 = vmatpush1.bf16.msra.mxu1 %v7365_v59 }
 0x8b5   : > { %3045 = vmatprep.subr.bf16.mxu1 %v7366_v24  ;;  %3137 = vmatpush1.bf16.msra.mxu0 %v7367_v7  ;;  %v7404_v7 = vld [vmem:[#allocation29_spill] sm:$0xff] }
 0x8b6   : > { %3138 = vmatprep.subr.bf16.mxu0 %v7368_v27  ;;  %v7405_v27 = vld [vmem:[#allocation30_spill] sm:$0xff] }
 0x8b8   : > { %3046 = vmatpush1.bf16.msra.mxu1 %v7369_v37 }
 0x8b9   : > { %3047 = vmatprep.subr.bf16.mxu1 %v7370_v44  ;;  %3139 = vmatpush1.bf16.msra.mxu0 %v7371_v8  ;;  %v7406_v8 = vld [vmem:[#allocation31_spill] sm:$0xff] }
 0x8ba   : > { %3140 = vmatprep.subr.bf16.mxu0 %v7372_v10  ;;  %v7407_v10 = vld [vmem:[#allocation32_spill] sm:$0xff] }
 0x8bc   : > { %3048 = vmatpush1.bf16.msra.mxu1 %v7373_v11 }
 0x8bd   : > { %3049 = vmatprep.subr.bf16.mxu1 %v7374_v12  ;;  %3141 = vmatpush1.bf16.msra.mxu0 %v7375_v13  ;;  %v7408_v13 = vld [vmem:[#allocation33_spill] sm:$0xff] }
 0x8be   : > { %3142 = vmatprep.subr.bf16.mxu0 %v7376_v14  ;;  %v7409_v14 = vld [vmem:[#allocation34_spill] sm:$0xff] }
 0x8c0   : > { %3050 = vmatpush1.bf16.msra.mxu1 %v7377_v15 }
 0x8c1   : > { %3051 = vmatprep.subr.bf16.mxu1 %v7378_v16  ;;  %3143 = vmatpush1.bf16.msra.mxu0 %v7379_v40  ;;  %v7410_v40 = vld [vmem:[#allocation35_spill] sm:$0xff] }
 0x8c2   : > { %3144 = vmatprep.subr.bf16.mxu0 %v7380_v3  ;;  %v7411_v3 = vld [vmem:[#allocation78_spill] sm:$0xff] }
 0x8c4   : > { %3052 = vmatpush1.bf16.msra.mxu1 %v7381_v9 }
 0x8c5   : > { %3155 = vmatprep.subr.bf16.mxu1 %v7382_v21  ;;  %3145 = vmatpush1.bf16.msra.mxu0 %v7383_v53  ;;  %v7412_v21 = vld [vmem:[#allocation79_spill] sm:$0xff] }
 0x8c6   : > { %3196 = vmatprep.subr.bf16.mxu0 %v7384_v18 }
 0x8c7   : > { %3054 = vmatmul.mubr.bf16.vlgmr.msra.gmra.mrb[32].mxu1 %v6642_v63  ;;  %v7400_v63 = vld [vmem:[#allocation25_spill] sm:$0xff] }
 0x8c8   : > { %3156 = vmatpush1.bf16.msra.mxu1 %v7385_v1  ;;  %v7413_v1 = vld [vmem:[#allocation80_spill] sm:$0xff] }
 0x8c9   : > { %3157 = vmatprep.subr.bf16.mxu1 %v7386_v17  ;;  %v7414_v17 = vld [vmem:[#allocation81_spill] sm:$0xff] }
 0x8cc   : > { %3158 = vmatpush1.bf16.msra.mxu1 %v7387_v56  ;;  %v7415_v56 = vld [vmem:[#allocation82_spill] sm:$0xff] }
 0x8cd   : > { %3159 = vmatprep.subr.bf16.mxu1 %v7388_v62  ;;  %v4776_v62 = vld [vmem:[#allocation9 + $0x4] ss:$24 sps:$4 sm:$0xff]  }
 0x8d0   : > { %3160 = vmatpush1.bf16.msra.mxu1 %v7389_v34 }
 0x8d1   : > { %3161 = vmatprep.subr.bf16.mxu1 %v7390_v61 }
 0x8d4   : > { %3162 = vmatpush1.bf16.msra.mxu1 %v7391_v30 }
 0x8d5   : > { %3163 = vmatprep.subr.bf16.mxu1 %v7392_v47 }
 0x8d8   : > { %3164 = vmatpush1.bf16.msra.mxu1 %v7393_v22 }
 0x8d9   : > { %3165 = vmatprep.subr.bf16.mxu1 %v7394_v6 }
 0x8dc   : > { %3166 = vmatpush1.bf16.msra.mxu1 %v7395_v26 }
 0x8dd   : > { %3167 = vmatprep.subr.bf16.mxu1 %v7396_v35 }
 0x8e0   : > { %3168 = vmatpush1.bf16.msra.mxu1 %v7397_v31  ;;  %v2931_v31 = vld [vmem:[#allocation2 + $0xf0] sm:$0xff] }
 0x8e1   : > { %3169 = vmatprep.subr.bf16.mxu1 %v7398_v25  ;;  %v2932_v25 = vld [vmem:[#allocation2 + $0xf8] sm:$0xff] }
 0x8e4   : > { %3170 = vmatpush1.bf16.msra.mxu1 %v7399_v23 }
 0x8e5   : > { %3171 = vmatprep.subr.bf16.mxu1 %v7400_v63 }
 0x8e8   : > { %3172 = vmatpush1.bf16.msra.mxu1 %v7401_v4 }
 0x8e9   : > { %3173 = vmatprep.subr.bf16.mxu1 %v7402_v28 }
 0x8ec   : > { %3174 = vmatpush1.bf16.msra.mxu1 %v7403_v36  ;;  %v2933_v36 = vld [vmem:[#allocation2 + $0x100] sm:$0xff] }
 0x8ed   : > { %3175 = vmatprep.subr.bf16.mxu1 %v7404_v7  ;;  %v2934_v7 = vld [vmem:[#allocation2 + $0x108] sm:$0xff] }
 0x8f0   : > { %3176 = vmatpush1.bf16.msra.mxu1 %v7405_v27 }
 0x8f1   : > { %3177 = vmatprep.subr.bf16.mxu1 %v7406_v8 }
 0x8f4   : > { %3178 = vmatpush1.bf16.msra.mxu1 %v7407_v10 }
 0x8f5   : > { %3179 = vmatprep.subr.bf16.mxu1 %v7408_v13 }
 0x8f8   : > { %3180 = vmatpush1.bf16.msra.mxu1 %v7409_v14 }
 0x8f9   : > { %3181 = vmatprep.subr.bf16.mxu1 %v7410_v40 }
 0x8fc   : > { %3182 = vmatpush1.bf16.msra.mxu1 %v7411_v3 }
 0x8fd   : > { %3183 = vmatprep.subr.bf16.mxu1 %v7412_v21 }
 0x900   : > { %3184 = vmatpush1.bf16.msra.mxu1 %v7413_v1 }
 0x901   : > { %3185 = vmatprep.subr.bf16.mxu1 %v7414_v17 }
 0x904   : > { %3186 = vmatpush1.bf16.msra.mxu1 %v7415_v56 }
 0x905   : > { %3289 = vmatprep.subr.bf16.mxu1 %v4776_v62 }
 0x95a   : > { %v2973_v34 = vpop.f32.mrb[28].mxu1  ;;  %v3014_v61 = vpop.f32.mrb[32].mxu0 }
 0x95b   : > { %v2975_v30 = vpop.f32.mrb[29].mxu1  ;;  %v3016_v47 = vpop.f32.mrb[33].mxu0  ;;  %v3062_v23 = vadd.f32 %v2973_v34, %v2931_v31  ;;  %v3076_v27 = vadd.f32 %v3014_v61, %v2933_v36  ;;  %v7416_v31 = vld [vmem:[#allocation76_spill] sm:$0xff] }
 0x95c   : > { %v2977_v22 = vpop.f32.mrb[30].mxu1  ;;  %v3018_v6 = vpop.f32.mrb[34].mxu0  ;;  %v3063_v63 = vadd.f32 %v2975_v30, %v2932_v25  ;;  %v3077_v8 = vadd.f32 %v3016_v47, %v2934_v7  ;;  %v2935_v47 = vld [vmem:[#allocation2 + $0x110] sm:$0xff]  ;;  %v2936_v7 = vld [vmem:[#allocation2 + $0x118] sm:$0xff] }
 0x95d   : > { %v2978_v26 = vpop.f32.mrb[31].mxu1  ;;  %v3019_v35 = vpop.f32.mrb[35].mxu0  ;;  %v4004_v4 = vmul.f32 -1.442695, %v3062_v23  ;;  %v4006_v10 = vmul.f32 -1.442695, %v3076_v27 }
 0x95e   : > { %v4005_v28 = vmul.f32 -1.442695, %v3063_v63  ;;  %v4007_v13 = vmul.f32 -1.442695, %v3077_v8 }
 0x95f   : > { %4620 = vpow2.f32 %v4004_v4 }
 0x960   : > { %4622 = vpow2.f32 %v4005_v28 }
 0x961   : > { %4624 = vpow2.f32 %v4006_v10 }
 0x962   : > { %4626 = vpow2.f32 %v4007_v13 }
 0x969   : > { %v4621_v14 = vpop.eup %4620 }
 0x96a   : > { %v4623_v40 = vpop.eup %4622  ;;  %v3070_v62 = vadd.f32 1.0, %v4621_v14 }
 0x96b   : > { %v3071_v22 = vadd.f32 1.0, %v4623_v40  ;;  %v4625_v34 = vpop.eup %4624 }
 0x96c   : > { %4628 = vrcp.f32 %v3070_v62  ;;  %v4627_v30 = vpop.eup %4626  ;;  %v3084_v6 = vadd.f32 1.0, %v4625_v34 }
 0x96d   : > { %4630 = vrcp.f32 %v3071_v22  ;;  %v3085_v26 = vadd.f32 1.0, %v4627_v30 }
 0x96e   : > { %4632 = vrcp.f32 %v3084_v6 }
 0x96f   : > { %4634 = vrcp.f32 %v3085_v26 }
 0x976   : > { %v4629_v61 = vpop.eup %4628 }
 0x977   : > { %v4631_v28 = vpop.eup %4630 }
 0x978   : > { %v4633_v14 = vpop.eup %4632 }
 0x979   : > { %v4635_v40 = vpop.eup %4634  ;;  %v3098_v62 = vsub.f32 1.0, %v4633_v14 }
 0x97a   : > { %v3099_v34 = vsub.f32 1.0, %v4635_v40  ;;  %v3103_v6 = vmul.f32 %v4635_v40, %v6636_v33  ;;  %v4778_v33 = vld [vmem:[#allocation9 + $0x34] ss:$24 sps:$4 sm:$0xff]  }
 0x97b   : > { %v4821_v40 = vld [vmem:[#allocation9 + $0x15c] ss:$24 sps:$4 sm:$0xff]  }
 0x99a   : > { %v3055_v35 = vpop.f32.mrb[32].mxu1 }
 0x99b   : > { %v3090_v25 = vadd.f32 %v3055_v35, %v7416_v31  ;;  %v3057_v23 = vpop.f32.mrb[33].mxu1 }
 0x99c   : > { %v3091_v63 = vadd.f32 %v3057_v23, %v5986_v45  ;;  %v3059_v4 = vpop.f32.mrb[34].mxu1  ;;  %v3102_v23 = vmul.f32 %v4633_v14, %v6634_v43  ;;  %v4777_v43 = vld [vmem:[#allocation9] ss:$24 sps:$4 sm:$0xff]  }
 0x99d   : > { %v3092_v36 = vmul.f32 %v4629_v61, %v3090_v25  ;;  %v3060_v27 = vpop.f32.mrb[35].mxu1  ;;  %v4820_v14 = vld [vmem:[#allocation9 + $0x128] ss:$24 sps:$4 sm:$0xff]  }
 0x99e   : > { %v3093_v8 = vmul.f32 %v4631_v28, %v3091_v63  ;;  %v4779_v63 = vld [vmem:[#allocation9 + $0x30] ss:$24 sps:$4 sm:$0xff]   ;;  %v4780_v28 = vld [vmem:[#allocation9 + $0x64] ss:$24 sps:$4 sm:$0xff]  }
 0x99f   : > { %v3094_v10 = vadd.f32 %v3092_v36, %v2935_v47  ;;  %v4782_v36 = vld [vmem:[#allocation9 + $0x94] ss:$24 sps:$4 sm:$0xff]  }
 0x9a0   : > { %v3095_v13 = vadd.f32 %v3093_v8, %v2936_v7  ;;  %v4812_v7 = vld [vmem:[#allocation9 + $0x68] ss:$24 sps:$4 sm:$0xff]   ;;  %v4813_v27 = vld [vmem:[#allocation9 + $0x9c] ss:$24 sps:$4 sm:$0xff]   ;;  %v4815_v8 = vld [vmem:[#allocation9 + $0xcc] ss:$24 sps:$4 sm:$0xff]  }
 0x9a1   : > { %4636 = vtanh.f32 %v3094_v10  ;;  %v4818_v10 = vld [vmem:[#allocation9 + $0xf8] ss:$24 sps:$4 sm:$0xff]  }
 0x9a2   : > { %4638 = vtanh.f32 %v3095_v13  ;;  %v4819_v13 = vld [vmem:[#allocation9 + $0x12c] ss:$24 sps:$4 sm:$0xff]  }
 0x9ab   : > { %v4637_v22 = vpop.eup %4636 }
 0x9ac   : > { %v4639_v30 = vpop.eup %4638  ;;  %v3100_v35 = vmul.f32 %v4637_v22, %v3098_v62  ;;  %v4822_v62 = vld [vmem:[#allocation9 + $0x158] ss:$24 sps:$4 sm:$0xff]   ;;  %v4823_v22 = vld [vmem:[#allocation9 + $0x18c] ss:$24 sps:$4 sm:$0xff]  }
 0x9ad   : > { %v3101_v4 = vmul.f32 %v4639_v30, %v3099_v34  ;;  %v4824_v34 = vld [vmem:[#allocation9 + $0x188] ss:$24 sps:$4 sm:$0xff]   ;;  %v4825_v30 = vld [vmem:[#allocation9 + $0x1bc] ss:$24 sps:$4 sm:$0xff]  }
 0x9ae   : > { %v6746_v25 = vadd.f32 %v3102_v23, %v3100_v35  ;;  %v4826_v35 = vld [vmem:[#allocation9 + $0x1b8] ss:$24 sps:$4 sm:$0xff]   ;;  %v4827_v23 = vld [vmem:[#allocation9 + $0x1ec] ss:$24 sps:$4 sm:$0xff]  }
 0x9af   : > { %v6748_v26 = vadd.f32 %v3103_v6, %v3101_v4  ;;  %v4828_v4 = vld [vmem:[#allocation9 + $0x1e8] ss:$24 sps:$4 sm:$0xff]   ;;  %v4829_v6 = vld [vmem:[#allocation9 + $0x21c] ss:$24 sps:$4 sm:$0xff]  }
 0x9b0   : > { %v6754_v47 = vpack.c.bf16 %v6746_v25, %v6746_v25 }
 0x9b1   : > { %v3113_v61 = vpack.c.bf16 %v6748_v26, %v6748_v26 }
 0x9b3   : > { %3146 = vmatprep.mubr.bf16.mxu0 %v3113_v61  ;;  %3187 = vmatprep.mubr.bf16.mxu1 %v3113_v61 }
 0x9b4   : > { %3147 = vmatmul.mubr.bf16.vlgmr.msra.gmra.mrb[36].mxu0 %v6754_v47  ;;  %3188 = vmatmul.mubr.bf16.vlgmr.msra.gmra.mrb[36].mxu1 %v6754_v47 }
 0x9b5   : > { %3197 = vmatpush1.bf16.msra.mxu0 %v6344_v55  ;;  %3228 = vmatprep.mubr.bf16.mxu0 %v3113_v61  ;;  %v4781_v55 = vld [vmem:[#allocation9 + $0x60] ss:$24 sps:$4 sm:$0xff]  }
 0x9b6   : > { %3198 = vmatprep.subr.bf16.mxu0 %v6347_v20  ;;  %3290 = vmatpush1.bf16.msra.mxu1 %v4777_v43  ;;  %v4783_v20 = vld [vmem:[#allocation9 + $0x90] ss:$24 sps:$4 sm:$0xff]  }
 0x9b7   : > { %3291 = vmatprep.subr.bf16.mxu1 %v4778_v33  ;;  %v4830_v61 = vld [vmem:[#allocation9 + $0x218] ss:$24 sps:$4 sm:$0xff]   ;;  %v4832_v43 = vld [vmem:[#allocation9 + $0x248] ss:$24 sps:$4 sm:$0xff]   ;;  %v4833_v33 = vld [vmem:[#allocation9 + $0x27c] ss:$24 sps:$4 sm:$0xff]  }
 0x9b9   : > { %3199 = vmatpush1.bf16.msra.mxu0 %v6352_v51  ;;  %v4784_v51 = vld [vmem:[#allocation9 + $0xc4] ss:$24 sps:$4 sm:$0xff]  }
 0x9ba   : > { %3200 = vmatprep.subr.bf16.mxu0 %v6355_v39  ;;  %3292 = vmatpush1.bf16.msra.mxu1 %v4779_v63  ;;  %v4785_v39 = vld [vmem:[#allocation9 + $0xc0] ss:$24 sps:$4 sm:$0xff]  }
 0x9bb   : > { %3293 = vmatprep.subr.bf16.mxu1 %v4780_v28 }
 0x9bd   : > { %3201 = vmatpush1.bf16.msra.mxu0 %v6360_v57  ;;  %v4786_v57 = vld [vmem:[#allocation9 + $0xf4] ss:$24 sps:$4 sm:$0xff]  }
 0x9be   : > { %3202 = vmatprep.subr.bf16.mxu0 %v6363_v52  ;;  %3294 = vmatpush1.bf16.msra.mxu1 %v4781_v55  ;;  %v4787_v52 = vld [vmem:[#allocation9 + $0xf0] ss:$24 sps:$4 sm:$0xff]  }
 0x9bf   : > { %3295 = vmatprep.subr.bf16.mxu1 %v4782_v36 }
 0x9c1   : > { %3203 = vmatpush1.bf16.msra.mxu0 %v6368_v49  ;;  %v4788_v49 = vld [vmem:[#allocation9 + $0x124] ss:$24 sps:$4 sm:$0xff]  }
 0x9c2   : > { %3204 = vmatprep.subr.bf16.mxu0 %v6371_v41  ;;  %3296 = vmatpush1.bf16.msra.mxu1 %v4783_v20  ;;  %v4789_v41 = vld [vmem:[#allocation9 + $0x120] ss:$24 sps:$4 sm:$0xff]  }
 0x9c3   : > { %3297 = vmatprep.subr.bf16.mxu1 %v4784_v51 }
 0x9c5   : > { %3205 = vmatpush1.bf16.msra.mxu0 %v6376_v48  ;;  %v4790_v48 = vld [vmem:[#allocation9 + $0x154] ss:$24 sps:$4 sm:$0xff]  }
 0x9c6   : > { %3206 = vmatprep.subr.bf16.mxu0 %v6379_v60  ;;  %3298 = vmatpush1.bf16.msra.mxu1 %v4785_v39  ;;  %v4791_v60 = vld [vmem:[#allocation9 + $0x150] ss:$24 sps:$4 sm:$0xff]  }
 0x9c7   : > { %3299 = vmatprep.subr.bf16.mxu1 %v4786_v57 }
 0x9c9   : > { %3207 = vmatpush1.bf16.msra.mxu0 %v6384_v2  ;;  %v4792_v2 = vld [vmem:[#allocation9 + $0x184] ss:$24 sps:$4 sm:$0xff]  }
 0x9ca   : > { %3208 = vmatprep.subr.bf16.mxu0 %v6387_v38  ;;  %3300 = vmatpush1.bf16.msra.mxu1 %v4787_v52  ;;  %v4793_v38 = vld [vmem:[#allocation9 + $0x180] ss:$24 sps:$4 sm:$0xff]  }
 0x9cb   : > { %3301 = vmatprep.subr.bf16.mxu1 %v4788_v49  ;;  %v3106_v52 = vld [vmem:[#allocation2 + $0x120] sm:$0xff]  ;;  %v3107_v49 = vld [vmem:[#allocation2 + $0x128] sm:$0xff] }
 0x9cd   : > { %3209 = vmatpush1.bf16.msra.mxu0 %v6392_v42  ;;  %v4794_v42 = vld [vmem:[#allocation9 + $0x1b4] ss:$24 sps:$4 sm:$0xff]  }
 0x9ce   : > { %3210 = vmatprep.subr.bf16.mxu0 %v6395_v46  ;;  %3302 = vmatpush1.bf16.msra.mxu1 %v4789_v41  ;;  %v4795_v46 = vld [vmem:[#allocation9 + $0x1b0] ss:$24 sps:$4 sm:$0xff]  }
 0x9cf   : > { %3303 = vmatprep.subr.bf16.mxu1 %v4790_v48 }
 0x9d1   : > { %3211 = vmatpush1.bf16.msra.mxu0 %v6400_v50  ;;  %v4796_v50 = vld [vmem:[#allocation9 + $0x1e4] ss:$24 sps:$4 sm:$0xff]  }
 0x9d2   : > { %3212 = vmatprep.subr.bf16.mxu0 %v6403_v58  ;;  %3304 = vmatpush1.bf16.msra.mxu1 %v4791_v60  ;;  %v4797_v58 = vld [vmem:[#allocation9 + $0x1e0] ss:$24 sps:$4 sm:$0xff]  }
 0x9d3   : > { %3305 = vmatprep.subr.bf16.mxu1 %v4792_v2 }
 0x9d5   : > { %3213 = vmatpush1.bf16.msra.mxu0 %v6408_v32  ;;  %v4798_v32 = vld [vmem:[#allocation9 + $0x214] ss:$24 sps:$4 sm:$0xff]  }
 0x9d6   : > { %3214 = vmatprep.subr.bf16.mxu0 %v7302_v19  ;;  %3306 = vmatpush1.bf16.msra.mxu1 %v4793_v38  ;;  %v4799_v19 = vld [vmem:[#allocation9 + $0x210] ss:$24 sps:$4 sm:$0xff]  }
 0x9d7   : > { %3307 = vmatprep.subr.bf16.mxu1 %v4794_v42 }
 0x9d9   : > { %3215 = vmatpush1.bf16.msra.mxu0 %v7303_v0  ;;  %v4800_v0 = vld [vmem:[#allocation9 + $0x244] ss:$24 sps:$4 sm:$0xff]  }
 0x9da   : > { %3216 = vmatprep.subr.bf16.mxu0 %v7304_v5  ;;  %3308 = vmatpush1.bf16.msra.mxu1 %v4795_v46  ;;  %v4801_v5 = vld [vmem:[#allocation9 + $0x240] ss:$24 sps:$4 sm:$0xff]  }
 0x9db   : > { %3309 = vmatprep.subr.bf16.mxu1 %v4796_v50 }
 0x9dd   : > { %3217 = vmatpush1.bf16.msra.mxu0 %v7361_v29  ;;  %v4802_v29 = vld [vmem:[#allocation9 + $0x274] ss:$24 sps:$4 sm:$0xff]  }
 0x9de   : > { %3218 = vmatprep.subr.bf16.mxu0 %v7362_v54  ;;  %3310 = vmatpush1.bf16.msra.mxu1 %v4797_v58  ;;  %v4803_v54 = vld [vmem:[#allocation9 + $0x270] ss:$24 sps:$4 sm:$0xff]  }
 0x9df   : > { %3311 = vmatprep.subr.bf16.mxu1 %v4798_v32 }
 0x9e1   : > { %3219 = vmatpush1.bf16.msra.mxu0 %v7365_v59  ;;  %v4804_v59 = vld [vmem:[#allocation9 + $0x2a4] ss:$24 sps:$4 sm:$0xff]  }
 0x9e2   : > { %3220 = vmatprep.subr.bf16.mxu0 %v7366_v24  ;;  %3312 = vmatpush1.bf16.msra.mxu1 %v4799_v19  ;;  %v4805_v24 = vld [vmem:[#allocation9 + $0x2a0] ss:$24 sps:$4 sm:$0xff]  }
 0x9e3   : > { %3313 = vmatprep.subr.bf16.mxu1 %v4800_v0 }
 0x9e5   : > { %3221 = vmatpush1.bf16.msra.mxu0 %v7369_v37  ;;  %v4806_v37 = vld [vmem:[#allocation9 + $0x2d4] ss:$24 sps:$4 sm:$0xff]  }
 0x9e6   : > { %3222 = vmatprep.subr.bf16.mxu0 %v7370_v44  ;;  %3314 = vmatpush1.bf16.msra.mxu1 %v4801_v5  ;;  %v4807_v44 = vld [vmem:[#allocation9 + $0xc] ss:$24 sps:$4 sm:$0xff]  }
 0x9e7   : > { %3315 = vmatprep.subr.bf16.mxu1 %v4802_v29 }
 0x9e9   : > { %3223 = vmatpush1.bf16.msra.mxu0 %v7373_v11  ;;  %v4808_v11 = vld [vmem:[#allocation9 + $0x8] ss:$24 sps:$4 sm:$0xff]  }
 0x9ea   : > { %3224 = vmatprep.subr.bf16.mxu0 %v7374_v12  ;;  %3316 = vmatpush1.bf16.msra.mxu1 %v4803_v54  ;;  %v4809_v12 = vld [vmem:[#allocation9 + $0x3c] ss:$24 sps:$4 sm:$0xff]  }
 0x9eb   : > { %3317 = vmatprep.subr.bf16.mxu1 %v4804_v59 }
 0x9ed   : > { %3225 = vmatpush1.bf16.msra.mxu0 %v7377_v15  ;;  %v4810_v15 = vld [vmem:[#allocation9 + $0x38] ss:$24 sps:$4 sm:$0xff]  }
 0x9ee   : > { %3226 = vmatprep.subr.bf16.mxu0 %v7378_v16  ;;  %3318 = vmatpush1.bf16.msra.mxu1 %v4805_v24  ;;  %v4811_v16 = vld [vmem:[#allocation9 + $0x6c] ss:$24 sps:$4 sm:$0xff]  }
 0x9ef   : > { %3319 = vmatprep.subr.bf16.mxu1 %v4806_v37  ;;  %v3110_v37 = vld [vmem:[#allocation2 + $0x140] sm:$0xff] }
 0x9f1   : > { %3227 = vmatpush1.bf16.msra.mxu0 %v7381_v9  ;;  %v4814_v9 = vld [vmem:[#allocation9 + $0x98] ss:$24 sps:$4 sm:$0xff]  }
 0x9f2   : > { %3330 = vmatprep.subr.bf16.mxu0 %v4807_v44  ;;  %3320 = vmatpush1.bf16.msra.mxu1 %v7383_v53  ;;  %v4816_v53 = vld [vmem:[#allocation9 + $0xc8] ss:$24 sps:$4 sm:$0xff]  }
 0x9f3   : > { %3371 = vmatprep.subr.bf16.mxu1 %v7384_v18  ;;  %v4817_v18 = vld [vmem:[#allocation9 + $0xfc] ss:$24 sps:$4 sm:$0xff]  }
 0x9f4   : > { %3229 = vmatmul.mubr.bf16.vlgmr.msra.gmra.mrb[40].mxu0 %v6754_v47  ;;  %v4831_v47 = vld [vmem:[#allocation9 + $0x24c] ss:$24 sps:$4 sm:$0xff]  }
 0x9f5   : > { %3331 = vmatpush1.bf16.msra.mxu0 %v4808_v11 }
 0x9f6   : > { %3332 = vmatprep.subr.bf16.mxu0 %v4809_v12 }
 0x9f9   : > { %3333 = vmatpush1.bf16.msra.mxu0 %v4810_v15 }
 0x9fa   : > { %3334 = vmatprep.subr.bf16.mxu0 %v4811_v16  ;;  %v3111_v16 = vld [vmem:[#allocation2 + $0x148] sm:$0xff] }
 0x9fd   : > { %3335 = vmatpush1.bf16.msra.mxu0 %v4812_v7 }
 0x9fe   : > { %3336 = vmatprep.subr.bf16.mxu0 %v4813_v27 }
 0xa01   : > { %3337 = vmatpush1.bf16.msra.mxu0 %v4814_v9 }
 0xa02   : > { %3338 = vmatprep.subr.bf16.mxu0 %v4815_v8 }
 0xa05   : > { %3339 = vmatpush1.bf16.msra.mxu0 %v4816_v53 }
 0xa06   : > { %3340 = vmatprep.subr.bf16.mxu0 %v4817_v18 }
 0xa09   : > { %3341 = vmatpush1.bf16.msra.mxu0 %v4818_v10 }
 0xa0a   : > { %3342 = vmatprep.subr.bf16.mxu0 %v4819_v13 }
 0xa0d   : > { %3343 = vmatpush1.bf16.msra.mxu0 %v4820_v14 }
 0xa0e   : > { %3344 = vmatprep.subr.bf16.mxu0 %v4821_v40 }
 0xa11   : > { %3345 = vmatpush1.bf16.msra.mxu0 %v4822_v62 }
 0xa12   : > { %3346 = vmatprep.subr.bf16.mxu0 %v4823_v22 }
 0xa15   : > { %3347 = vmatpush1.bf16.msra.mxu0 %v4824_v34 }
 0xa16   : > { %3348 = vmatprep.subr.bf16.mxu0 %v4825_v30 }
 0xa19   : > { %3349 = vmatpush1.bf16.msra.mxu0 %v4826_v35 }
 0xa1a   : > { %3350 = vmatprep.subr.bf16.mxu0 %v4827_v23 }
 0xa1d   : > { %3351 = vmatpush1.bf16.msra.mxu0 %v4828_v4 }
 0xa1e   : > { %3352 = vmatprep.subr.bf16.mxu0 %v4829_v6 }
 0xa21   : > { %3353 = vmatpush1.bf16.msra.mxu0 %v4830_v61  ;;  %v4836_v61 = vld [vmem:[#allocation9 + $0x40] ss:$24 sps:$4 sm:$0xff]  }
 0xa22   : > { %3354 = vmatprep.subr.bf16.mxu0 %v4831_v47  ;;  %v4837_v47 = vld [vmem:[#allocation9 + $0x74] ss:$24 sps:$4 sm:$0xff]  }
 0xa25   : > { %3355 = vmatpush1.bf16.msra.mxu0 %v4832_v43  ;;  %v4838_v43 = vld [vmem:[#allocation9 + $0x70] ss:$24 sps:$4 sm:$0xff]  }
 0xa26   : > { %3356 = vmatprep.subr.bf16.mxu0 %v4833_v33  ;;  %v4839_v33 = vld [vmem:[#allocation9 + $0xa4] ss:$24 sps:$4 sm:$0xff]  }
 0xa29   : > { %3357 = vmatpush1.bf16.msra.mxu0 %v7411_v3 }
 0xa2a   : > { %3358 = vmatprep.subr.bf16.mxu0 %v7412_v21 }
 0xa2d   : > { %3359 = vmatpush1.bf16.msra.mxu0 %v7413_v1  ;;  %v3108_v1 = vld [vmem:[#allocation2 + $0x130] sm:$0xff] }
 0xa2e   : > { %3360 = vmatprep.subr.bf16.mxu0 %v7414_v17  ;;  %v3109_v17 = vld [vmem:[#allocation2 + $0x138] sm:$0xff] }
 0xa31   : > { %3361 = vmatpush1.bf16.msra.mxu0 %v7415_v56 }
 0xa87   : > { %v3148_v63 = vpop.f32.mrb[36].mxu0  ;;  %v3189_v28 = vpop.f32.mrb[36].mxu1 }
 0xa88   : > { %v3150_v55 = vpop.f32.mrb[37].mxu0  ;;  %v3191_v36 = vpop.f32.mrb[37].mxu1  ;;  %v3237_v41 = vadd.f32 %v3148_v63, %v3106_v52  ;;  %v3251_v60 = vadd.f32 %v3189_v28, %v3108_v1  ;;  %v4840_v63 = vld [vmem:[#allocation9 + $0xa0] ss:$24 sps:$4 sm:$0xff]   ;;  %v4841_v28 = vld [vmem:[#allocation9 + $0xd4] ss:$24 sps:$4 sm:$0xff]  }
 0xa89   : > { %v3152_v20 = vpop.f32.mrb[38].mxu0  ;;  %v3193_v51 = vpop.f32.mrb[38].mxu1  ;;  %v3238_v3 = vadd.f32 %v3150_v55, %v3107_v49  ;;  %v3252_v56 = vadd.f32 %v3191_v36, %v3109_v17  ;;  %v4842_v55 = vld [vmem:[#allocation9 + $0xd0] ss:$24 sps:$4 sm:$0xff]   ;;  %v4843_v36 = vld [vmem:[#allocation9 + $0x104] ss:$24 sps:$4 sm:$0xff]  }
 0xa8a   : > { %v3153_v39 = vpop.f32.mrb[39].mxu0  ;;  %v3194_v57 = vpop.f32.mrb[39].mxu1  ;;  %v4008_v48 = vmul.f32 -1.442695, %v3237_v41  ;;  %v4010_v2 = vmul.f32 -1.442695, %v3251_v60 }
 0xa8b   : > { %v4009_v21 = vmul.f32 -1.442695, %v3238_v3  ;;  %v4011_v38 = vmul.f32 -1.442695, %v3252_v56  ;;  %v4844_v20 = vld [vmem:[#allocation9 + $0x100] ss:$24 sps:$4 sm:$0xff]  }
 0xa8c   : > { %4640 = vpow2.f32 %v4008_v48  ;;  %v4845_v51 = vld [vmem:[#allocation9 + $0x134] ss:$24 sps:$4 sm:$0xff]   ;;  %v4846_v39 = vld [vmem:[#allocation9 + $0x130] ss:$24 sps:$4 sm:$0xff]   ;;  %v4847_v57 = vld [vmem:[#allocation9 + $0x164] ss:$24 sps:$4 sm:$0xff]  }
 0xa8d   : > { %4642 = vpow2.f32 %v4009_v21  ;;  %v4848_v52 = vld [vmem:[#allocation9 + $0x160] ss:$24 sps:$4 sm:$0xff]   ;;  %v4849_v49 = vld [vmem:[#allocation9 + $0x194] ss:$24 sps:$4 sm:$0xff]   ;;  %v4850_v41 = vld [vmem:[#allocation9 + $0x190] ss:$24 sps:$4 sm:$0xff]  }
 0xa8e   : > { %4644 = vpow2.f32 %v4010_v2  ;;  %v4851_v3 = vld [vmem:[#allocation9 + $0x1c4] ss:$24 sps:$4 sm:$0xff]   ;;  %v4852_v48 = vld [vmem:[#allocation9 + $0x1c0] ss:$24 sps:$4 sm:$0xff]   ;;  %v4853_v21 = vld [vmem:[#allocation9 + $0x1f4] ss:$24 sps:$4 sm:$0xff]  }
 0xa8f   : > { %4646 = vpow2.f32 %v4011_v38  ;;  %v4854_v1 = vld [vmem:[#allocation9 + $0x1f0] ss:$24 sps:$4 sm:$0xff]   ;;  %v4855_v17 = vld [vmem:[#allocation9 + $0x224] ss:$24 sps:$4 sm:$0xff]   ;;  %v4856_v60 = vld [vmem:[#allocation9 + $0x220] ss:$24 sps:$4 sm:$0xff]  }
 0xa90   : > { %v4857_v56 = vld [vmem:[#allocation9 + $0x254] ss:$24 sps:$4 sm:$0xff]   ;;  %v4858_v2 = vld [vmem:[#allocation9 + $0x250] ss:$24 sps:$4 sm:$0xff]   ;;  %v4859_v38 = vld [vmem:[#allocation9 + $0x284] ss:$24 sps:$4 sm:$0xff]  }
 0xa96   : > { %v4641_v42 = vpop.eup %4640 }
 0xa97   : > { %v4643_v46 = vpop.eup %4642  ;;  %v3245_v50 = vadd.f32 1.0, %v4641_v42  ;;  %v4860_v42 = vld [vmem:[#allocation9 + $0x280] ss:$24 sps:$4 sm:$0xff]  }
 0xa98   : > { %v3246_v58 = vadd.f32 1.0, %v4643_v46  ;;  %v4645_v32 = vpop.eup %4644  ;;  %v4861_v46 = vld [vmem:[#allocation9 + $0x2b4] ss:$24 sps:$4 sm:$0xff]  }
 0xa99   : > { %4648 = vrcp.f32 %v3245_v50  ;;  %v4647_v19 = vpop.eup %4646  ;;  %v3259_v0 = vadd.f32 1.0, %v4645_v32  ;;  %v4862_v50 = vld [vmem:[#allocation9 + $0x2b0] ss:$24 sps:$4 sm:$0xff]   ;;  %v4864_v32 = vld [vmem:[#allocation9 + $0x2e0] ss:$24 sps:$4 sm:$0xff]  }
 0xa9a   : > { %4650 = vrcp.f32 %v3246_v58  ;;  %v3260_v5 = vadd.f32 1.0, %v4647_v19  ;;  %v4863_v58 = vld [vmem:[#allocation9 + $0x2e4] ss:$24 sps:$4 sm:$0xff]  }
 0xa9b   : > { %4652 = vrcp.f32 %v3259_v0  ;;  %v4504_v19 = vld [vmem:[#allocation12 + $0x40] sm:$0xff]  }
 0xa9c   : > { %4654 = vrcp.f32 %v3260_v5  ;;  %v4505_v0 = vld [vmem:[#allocation12] sm:$0xff]   ;;  %v4506_v5 = vld [vmem:[#allocation12 + $0x48] sm:$0xff]   ;;  %4038 = vmatprep.subr.bf16.mxu0 %v4504_v19 }
 0xaa3   : > { %v4649_v24 = vpop.eup %4648 }
 0xaa4   : > { %v4651_v12 = vpop.eup %4650 }
 0xaa5   : > { %v4653_v53 = vpop.eup %4652 }
 0xaa6   : > { %v4655_v18 = vpop.eup %4654  ;;  %v3273_v10 = vsub.f32 1.0, %v4653_v53  ;;  %v3277_v22 = vmul.f32 %v4653_v53, %v6746_v25  ;;  %v4834_v25 = vld [vmem:[#allocation9 + $0x10] ss:$24 sps:$4 sm:$0xff]  }
 0xaa7   : > { %v3274_v14 = vsub.f32 1.0, %v4655_v18  ;;  %v3278_v30 = vmul.f32 %v4655_v18, %v6748_v26  ;;  %v4835_v26 = vld [vmem:[#allocation9 + $0x44] ss:$24 sps:$4 sm:$0xff]  }
 0xac7   : > { %v3230_v29 = vpop.f32.mrb[40].mxu0 }
 0xac8   : > { %v3265_v54 = vadd.f32 %v3230_v29, %v7416_v31  ;;  %v3232_v59 = vpop.f32.mrb[41].mxu0  ;;  %v4507_v29 = vld [vmem:[#allocation12 + $0x8] sm:$0xff]  }
 0xac9   : > { %v3266_v44 = vadd.f32 %v3232_v59, %v5986_v45  ;;  %v3234_v11 = vpop.f32.mrb[42].mxu0  ;;  %v4509_v59 = vld [vmem:[#allocation12 + $0x10] sm:$0xff]  }
 0xaca   : > { %v3267_v15 = vmul.f32 %v4649_v24, %v3265_v54  ;;  %v3235_v7 = vpop.f32.mrb[43].mxu0  ;;  %v4508_v54 = vld [vmem:[#allocation12 + $0x50] sm:$0xff]   ;;  %v4510_v24 = vld [vmem:[#allocation12 + $0x58] sm:$0xff]   ;;  %v4513_v11 = vld [vmem:[#allocation12 + $0x20] sm:$0xff]  }
 0xacb   : > { %v3268_v27 = vmul.f32 %v4651_v12, %v3266_v44  ;;  %v4512_v44 = vld [vmem:[#allocation12 + $0x60] sm:$0xff]   ;;  %v4514_v12 = vld [vmem:[#allocation12 + $0x68] sm:$0xff]   ;;  %v4517_v7 = vld [vmem:[#allocation12 + $0x30] sm:$0xff]  }
 0xacc   : > { %v3269_v9 = vadd.f32 %v3267_v15, %v3110_v37  ;;  %v4511_v37 = vld [vmem:[#allocation12 + $0x18] sm:$0xff]   ;;  %v4515_v15 = vld [vmem:[#allocation12 + $0x28] sm:$0xff]  }
 0xacd   : > { %v3270_v8 = vadd.f32 %v3268_v27, %v3111_v16  ;;  %v4516_v16 = vld [vmem:[#allocation12 + $0x70] sm:$0xff]   ;;  %v4518_v27 = vld [vmem:[#allocation12 + $0x78] sm:$0xff]  }
 0xace   : > { %4656 = vtanh.f32 %v3269_v9  ;;  %v4519_v9 = vld [vmem:[#allocation12 + $0x38] sm:$0xff]  }
 0xacf   : > { %4658 = vtanh.f32 %v3270_v8 }
 0xad8   : > { %v4657_v13 = vpop.eup %4656 }
 0xad9   : > { %v4659_v40 = vpop.eup %4658  ;;  %v3275_v62 = vmul.f32 %v4657_v13, %v3273_v10 }
 0xada   : > { %v3276_v34 = vmul.f32 %v4659_v40, %v3274_v14 }
 0xadb   : > { %v6801_v35 = vadd.f32 %v3277_v22, %v3275_v62  ;;  %v3281_v22 = vld [vmem:[#allocation2 + $0x150] sm:$0xff] }
 0xadc   : > { %v6803_v23 = vadd.f32 %v3278_v30, %v3276_v34  ;;  %v3282_v34 = vld [vmem:[#allocation2 + $0x158] sm:$0xff] }
 0xadd   : > { %v6809_v6 = vpack.c.bf16 %v6801_v35, %v6801_v35 }
 0xade   : > { %v3288_v4 = vpack.c.bf16 %v6803_v23, %v6803_v23 }
 0xae0   : > { %3321 = vmatprep.mubr.bf16.mxu1 %v3288_v4  ;;  %3362 = vmatprep.mubr.bf16.mxu0 %v3288_v4 }
 0xae1   : > { %3322 = vmatmul.mubr.bf16.vlgmr.msra.gmra.mrb[40].mxu1 %v6809_v6  ;;  %3363 = vmatmul.mubr.bf16.vlgmr.msra.gmra.mrb[44].mxu0 %v6809_v6 }
 0xae2   : > { %3372 = vmatpush1.bf16.msra.mxu1 %v4834_v25  ;;  %3403 = vmatprep.mubr.bf16.mxu1 %v3288_v4 }
 0xae3   : > { %3373 = vmatprep.subr.bf16.mxu1 %v4835_v26  ;;  %4039 = vmatpush3.bf16.msra.mxu0 %v4505_v0  ;;  %v3283_v26 = vld [vmem:[#allocation2 + $0x160] sm:$0xff] }
 0xae4   : > { %4040 = vmatprep.subr.bf16.mxu0 %v4506_v5 }
 0xae6   : > { %3374 = vmatpush1.bf16.msra.mxu1 %v4836_v61  ;;  %v3284_v61 = vld [vmem:[#allocation2 + $0x168] sm:$0xff] }
 0xae7   : > { %3375 = vmatprep.subr.bf16.mxu1 %v4837_v47  ;;  %4041 = vmatpush3.bf16.msra.mxu0 %v4507_v29 }
 0xae8   : > { %4042 = vmatprep.subr.bf16.mxu0 %v4508_v54 }
 0xaea   : > { %3376 = vmatpush1.bf16.msra.mxu1 %v4838_v43 }
 0xaeb   : > { %3377 = vmatprep.subr.bf16.mxu1 %v4839_v33  ;;  %4043 = vmatpush3.bf16.msra.mxu0 %v4509_v59 }
 0xaec   : > { %4044 = vmatprep.subr.bf16.mxu0 %v4510_v24 }
 0xaee   : > { %3378 = vmatpush1.bf16.msra.mxu1 %v4840_v63 }
 0xaef   : > { %3379 = vmatprep.subr.bf16.mxu1 %v4841_v28  ;;  %4045 = vmatpush3.bf16.msra.mxu0 %v4511_v37 }
 0xaf0   : > { %4046 = vmatprep.subr.bf16.mxu0 %v4512_v44 }
 0xaf2   : > { %3380 = vmatpush1.bf16.msra.mxu1 %v4842_v55 }
 0xaf3   : > { %3381 = vmatprep.subr.bf16.mxu1 %v4843_v36  ;;  %4047 = vmatpush3.bf16.msra.mxu0 %v4513_v11 }
 0xaf4   : > { %4048 = vmatprep.subr.bf16.mxu0 %v4514_v12 }
 0xaf6   : > { %3382 = vmatpush1.bf16.msra.mxu1 %v4844_v20 }
 0xaf7   : > { %3383 = vmatprep.subr.bf16.mxu1 %v4845_v51  ;;  %4049 = vmatpush3.bf16.msra.mxu0 %v4515_v15  ;;  %v4016_v15 = vld [vmem:[#allocation14] ss:$0 sm:$0xff] }
 0xaf8   : > { %4050 = vmatprep.subr.bf16.mxu0 %v4516_v16 }
 0xafa   : > { %3384 = vmatpush1.bf16.msra.mxu1 %v4846_v39 }
 0xafb   : > { %3385 = vmatprep.subr.bf16.mxu1 %v4847_v57  ;;  %4051 = vmatpush3.bf16.msra.mxu0 %v4517_v7 }
 0xafc   : > { %4052 = vmatprep.subr.bf16.mxu0 %v4518_v27 }
 0xafe   : > { %3386 = vmatpush1.bf16.msra.mxu1 %v4848_v52 }
 0xaff   : > { %3387 = vmatprep.subr.bf16.mxu1 %v4849_v49  ;;  %4053 = vmatpush3.bf16.msra.mxu0 %v4519_v9 }
 0xb02   : > { %3388 = vmatpush1.bf16.msra.mxu1 %v4850_v41 }
 0xb03   : > { %3389 = vmatprep.subr.bf16.mxu1 %v4851_v3 }
 0xb06   : > { %3390 = vmatpush1.bf16.msra.mxu1 %v4852_v48 }
 0xb07   : > { %3391 = vmatprep.subr.bf16.mxu1 %v4853_v21  ;;  %v3285_v21 = vld [vmem:[#allocation2 + $0x170] sm:$0xff] }
 0xb0a   : > { %3392 = vmatpush1.bf16.msra.mxu1 %v4854_v1 }
 0xb0b   : > { %3393 = vmatprep.subr.bf16.mxu1 %v4855_v17 }
 0xb0e   : > { %3394 = vmatpush1.bf16.msra.mxu1 %v4856_v60 }
 0xb0f   : > { %3395 = vmatprep.subr.bf16.mxu1 %v4857_v56 }
 0xb12   : > { %3396 = vmatpush1.bf16.msra.mxu1 %v4858_v2  ;;  %v3286_v2 = vld [vmem:[#allocation2 + $0x178] sm:$0xff] }
 0xb13   : > { %3397 = vmatprep.subr.bf16.mxu1 %v4859_v38 }
 0xb16   : > { %3398 = vmatpush1.bf16.msra.mxu1 %v4860_v42 }
 0xb17   : > { %3399 = vmatprep.subr.bf16.mxu1 %v4861_v46 }
 0xb1a   : > { %3400 = vmatpush1.bf16.msra.mxu1 %v4862_v50 }
 0xb1b   : > { %3401 = vmatprep.subr.bf16.mxu1 %v4863_v58 }
 0xb1e   : > { %3402 = vmatpush1.bf16.msra.mxu1 %v4864_v32 }
 0xb21   : > { %3404 = vmatmul.mubr.bf16.vlgmr.msra.gmra.mrb[44].mxu1 %v6809_v6 }
 0xbb4   : > { %v3323_v8 = vpop.f32.mrb[40].mxu1  ;;  %v3364_v53 = vpop.f32.mrb[44].mxu0 }
 0xbb5   : > { %v3325_v18 = vpop.f32.mrb[41].mxu1  ;;  %v3366_v10 = vpop.f32.mrb[45].mxu0  ;;  %v3412_v30 = vadd.f32 %v3323_v8, %v3281_v22  ;;  %v3426_v47 = vadd.f32 %v3364_v53, %v3283_v26 }
 0xbb6   : > { %v3327_v13 = vpop.f32.mrb[42].mxu1  ;;  %v3368_v14 = vpop.f32.mrb[46].mxu0  ;;  %v3413_v4 = vadd.f32 %v3325_v18, %v3282_v34  ;;  %v3427_v43 = vadd.f32 %v3366_v10, %v3284_v61 }
 0xbb7   : > { %v3328_v40 = vpop.f32.mrb[43].mxu1  ;;  %v3369_v62 = vpop.f32.mrb[47].mxu0  ;;  %v4012_v6 = vmul.f32 -1.442695, %v3412_v30  ;;  %v4014_v33 = vmul.f32 -1.442695, %v3426_v47 }
 0xbb8   : > { %v4013_v25 = vmul.f32 -1.442695, %v3413_v4  ;;  %v4015_v63 = vmul.f32 -1.442695, %v3427_v43 }
 0xbb9   : > { %4660 = vpow2.f32 %v4012_v6 }
 0xbba   : > { %4662 = vpow2.f32 %v4013_v25 }
 0xbbb   : > { %4664 = vpow2.f32 %v4014_v33 }
 0xbbc   : > { %4666 = vpow2.f32 %v4015_v63 }
 0xbc3   : > { %v4661_v28 = vpop.eup %4660 }
 0xbc4   : > { %v4663_v55 = vpop.eup %4662  ;;  %v3420_v36 = vadd.f32 1.0, %v4661_v28 }
 0xbc5   : > { %v3421_v20 = vadd.f32 1.0, %v4663_v55  ;;  %v4665_v51 = vpop.eup %4664 }
 0xbc6   : > { %4668 = vrcp.f32 %v3420_v36  ;;  %v4667_v39 = vpop.eup %4666  ;;  %v3434_v57 = vadd.f32 1.0, %v4665_v51 }
 0xbc7   : > { %4670 = vrcp.f32 %v3421_v20  ;;  %v3435_v52 = vadd.f32 1.0, %v4667_v39 }
 0xbc8   : > { %4672 = vrcp.f32 %v3434_v57 }
 0xbc9   : > { %4674 = vrcp.f32 %v3435_v52 }
 0xbd0   : > { %v4669_v48 = vpop.eup %4668 }
 0xbd1   : > { %v4671_v60 = vpop.eup %4670 }
 0xbd2   : > { %v4673_v58 = vpop.eup %4672 }
 0xbd3   : > { %v4675_v32 = vpop.eup %4674 }
 0xbd4   : > { %v3449_v0 = vsub.f32 1.0, %v4675_v32  ;;  %v3453_v59 = vmul.f32 %v4675_v32, %v6803_v23 }
 0xbf4   : > { %v3405_v49 = vpop.f32.mrb[44].mxu1 }
 0xbf5   : > { %v3440_v41 = vadd.f32 %v3405_v49, %v7416_v31  ;;  %v3407_v3 = vpop.f32.mrb[45].mxu1  ;;  %v3448_v31 = vsub.f32 1.0, %v4673_v58 }
 0xbf6   : > { %v3441_v1 = vadd.f32 %v3407_v3, %v5986_v45  ;;  %v3409_v17 = vpop.f32.mrb[46].mxu1  ;;  %v3452_v45 = vmul.f32 %v4673_v58, %v6801_v35 }
 0xbf7   : > { %v3442_v56 = vmul.f32 %v4669_v48, %v3440_v41  ;;  %v3410_v38 = vpop.f32.mrb[47].mxu1 }
 0xbf8   : > { %v3443_v42 = vmul.f32 %v4671_v60, %v3441_v1 }
 0xbf9   : > { %v3444_v46 = vadd.f32 %v3442_v56, %v3285_v21 }
 0xbfa   : > { %v3445_v50 = vadd.f32 %v3443_v42, %v3286_v2 }
 0xbfb   : > { %4676 = vtanh.f32 %v3444_v46 }
 0xbfc   : > { %4678 = vtanh.f32 %v3445_v50 }
 0xc05   : > { %v4677_v19 = vpop.eup %4676 }
 0xc06   : > { %v4679_v5 = vpop.eup %4678  ;;  %v3450_v29 = vmul.f32 %v4677_v19, %v3448_v31 }
 0xc07   : > { %v3451_v54 = vmul.f32 %v4679_v5, %v3449_v0 }
 0xc08   : > { %v3454_v24 = vadd.f32 %v3452_v45, %v3450_v29 }
 0xc09   : > { %v3455_v37 = vadd.f32 %v3453_v59, %v3451_v54 }
 0xc0a   : > { %v3456_v11 = vpack.c.bf16 %v3454_v24, %v3454_v24 }
 0xc0b   : > { %v3457_v44 = vpack.c.bf16 %v3455_v37, %v3455_v37 }
 0xc0d   : > { %3625 = vmatprep.mubr.bf16.mxu0 %v3457_v44 }
 0xc0e   : > { %3626 = vmatmul.mubr.bf16.vlgmr.msra.gmra.mrb[48].mxu0 %v3456_v11 }
 0xce1   : > { %v4054_v12 = vpop.f32.mrb[48].mxu0 }
 0xce2   : > { %v4055_v16 = vpop.f32.mrb[49].mxu0 }
 0xce3   : > { %v4056_v7 = vadd.f32 %v4055_v16, %v4054_v12  ;;  %v4057_v27 = vpop.f32.mrb[50].mxu0 }
 0xce4   : > { %v4058_v9 = vpop.f32.mrb[51].mxu0 }
 0xce5   : > { %v3628_v8 = vadd.f32 %v4056_v7, %v4016_v15 }
 0xce7   : > { %3633 = vst [vmem:[#allocation15] sm:$0xff] %v3628_v8 }
 0xce8 PF: > { %p4157_p13 = scmp.eq.s32.totalorder %s5221_s28, 2  ;;  %s5161_s29 = smov [#allocation15]  }
 0xce9   : > { %s3641_s30 = sshll.u32 %s5161_s29, 4  ;;  %s3642_s30 = int_to_ptr.vmem [resolvable:$true] %s3641_s30 }
 0xcea   : > { %s5065_s15 = scalar_lea.vmem %s3642_s30, 128  ;;  %p5072_p6 = scmp.lt.s32.totalorder %s3642_s30, %s3642_s30 }
 0xceb   : > { %p5066_p3 = scmp.ne.s32.totalorder %s3642_s30, %s5065_s15  ;;  %p5073_p7 = scmp.lt.s32.totalorder %s5065_s15, %s5065_s15 }
 0xced   : > { %p5067_p10 = pnand %p5066_p3, %p4157_p13  ;;  %p5074_p8 = por %p5073_p7, %p5072_p6 }
 0xcef   : > { %p5068_p9 = pneg %p5067_p10 }
 0xcf1   : > { %p5075_p11 = pnand %p5074_p8, %p5068_p9 }
 0xcf3   : > { %5078 = shalt.err (!%p5075_p11)
}
 0xcf4   : > { %s5079_s24 = scalar_lea.hbm %s6861_s7, 128 }
 0xcf5   : > { %p5080_p1 = scmp.ne.s32.totalorder %s6861_s7, %s5079_s24  ;;  %p5085_p12 = scmp.lt.u32.totalorder %s5079_s24, %s6861_s7 }
 0xcf7   : > { %p5081_p4 = pnand %p5080_p1, %p4157_p13 }
 0xcf9   : > { %p5082_p5 = pneg %p5081_p4 }
 0xcfb   : > { %p5087_p0 = pnand %p5085_p12, %p5082_p5 }
 0xcfd   : > { %5090 = shalt.err (!%p5087_p0)
}
 0xcfe   : > { %4120 = dma.vmem_to_hbm [thread:$0]  (%p4157_p13), %s3642_s30, 128, %s6861_s7, [#allocation5]  }
 0xcff   : > { %5128 = dma.done.wait (%p4157_p13), [#allocation5], 128  }
 0xd00   : > { %5130 = vsyncadd (%p4157_p13), [#allocation5], 4294967168 }
 0xd01 PF: > { %p23_p2 = scmp.ge.s32.totalorder %s5356_s20, 5   ;;  %s7417_s24 = smov %s5137_s25 }
 0xd02   : > { %s7418_s25 = smov %s5141_s26  ;;  %s7419_s26 = smov %s5366_s14 }
 0xd03   : > { %s7420_s27 = smov %s5356_s20  ;;  %25 = sbr.rel (!%p23_p2) target bundleno = 12 (0xc), region = 126 }
 0xd0a   :  { %3654 = vsyncpa [#allocation4], 1 }
 0xd0b   :  { %3656 = vsyncpa [#allocation4 + $0x1], 1 }
 0xd0c   :  { %3657 = vsyncpa [#allocation7], 1 }
 0xd0d   :  { %3659 = vsyncpa [#allocation7 + $0x1], 1 }
 0xd0e   :  { %3660 = vsyncpa [#allocation10], 1 }
 0xd0f   :  { %3661 = vsyncpa [#allocation13], 1 }
 0xd10   :  { %3662 = vsyncpa [#allocation5], 1 }
 0xd11   :  { %3664 = vsyncpa [#allocation5 + $0x1], 1 }

</bundles_post_ra>
